<compile_context>
chip_gen: v7x
topology: tpu7x:2x2x1
jax: 0.10.0
libtpu: 0.0.40
codegen_flags: <defaults>
</compile_context>

<pallas_src>
import functools

import jax
import jax.numpy as jnp
import numpy as np
from jax.experimental import pallas as pl
from jax.experimental.pallas import tpu as pltpu

# ---- packed layout constants -------------------------------------------------
GP = 128          # per-gate lane padding (one full lane tile per gate)
GC = 4 * GP       # packed gate width, gate order (i, f, g, o) like torch
IP = 128          # padded input-feature width (lane tile)


# ---------------------------------------------------------------------------
# Pallas kernel: single invocation, whole sequence resident in VMEM
# ---------------------------------------------------------------------------
def _lstm_kernel(x_ref, w_ref, b_ref, out_ref, *, T, B):
    """
    x_ref  : (T*B, IP)  bf16  time-major flattened input (zero-padded)
    w_ref  : (640, GC)  bf16  row blocks: [Wih0; Whh0; Wih1; Whh1; Wfc]
                              (i/f/o columns pre-scaled by 0.5; pads are 0)
    b_ref  : (8, GC)    f32   row0 = b0, row1 = b1, row2 = b_fc (cols 0:128)
    out_ref: (B, 128)   f32   FC output, real data in cols 0:O
    """
    f32, bf16 = jnp.float32, jnp.bfloat16

    # Static, tile-aligned slices of the packed weight slab.
    wih0 = w_ref[0:128, :]
    whh0 = w_ref[128:256, :]
    wih1 = w_ref[256:384, :]
    whh1 = w_ref[384:512, :]
    wfc = w_ref[512:640, 0:128]

    b0 = b_ref[0:1, :]
    b1 = jnp.broadcast_to(b_ref[1:2, :], (B, GC))   # hoisted (no per-step bcast)
    bfc = b_ref[2:3, 0:128]

    # Layer-0 input projection for all timesteps at once — off the serial chain.
    x_proj = jnp.dot(x_ref[...], wih0, preferred_element_type=f32) + b0  # (T*B,GC)

    def activate(g, c_prev):
        # g: (B, GC) pre-activations. i/f/o columns are pre-scaled by 0.5 so
        # sigmoid(z) == 0.5*tanh(z/2)+0.5 == 0.5*tanh(g)+0.5  (one EUP op).
        t = jnp.tanh(g)
        i_g = 0.5 * t[:, 0 * GP:1 * GP] + 0.5
        f_g = 0.5 * t[:, 1 * GP:2 * GP] + 0.5
        g_g = t[:, 2 * GP:3 * GP]
        o_g = 0.5 * t[:, 3 * GP:4 * GP] + 0.5
        c_new = f_g * c_prev + i_g * g_g
        h_new = o_g * jnp.tanh(c_new)
        return h_new, c_new

    zeros = jnp.zeros((B, GP), f32)
    h0 = c0 = h1 = c1 = zeros
    rec0 = jnp.zeros((B, GC), f32)      # h0_{-1} @ Whh0 == 0
    rec1 = jnp.zeros((B, GC), f32)      # h1_{-1} @ Whh1 == 0

    # T is a small static constant -> fully unrolled recurrence.
    for t in range(T):
        # ---- layer 0 (recurrent term rec0 was issued at the end of step t-1)
        g0 = x_proj[t * B:(t + 1) * B, :] + rec0
        h0, c0 = activate(g0, c0)
        h0b = h0.astype(bf16)
        if t + 1 < T:
            # for step t+1; overlaps with layer-1 work below
            rec0 = jnp.dot(h0b, whh0, preferred_element_type=f32)

        # ---- layer 1 (rec1 pre-computed at end of step t-1, off this chain)
        g1 = jnp.dot(h0b, wih1, preferred_element_type=f32) + b1 + rec1
        h1, c1 = activate(g1, c1)
        if t + 1 < T:
            # for step t+1; overlaps with layer-0 work of step t+1
            rec1 = jnp.dot(h1.astype(bf16), whh1, preferred_element_type=f32)

    # ---- Final FC exactly once, on the last top-layer hidden state.
    out_ref[...] = (jnp.dot(h1.astype(bf16), wfc, preferred_element_type=f32)
                    + bfc).astype(out_ref.dtype)


# ---------------------------------------------------------------------------
# Wrapper: parameter packing (gate lane-alignment, 0.5 fold, bf16 cast, DMA
# consolidation) + input layout + pallas_call.
# ---------------------------------------------------------------------------
def _pack_gate_cols(w, H, half_ifo):
    """(R, 4H) gate-concatenated (i,f,g,o) -> (R, GC) with one 128-lane block
    per gate; optionally pre-scale the i/f/o columns by 0.5 (sigmoid-as-tanh)."""
    R = w.shape[0]
    out = jnp.zeros((R, GC), jnp.float32)
    for k in range(4):
        blk = w[:, k * H:(k + 1) * H].astype(jnp.float32)
        if half_ifo and k != 2:                    # k==2 is the tanh 'g' gate
            blk = 0.5 * blk
        out = out.at[:, k * GP:k * GP + H].set(blk)
    return out


def _pack_params(params, H, O):
    def rows_to_128(w):
        return jnp.pad(w, ((0, 128 - w.shape[0]), (0, 0)))

    wih0 = rows_to_128(_pack_gate_cols(params["wih0"], H, True))
    whh0 = rows_to_128(_pack_gate_cols(params["whh0"], H, True))
    wih1 = rows_to_128(_pack_gate_cols(params["wih1"], H, True))
    whh1 = rows_to_128(_pack_gate_cols(params["whh1"], H, True))
    wfc = jnp.zeros((128, GC), jnp.float32).at[:H, :O].set(params["wfc"])
    w_packed = jnp.concatenate([wih0, whh0, wih1, whh1, wfc],
                               axis=0).astype(jnp.bfloat16)          # (640, GC)

    b0 = _pack_gate_cols(params["b0"], H, True)
    b1 = _pack_gate_cols(params["b1"], H, True)
    bfc = jnp.zeros((1, GC), jnp.float32).at[:, :O].set(params["bfc"])
    b_packed = jnp.concatenate(
        [b0, b1, bfc, jnp.zeros((5, GC), jnp.float32)], axis=0)      # (8, GC)
    return w_packed, b_packed


def lstm_forward(x, params):
    """x: (B, T, I) float32, batch-first like the PyTorch module."""
    B, T, I = x.shape
    H = params["whh0"].shape[-1] // 4
    O = params["wfc"].shape[-1]
    b_pad = ((B + 7) // 8) * 8

    # time-major, zero-pad batch (sublanes) + features (lane tile), bf16.
    # Padding rows/cols are inert (zero weights/bias, independent batch rows).
    x_tm = jnp.transpose(x, (1, 0, 2))                                 # (T,B,I)
    x_tm = jnp.pad(x_tm, ((0, 0), (0, b_pad - B), (0, IP - I)))        # (T,Bp,IP)
    x_flat = x_tm.reshape(T * b_pad, IP).astype(jnp.bfloat16)

    w_packed, b_packed = _pack_params(params, H, O)

    kernel = functools.partial(_lstm_kernel, T=T, B=b_pad)
    vmem = lambda: pl.BlockSpec(memory_space=pltpu.MemorySpace.VMEM)

    out_pad = pl.pallas_call(
        kernel,
        out_shape=jax.ShapeDtypeStruct((b_pad, 128), jnp.float32),
        in_specs=[vmem(), vmem(), vmem()],
        out_specs=vmem(),
    )(x_flat, w_packed, b_packed)
    return out_pad[:B, :O]


# ---------------------------------------------------------------------------
# Deterministic parameter init (PyTorch-style uniform(-1/sqrt(H), 1/sqrt(H)))
# Gate-concatenated layout, gate order (i, f, g, o); b = b_ih + b_hh fused.
# ---------------------------------------------------------------------------
def init_params(key, input_dim, hidden_dim, output_dim):
    H = hidden_dim
    s = 1.0 / np.sqrt(H)
    ks = jax.random.split(key, 8)
    u = lambda k, shape: jax.random.uniform(k, shape, jnp.float32, -s, s)
    return {
        "wih0": u(ks[0], (input_dim, 4 * H)),
        "whh0": u(ks[1], (H, 4 * H)),
        "b0":   u(ks[2], (1, 4 * H)),
        "wih1": u(ks[3], (H, 4 * H)),
        "whh1": u(ks[4], (H, 4 * H)),
        "b1":   u(ks[5], (1, 4 * H)),
        "wfc":  u(ks[6], (H, output_dim)),
        "bfc":  u(ks[7], (1, output_dim)),
    }


# ---------------------------------------------------------------------------
# Pure-JAX reference (mirrors torch.nn.LSTM math). `mxu_dtype=bfloat16` mirrors
# the kernel's bf16 MXU operands (f32 accumulation) for a tight check.
# ---------------------------------------------------------------------------
def lstm_reference(x, params, mxu_dtype=jnp.float32):
    B, T, I = x.shape
    H = params["whh0"].shape[-1] // 4

    def mm(a, w):
        return jnp.dot(a.astype(mxu_dtype), w.astype(mxu_dtype),
                       preferred_element_type=jnp.float32)

    def cell(pre, h, c, whh):
        g = pre + mm(h, whh)
        i_g = jax.nn.sigmoid(g[:, 0 * H:1 * H])
        f_g = jax.nn.sigmoid(g[:, 1 * H:2 * H])
        g_g = jnp.tanh(g[:, 2 * H:3 * H])
        o_g = jax.nn.sigmoid(g[:, 3 * H:4 * H])
        c_new = f_g * c + i_g * g_g
        return o_g * jnp.tanh(c_new), c_new

    h0 = c0 = h1 = c1 = jnp.zeros((B, H), jnp.float32)
    for t in range(T):
        pre0 = mm(x[:, t, :], params["wih0"]) + params["b0"]
        h0, c0 = cell(pre0, h0, c0, params["whh0"])
        pre1 = mm(h0, params["wih1"]) + params["b1"]
        h1, c1 = cell(pre1, h1, c1, params["whh1"])
    return mm(h1, params["wfc"]) + params["bfc"]


if __name__ == "__main__":
    # shapes consistent with the module defaults:
    # input_dim=1, hidden_dim=10, output_dim=1, num_layers=2; batch=2, seq=8
    B, T, I, H, O = 2, 8, 1, 10, 1

    key = jax.random.PRNGKey(0)
    k_x, k_p = jax.random.split(key)
    x = jax.random.normal(k_x, (B, T, I), jnp.float32)
    params = init_params(k_p, I, H, O)

    out = jax.block_until_ready(jax.jit(lstm_forward)(x, params))
    ref_bf16 = lstm_reference(x, params, mxu_dtype=jnp.bfloat16)  # kernel-arith mirror
    ref_f32 = lstm_reference(x, params, mxu_dtype=jnp.float32)    # torch-math semantics

    assert out.shape == (B, O), out.shape
    assert jnp.allclose(out, ref_bf16, atol=2e-3, rtol=2e-3), (out, ref_bf16)
    assert jnp.allclose(out, ref_f32, atol=3e-2, rtol=3e-2), (out, ref_f32)

    print("KERNEL_OK")
</pallas_src>

<mosaic_0001>
module attributes {stable_mosaic.version = 11 : i64} {
  func.func @_lstm_kernel(%arg0: memref<64x128xbf16, #tpu.memory_space<vmem>>, %arg1: memref<640x512xbf16, #tpu.memory_space<vmem>>, %arg2: memref<8x512xf32, #tpu.memory_space<vmem>>, %arg3: memref<8x128xf32, #tpu.memory_space<vmem>>) attributes {dimension_semantics = [], scalar_prefetch = 0 : i64, scratch_operands = 0 : i64, tpu.core_type = #tpu.core_type<tc>} {
    %c0 = arith.constant 0 : index
    %c0_0 = arith.constant 0 : index
    %0 = vector.load %arg1[%c0, %c0_0] : memref<640x512xbf16, #tpu.memory_space<vmem>>, vector<128x512xbf16>
    %c128 = arith.constant 128 : index
    %c0_1 = arith.constant 0 : index
    %1 = vector.load %arg1[%c128, %c0_1] : memref<640x512xbf16, #tpu.memory_space<vmem>>, vector<128x512xbf16>
    %c256 = arith.constant 256 : index
    %c0_2 = arith.constant 0 : index
    %2 = vector.load %arg1[%c256, %c0_2] : memref<640x512xbf16, #tpu.memory_space<vmem>>, vector<128x512xbf16>
    %c384 = arith.constant 384 : index
    %c0_3 = arith.constant 0 : index
    %3 = vector.load %arg1[%c384, %c0_3] : memref<640x512xbf16, #tpu.memory_space<vmem>>, vector<128x512xbf16>
    %c512 = arith.constant 512 : index
    %c0_4 = arith.constant 0 : index
    %4 = vector.load %arg1[%c512, %c0_4] : memref<640x512xbf16, #tpu.memory_space<vmem>>, vector<128x128xbf16>
    %c0_5 = arith.constant 0 : index
    %c0_6 = arith.constant 0 : index
    %5 = vector.load %arg2[%c0_5, %c0_6] : memref<8x512xf32, #tpu.memory_space<vmem>>, vector<1x512xf32>
    %c1 = arith.constant 1 : index
    %c0_7 = arith.constant 0 : index
    %6 = vector.load %arg2[%c1, %c0_7] : memref<8x512xf32, #tpu.memory_space<vmem>>, vector<1x512xf32>
    %7 = vector.shape_cast %6 : vector<1x512xf32> to vector<1x512xf32>
    %8 = vector.broadcast %7 : vector<1x512xf32> to vector<8x512xf32>
    %c2 = arith.constant 2 : index
    %c0_8 = arith.constant 0 : index
    %9 = vector.load %arg2[%c2, %c0_8] : memref<8x512xf32, #tpu.memory_space<vmem>>, vector<1x128xf32>
    %c0_9 = arith.constant 0 : index
    %c0_10 = arith.constant 0 : index
    %10 = vector.load %arg0[%c0_9, %c0_10] : memref<64x128xbf16, #tpu.memory_space<vmem>>, vector<64x128xbf16>
    %cst = arith.constant dense<0.000000e+00> : vector<64x512xf32>
    %11 = tpu.matmul %10, %0, %cst {dimension_numbers = #tpu.dot_dimension_numbers<[1], [0], [0], [1], [0, 0, 1, 1], [], []>} : vector<64x128xbf16>, vector<128x512xbf16>, vector<64x512xf32> -> vector<64x512xf32>
    %12 = vector.broadcast %5 : vector<1x512xf32> to vector<64x512xf32>
    %13 = arith.addf %11, %12 : vector<64x512xf32>
    %cst_11 = arith.constant 0.000000e+00 : f32
    %14 = vector.broadcast %cst_11 : f32 to vector<8x128xf32>
    %cst_12 = arith.constant 0.000000e+00 : f32
    %15 = vector.broadcast %cst_12 : f32 to vector<8x512xf32>
    %cst_13 = arith.constant 0.000000e+00 : f32
    %16 = vector.broadcast %cst_13 : f32 to vector<8x512xf32>
    %17 = vector.extract_strided_slice %13 {offsets = [0, 0], sizes = [8, 512], strides = [1, 1]} : vector<64x512xf32> to vector<8x512xf32>
    %18 = arith.addf %17, %15 : vector<8x512xf32>
    %19 = math.tanh %18 : vector<8x512xf32>
    %20 = vector.extract_strided_slice %19 {offsets = [0, 0], sizes = [8, 128], strides = [1, 1]} : vector<8x512xf32> to vector<8x128xf32>
    %cst_14 = arith.constant 5.000000e-01 : f32
    %21 = vector.broadcast %cst_14 : f32 to vector<8x128xf32>
    %22 = arith.mulf %21, %20 : vector<8x128xf32>
    %cst_15 = arith.constant 5.000000e-01 : f32
    %23 = vector.broadcast %cst_15 : f32 to vector<8x128xf32>
    %24 = arith.addf %22, %23 : vector<8x128xf32>
    %25 = vector.extract_strided_slice %19 {offsets = [0, 128], sizes = [8, 128], strides = [1, 1]} : vector<8x512xf32> to vector<8x128xf32>
    %cst_16 = arith.constant 5.000000e-01 : f32
    %26 = vector.broadcast %cst_16 : f32 to vector<8x128xf32>
    %27 = arith.mulf %26, %25 : vector<8x128xf32>
    %cst_17 = arith.constant 5.000000e-01 : f32
    %28 = vector.broadcast %cst_17 : f32 to vector<8x128xf32>
    %29 = arith.addf %27, %28 : vector<8x128xf32>
    %30 = vector.extract_strided_slice %19 {offsets = [0, 256], sizes = [8, 128], strides = [1, 1]} : vector<8x512xf32> to vector<8x128xf32>
    %31 = vector.extract_strided_slice %19 {offsets = [0, 384], sizes = [8, 128], strides = [1, 1]} : vector<8x512xf32> to vector<8x128xf32>
    %cst_18 = arith.constant 5.000000e-01 : f32
    %32 = vector.broadcast %cst_18 : f32 to vector<8x128xf32>
    %33 = arith.mulf %32, %31 : vector<8x128xf32>
    %cst_19 = arith.constant 5.000000e-01 : f32
    %34 = vector.broadcast %cst_19 : f32 to vector<8x128xf32>
    %35 = arith.addf %33, %34 : vector<8x128xf32>
    %36 = arith.mulf %29, %14 : vector<8x128xf32>
    %37 = arith.mulf %24, %30 : vector<8x128xf32>
    %38 = arith.addf %36, %37 : vector<8x128xf32>
    %39 = math.tanh %38 : vector<8x128xf32>
    %40 = arith.mulf %35, %39 : vector<8x128xf32>
    %41 = arith.truncf %40 : vector<8x128xf32> to vector<8x128xbf16>
    %cst_20 = arith.constant dense<0.000000e+00> : vector<8x512xf32>
    %42 = tpu.matmul %41, %1, %cst_20 {dimension_numbers = #tpu.dot_dimension_numbers<[1], [0], [0], [1], [0, 0, 1, 1], [], []>} : vector<8x128xbf16>, vector<128x512xbf16>, vector<8x512xf32> -> vector<8x512xf32>
    %cst_21 = arith.constant dense<0.000000e+00> : vector<8x512xf32>
    %43 = tpu.matmul %41, %2, %cst_21 {dimension_numbers = #tpu.dot_dimension_numbers<[1], [0], [0], [1], [0, 0, 1, 1], [], []>} : vector<8x128xbf16>, vector<128x512xbf16>, vector<8x512xf32> -> vector<8x512xf32>
    %44 = arith.addf %43, %8 : vector<8x512xf32>
    %45 = arith.addf %44, %16 : vector<8x512xf32>
    %46 = math.tanh %45 : vector<8x512xf32>
    %47 = vector.extract_strided_slice %46 {offsets = [0, 0], sizes = [8, 128], strides = [1, 1]} : vector<8x512xf32> to vector<8x128xf32>
    %cst_22 = arith.constant 5.000000e-01 : f32
    %48 = vector.broadcast %cst_22 : f32 to vector<8x128xf32>
    %49 = arith.mulf %48, %47 : vector<8x128xf32>
    %cst_23 = arith.constant 5.000000e-01 : f32
    %50 = vector.broadcast %cst_23 : f32 to vector<8x128xf32>
    %51 = arith.addf %49, %50 : vector<8x128xf32>
    %52 = vector.extract_strided_slice %46 {offsets = [0, 128], sizes = [8, 128], strides = [1, 1]} : vector<8x512xf32> to vector<8x128xf32>
    %cst_24 = arith.constant 5.000000e-01 : f32
    %53 = vector.broadcast %cst_24 : f32 to vector<8x128xf32>
    %54 = arith.mulf %53, %52 : vector<8x128xf32>
    %cst_25 = arith.constant 5.000000e-01 : f32
    %55 = vector.broadcast %cst_25 : f32 to vector<8x128xf32>
    %56 = arith.addf %54, %55 : vector<8x128xf32>
    %57 = vector.extract_strided_slice %46 {offsets = [0, 256], sizes = [8, 128], strides = [1, 1]} : vector<8x512xf32> to vector<8x128xf32>
    %58 = vector.extract_strided_slice %46 {offsets = [0, 384], sizes = [8, 128], strides = [1, 1]} : vector<8x512xf32> to vector<8x128xf32>
    %cst_26 = arith.constant 5.000000e-01 : f32
    %59 = vector.broadcast %cst_26 : f32 to vector<8x128xf32>
    %60 = arith.mulf %59, %58 : vector<8x128xf32>
    %cst_27 = arith.constant 5.000000e-01 : f32
    %61 = vector.broadcast %cst_27 : f32 to vector<8x128xf32>
    %62 = arith.addf %60, %61 : vector<8x128xf32>
    %63 = arith.mulf %56, %14 : vector<8x128xf32>
    %64 = arith.mulf %51, %57 : vector<8x128xf32>
    %65 = arith.addf %63, %64 : vector<8x128xf32>
    %66 = math.tanh %65 : vector<8x128xf32>
    %67 = arith.mulf %62, %66 : vector<8x128xf32>
    %68 = arith.truncf %67 : vector<8x128xf32> to vector<8x128xbf16>
    %cst_28 = arith.constant dense<0.000000e+00> : vector<8x512xf32>
    %69 = tpu.matmul %68, %3, %cst_28 {dimension_numbers = #tpu.dot_dimension_numbers<[1], [0], [0], [1], [0, 0, 1, 1], [], []>} : vector<8x128xbf16>, vector<128x512xbf16>, vector<8x512xf32> -> vector<8x512xf32>
    %70 = vector.extract_strided_slice %13 {offsets = [8, 0], sizes = [8, 512], strides = [1, 1]} : vector<64x512xf32> to vector<8x512xf32>
    %71 = arith.addf %70, %42 : vector<8x512xf32>
    %72 = math.tanh %71 : vector<8x512xf32>
    %73 = vector.extract_strided_slice %72 {offsets = [0, 0], sizes = [8, 128], strides = [1, 1]} : vector<8x512xf32> to vector<8x128xf32>
    %cst_29 = arith.constant 5.000000e-01 : f32
    %74 = vector.broadcast %cst_29 : f32 to vector<8x128xf32>
    %75 = arith.mulf %74, %73 : vector<8x128xf32>
    %cst_30 = arith.constant 5.000000e-01 : f32
    %76 = vector.broadcast %cst_30 : f32 to vector<8x128xf32>
    %77 = arith.addf %75, %76 : vector<8x128xf32>
    %78 = vector.extract_strided_slice %72 {offsets = [0, 128], sizes = [8, 128], strides = [1, 1]} : vector<8x512xf32> to vector<8x128xf32>
    %cst_31 = arith.constant 5.000000e-01 : f32
    %79 = vector.broadcast %cst_31 : f32 to vector<8x128xf32>
    %80 = arith.mulf %79, %78 : vector<8x128xf32>
    %cst_32 = arith.constant 5.000000e-01 : f32
    %81 = vector.broadcast %cst_32 : f32 to vector<8x128xf32>
    %82 = arith.addf %80, %81 : vector<8x128xf32>
    %83 = vector.extract_strided_slice %72 {offsets = [0, 256], sizes = [8, 128], strides = [1, 1]} : vector<8x512xf32> to vector<8x128xf32>
    %84 = vector.extract_strided_slice %72 {offsets = [0, 384], sizes = [8, 128], strides = [1, 1]} : vector<8x512xf32> to vector<8x128xf32>
    %cst_33 = arith.constant 5.000000e-01 : f32
    %85 = vector.broadcast %cst_33 : f32 to vector<8x128xf32>
    %86 = arith.mulf %85, %84 : vector<8x128xf32>
    %cst_34 = arith.constant 5.000000e-01 : f32
    %87 = vector.broadcast %cst_34 : f32 to vector<8x128xf32>
    %88 = arith.addf %86, %87 : vector<8x128xf32>
    %89 = arith.mulf %82, %38 : vector<8x128xf32>
    %90 = arith.mulf %77, %83 : vector<8x128xf32>
    %91 = arith.addf %89, %90 : vector<8x128xf32>
    %92 = math.tanh %91 : vector<8x128xf32>
    %93 = arith.mulf %88, %92 : vector<8x128xf32>
    %94 = arith.truncf %93 : vector<8x128xf32> to vector<8x128xbf16>
    %cst_35 = arith.constant dense<0.000000e+00> : vector<8x512xf32>
    %95 = tpu.matmul %94, %1, %cst_35 {dimension_numbers = #tpu.dot_dimension_numbers<[1], [0], [0], [1], [0, 0, 1, 1], [], []>} : vector<8x128xbf16>, vector<128x512xbf16>, vector<8x512xf32> -> vector<8x512xf32>
    %cst_36 = arith.constant dense<0.000000e+00> : vector<8x512xf32>
    %96 = tpu.matmul %94, %2, %cst_36 {dimension_numbers = #tpu.dot_dimension_numbers<[1], [0], [0], [1], [0, 0, 1, 1], [], []>} : vector<8x128xbf16>, vector<128x512xbf16>, vector<8x512xf32> -> vector<8x512xf32>
    %97 = arith.addf %96, %8 : vector<8x512xf32>
    %98 = arith.addf %97, %69 : vector<8x512xf32>
    %99 = math.tanh %98 : vector<8x512xf32>
    %100 = vector.extract_strided_slice %99 {offsets = [0, 0], sizes = [8, 128], strides = [1, 1]} : vector<8x512xf32> to vector<8x128xf32>
    %cst_37 = arith.constant 5.000000e-01 : f32
    %101 = vector.broadcast %cst_37 : f32 to vector<8x128xf32>
    %102 = arith.mulf %101, %100 : vector<8x128xf32>
    %cst_38 = arith.constant 5.000000e-01 : f32
    %103 = vector.broadcast %cst_38 : f32 to vector<8x128xf32>
    %104 = arith.addf %102, %103 : vector<8x128xf32>
    %105 = vector.extract_strided_slice %99 {offsets = [0, 128], sizes = [8, 128], strides = [1, 1]} : vector<8x512xf32> to vector<8x128xf32>
    %cst_39 = arith.constant 5.000000e-01 : f32
    %106 = vector.broadcast %cst_39 : f32 to vector<8x128xf32>
    %107 = arith.mulf %106, %105 : vector<8x128xf32>
    %cst_40 = arith.constant 5.000000e-01 : f32
    %108 = vector.broadcast %cst_40 : f32 to vector<8x128xf32>
    %109 = arith.addf %107, %108 : vector<8x128xf32>
    %110 = vector.extract_strided_slice %99 {offsets = [0, 256], sizes = [8, 128], strides = [1, 1]} : vector<8x512xf32> to vector<8x128xf32>
    %111 = vector.extract_strided_slice %99 {offsets = [0, 384], sizes = [8, 128], strides = [1, 1]} : vector<8x512xf32> to vector<8x128xf32>
    %cst_41 = arith.constant 5.000000e-01 : f32
    %112 = vector.broadcast %cst_41 : f32 to vector<8x128xf32>
    %113 = arith.mulf %112, %111 : vector<8x128xf32>
    %cst_42 = arith.constant 5.000000e-01 : f32
    %114 = vector.broadcast %cst_42 : f32 to vector<8x128xf32>
    %115 = arith.addf %113, %114 : vector<8x128xf32>
    %116 = arith.mulf %109, %65 : vector<8x128xf32>
    %117 = arith.mulf %104, %110 : vector<8x128xf32>
    %118 = arith.addf %116, %117 : vector<8x128xf32>
    %119 = math.tanh %118 : vector<8x128xf32>
    %120 = arith.mulf %115, %119 : vector<8x128xf32>
    %121 = arith.truncf %120 : vector<8x128xf32> to vector<8x128xbf16>
    %cst_43 = arith.constant dense<0.000000e+00> : vector<8x512xf32>
    %122 = tpu.matmul %121, %3, %cst_43 {dimension_numbers = #tpu.dot_dimension_numbers<[1], [0], [0], [1], [0, 0, 1, 1], [], []>} : vector<8x128xbf16>, vector<128x512xbf16>, vector<8x512xf32> -> vector<8x512xf32>
    %123 = vector.extract_strided_slice %13 {offsets = [16, 0], sizes = [8, 512], strides = [1, 1]} : vector<64x512xf32> to vector<8x512xf32>
    %124 = arith.addf %123, %95 : vector<8x512xf32>
    %125 = math.tanh %124 : vector<8x512xf32>
    %126 = vector.extract_strided_slice %125 {offsets = [0, 0], sizes = [8, 128], strides = [1, 1]} : vector<8x512xf32> to vector<8x128xf32>
    %cst_44 = arith.constant 5.000000e-01 : f32
    %127 = vector.broadcast %cst_44 : f32 to vector<8x128xf32>
    %128 = arith.mulf %127, %126 : vector<8x128xf32>
    %cst_45 = arith.constant 5.000000e-01 : f32
    %129 = vector.broadcast %cst_45 : f32 to vector<8x128xf32>
    %130 = arith.addf %128, %129 : vector<8x128xf32>
    %131 = vector.extract_strided_slice %125 {offsets = [0, 128], sizes = [8, 128], strides = [1, 1]} : vector<8x512xf32> to vector<8x128xf32>
    %cst_46 = arith.constant 5.000000e-01 : f32
    %132 = vector.broadcast %cst_46 : f32 to vector<8x128xf32>
    %133 = arith.mulf %132, %131 : vector<8x128xf32>
    %cst_47 = arith.constant 5.000000e-01 : f32
    %134 = vector.broadcast %cst_47 : f32 to vector<8x128xf32>
    %135 = arith.addf %133, %134 : vector<8x128xf32>
    %136 = vector.extract_strided_slice %125 {offsets = [0, 256], sizes = [8, 128], strides = [1, 1]} : vector<8x512xf32> to vector<8x128xf32>
    %137 = vector.extract_strided_slice %125 {offsets = [0, 384], sizes = [8, 128], strides = [1, 1]} : vector<8x512xf32> to vector<8x128xf32>
    %cst_48 = arith.constant 5.000000e-01 : f32
    %138 = vector.broadcast %cst_48 : f32 to vector<8x128xf32>
    %139 = arith.mulf %138, %137 : vector<8x128xf32>
    %cst_49 = arith.constant 5.000000e-01 : f32
    %140 = vector.broadcast %cst_49 : f32 to vector<8x128xf32>
    %141 = arith.addf %139, %140 : vector<8x128xf32>
    %142 = arith.mulf %135, %91 : vector<8x128xf32>
    %143 = arith.mulf %130, %136 : vector<8x128xf32>
    %144 = arith.addf %142, %143 : vector<8x128xf32>
    %145 = math.tanh %144 : vector<8x128xf32>
    %146 = arith.mulf %141, %145 : vector<8x128xf32>
    %147 = arith.truncf %146 : vector<8x128xf32> to vector<8x128xbf16>
    %cst_50 = arith.constant dense<0.000000e+00> : vector<8x512xf32>
    %148 = tpu.matmul %147, %1, %cst_50 {dimension_numbers = #tpu.dot_dimension_numbers<[1], [0], [0], [1], [0, 0, 1, 1], [], []>} : vector<8x128xbf16>, vector<128x512xbf16>, vector<8x512xf32> -> vector<8x512xf32>
    %cst_51 = arith.constant dense<0.000000e+00> : vector<8x512xf32>
    %149 = tpu.matmul %147, %2, %cst_51 {dimension_numbers = #tpu.dot_dimension_numbers<[1], [0], [0], [1], [0, 0, 1, 1], [], []>} : vector<8x128xbf16>, vector<128x512xbf16>, vector<8x512xf32> -> vector<8x512xf32>
    %150 = arith.addf %149, %8 : vector<8x512xf32>
    %151 = arith.addf %150, %122 : vector<8x512xf32>
    %152 = math.tanh %151 : vector<8x512xf32>
    %153 = vector.extract_strided_slice %152 {offsets = [0, 0], sizes = [8, 128], strides = [1, 1]} : vector<8x512xf32> to vector<8x128xf32>
    %cst_52 = arith.constant 5.000000e-01 : f32
    %154 = vector.broadcast %cst_52 : f32 to vector<8x128xf32>
    %155 = arith.mulf %154, %153 : vector<8x128xf32>
    %cst_53 = arith.constant 5.000000e-01 : f32
    %156 = vector.broadcast %cst_53 : f32 to vector<8x128xf32>
    %157 = arith.addf %155, %156 : vector<8x128xf32>
    %158 = vector.extract_strided_slice %152 {offsets = [0, 128], sizes = [8, 128], strides = [1, 1]} : vector<8x512xf32> to vector<8x128xf32>
    %cst_54 = arith.constant 5.000000e-01 : f32
    %159 = vector.broadcast %cst_54 : f32 to vector<8x128xf32>
    %160 = arith.mulf %159, %158 : vector<8x128xf32>
    %cst_55 = arith.constant 5.000000e-01 : f32
    %161 = vector.broadcast %cst_55 : f32 to vector<8x128xf32>
    %162 = arith.addf %160, %161 : vector<8x128xf32>
    %163 = vector.extract_strided_slice %152 {offsets = [0, 256], sizes = [8, 128], strides = [1, 1]} : vector<8x512xf32> to vector<8x128xf32>
    %164 = vector.extract_strided_slice %152 {offsets = [0, 384], sizes = [8, 128], strides = [1, 1]} : vector<8x512xf32> to vector<8x128xf32>
    %cst_56 = arith.constant 5.000000e-01 : f32
    %165 = vector.broadcast %cst_56 : f32 to vector<8x128xf32>
    %166 = arith.mulf %165, %164 : vector<8x128xf32>
    %cst_57 = arith.constant 5.000000e-01 : f32
    %167 = vector.broadcast %cst_57 : f32 to vector<8x128xf32>
    %168 = arith.addf %166, %167 : vector<8x128xf32>
    %169 = arith.mulf %162, %118 : vector<8x128xf32>
    %170 = arith.mulf %157, %163 : vector<8x128xf32>
    %171 = arith.addf %169, %170 : vector<8x128xf32>
    %172 = math.tanh %171 : vector<8x128xf32>
    %173 = arith.mulf %168, %172 : vector<8x128xf32>
    %174 = arith.truncf %173 : vector<8x128xf32> to vector<8x128xbf16>
    %cst_58 = arith.constant dense<0.000000e+00> : vector<8x512xf32>
    %175 = tpu.matmul %174, %3, %cst_58 {dimension_numbers = #tpu.dot_dimension_numbers<[1], [0], [0], [1], [0, 0, 1, 1], [], []>} : vector<8x128xbf16>, vector<128x512xbf16>, vector<8x512xf32> -> vector<8x512xf32>
    %176 = vector.extract_strided_slice %13 {offsets = [24, 0], sizes = [8, 512], strides = [1, 1]} : vector<64x512xf32> to vector<8x512xf32>
    %177 = arith.addf %176, %148 : vector<8x512xf32>
    %178 = math.tanh %177 : vector<8x512xf32>
    %179 = vector.extract_strided_slice %178 {offsets = [0, 0], sizes = [8, 128], strides = [1, 1]} : vector<8x512xf32> to vector<8x128xf32>
    %cst_59 = arith.constant 5.000000e-01 : f32
    %180 = vector.broadcast %cst_59 : f32 to vector<8x128xf32>
    %181 = arith.mulf %180, %179 : vector<8x128xf32>
    %cst_60 = arith.constant 5.000000e-01 : f32
    %182 = vector.broadcast %cst_60 : f32 to vector<8x128xf32>
    %183 = arith.addf %181, %182 : vector<8x128xf32>
    %184 = vector.extract_strided_slice %178 {offsets = [0, 128], sizes = [8, 128], strides = [1, 1]} : vector<8x512xf32> to vector<8x128xf32>
    %cst_61 = arith.constant 5.000000e-01 : f32
    %185 = vector.broadcast %cst_61 : f32 to vector<8x128xf32>
    %186 = arith.mulf %185, %184 : vector<8x128xf32>
    %cst_62 = arith.constant 5.000000e-01 : f32
    %187 = vector.broadcast %cst_62 : f32 to vector<8x128xf32>
    %188 = arith.addf %186, %187 : vector<8x128xf32>
    %189 = vector.extract_strided_slice %178 {offsets = [0, 256], sizes = [8, 128], strides = [1, 1]} : vector<8x512xf32> to vector<8x128xf32>
    %190 = vector.extract_strided_slice %178 {offsets = [0, 384], sizes = [8, 128], strides = [1, 1]} : vector<8x512xf32> to vector<8x128xf32>
    %cst_63 = arith.constant 5.000000e-01 : f32
    %191 = vector.broadcast %cst_63 : f32 to vector<8x128xf32>
    %192 = arith.mulf %191, %190 : vector<8x128xf32>
    %cst_64 = arith.constant 5.000000e-01 : f32
    %193 = vector.broadcast %cst_64 : f32 to vector<8x128xf32>
    %194 = arith.addf %192, %193 : vector<8x128xf32>
    %195 = arith.mulf %188, %144 : vector<8x128xf32>
    %196 = arith.mulf %183, %189 : vector<8x128xf32>
    %197 = arith.addf %195, %196 : vector<8x128xf32>
    %198 = math.tanh %197 : vector<8x128xf32>
    %199 = arith.mulf %194, %198 : vector<8x128xf32>
    %200 = arith.truncf %199 : vector<8x128xf32> to vector<8x128xbf16>
    %cst_65 = arith.constant dense<0.000000e+00> : vector<8x512xf32>
    %201 = tpu.matmul %200, %1, %cst_65 {dimension_numbers = #tpu.dot_dimension_numbers<[1], [0], [0], [1], [0, 0, 1, 1], [], []>} : vector<8x128xbf16>, vector<128x512xbf16>, vector<8x512xf32> -> vector<8x512xf32>
    %cst_66 = arith.constant dense<0.000000e+00> : vector<8x512xf32>
    %202 = tpu.matmul %200, %2, %cst_66 {dimension_numbers = #tpu.dot_dimension_numbers<[1], [0], [0], [1], [0, 0, 1, 1], [], []>} : vector<8x128xbf16>, vector<128x512xbf16>, vector<8x512xf32> -> vector<8x512xf32>
    %203 = arith.addf %202, %8 : vector<8x512xf32>
    %204 = arith.addf %203, %175 : vector<8x512xf32>
    %205 = math.tanh %204 : vector<8x512xf32>
    %206 = vector.extract_strided_slice %205 {offsets = [0, 0], sizes = [8, 128], strides = [1, 1]} : vector<8x512xf32> to vector<8x128xf32>
    %cst_67 = arith.constant 5.000000e-01 : f32
    %207 = vector.broadcast %cst_67 : f32 to vector<8x128xf32>
    %208 = arith.mulf %207, %206 : vector<8x128xf32>
    %cst_68 = arith.constant 5.000000e-01 : f32
    %209 = vector.broadcast %cst_68 : f32 to vector<8x128xf32>
    %210 = arith.addf %208, %209 : vector<8x128xf32>
    %211 = vector.extract_strided_slice %205 {offsets = [0, 128], sizes = [8, 128], strides = [1, 1]} : vector<8x512xf32> to vector<8x128xf32>
    %cst_69 = arith.constant 5.000000e-01 : f32
    %212 = vector.broadcast %cst_69 : f32 to vector<8x128xf32>
    %213 = arith.mulf %212, %211 : vector<8x128xf32>
    %cst_70 = arith.constant 5.000000e-01 : f32
    %214 = vector.broadcast %cst_70 : f32 to vector<8x128xf32>
    %215 = arith.addf %213, %214 : vector<8x128xf32>
    %216 = vector.extract_strided_slice %205 {offsets = [0, 256], sizes = [8, 128], strides = [1, 1]} : vector<8x512xf32> to vector<8x128xf32>
    %217 = vector.extract_strided_slice %205 {offsets = [0, 384], sizes = [8, 128], strides = [1, 1]} : vector<8x512xf32> to vector<8x128xf32>
    %cst_71 = arith.constant 5.000000e-01 : f32
    %218 = vector.broadcast %cst_71 : f32 to vector<8x128xf32>
    %219 = arith.mulf %218, %217 : vector<8x128xf32>
    %cst_72 = arith.constant 5.000000e-01 : f32
    %220 = vector.broadcast %cst_72 : f32 to vector<8x128xf32>
    %221 = arith.addf %219, %220 : vector<8x128xf32>
    %222 = arith.mulf %215, %171 : vector<8x128xf32>
    %223 = arith.mulf %210, %216 : vector<8x128xf32>
    %224 = arith.addf %222, %223 : vector<8x128xf32>
    %225 = math.tanh %224 : vector<8x128xf32>
    %226 = arith.mulf %221, %225 : vector<8x128xf32>
    %227 = arith.truncf %226 : vector<8x128xf32> to vector<8x128xbf16>
    %cst_73 = arith.constant dense<0.000000e+00> : vector<8x512xf32>
    %228 = tpu.matmul %227, %3, %cst_73 {dimension_numbers = #tpu.dot_dimension_numbers<[1], [0], [0], [1], [0, 0, 1, 1], [], []>} : vector<8x128xbf16>, vector<128x512xbf16>, vector<8x512xf32> -> vector<8x512xf32>
    %229 = vector.extract_strided_slice %13 {offsets = [32, 0], sizes = [8, 512], strides = [1, 1]} : vector<64x512xf32> to vector<8x512xf32>
    %230 = arith.addf %229, %201 : vector<8x512xf32>
    %231 = math.tanh %230 : vector<8x512xf32>
    %232 = vector.extract_strided_slice %231 {offsets = [0, 0], sizes = [8, 128], strides = [1, 1]} : vector<8x512xf32> to vector<8x128xf32>
    %cst_74 = arith.constant 5.000000e-01 : f32
    %233 = vector.broadcast %cst_74 : f32 to vector<8x128xf32>
    %234 = arith.mulf %233, %232 : vector<8x128xf32>
    %cst_75 = arith.constant 5.000000e-01 : f32
    %235 = vector.broadcast %cst_75 : f32 to vector<8x128xf32>
    %236 = arith.addf %234, %235 : vector<8x128xf32>
    %237 = vector.extract_strided_slice %231 {offsets = [0, 128], sizes = [8, 128], strides = [1, 1]} : vector<8x512xf32> to vector<8x128xf32>
    %cst_76 = arith.constant 5.000000e-01 : f32
    %238 = vector.broadcast %cst_76 : f32 to vector<8x128xf32>
    %239 = arith.mulf %238, %237 : vector<8x128xf32>
    %cst_77 = arith.constant 5.000000e-01 : f32
    %240 = vector.broadcast %cst_77 : f32 to vector<8x128xf32>
    %241 = arith.addf %239, %240 : vector<8x128xf32>
    %242 = vector.extract_strided_slice %231 {offsets = [0, 256], sizes = [8, 128], strides = [1, 1]} : vector<8x512xf32> to vector<8x128xf32>
    %243 = vector.extract_strided_slice %231 {offsets = [0, 384], sizes = [8, 128], strides = [1, 1]} : vector<8x512xf32> to vector<8x128xf32>
    %cst_78 = arith.constant 5.000000e-01 : f32
    %244 = vector.broadcast %cst_78 : f32 to vector<8x128xf32>
    %245 = arith.mulf %244, %243 : vector<8x128xf32>
    %cst_79 = arith.constant 5.000000e-01 : f32
    %246 = vector.broadcast %cst_79 : f32 to vector<8x128xf32>
    %247 = arith.addf %245, %246 : vector<8x128xf32>
    %248 = arith.mulf %241, %197 : vector<8x128xf32>
    %249 = arith.mulf %236, %242 : vector<8x128xf32>
    %250 = arith.addf %248, %249 : vector<8x128xf32>
    %251 = math.tanh %250 : vector<8x128xf32>
    %252 = arith.mulf %247, %251 : vector<8x128xf32>
    %253 = arith.truncf %252 : vector<8x128xf32> to vector<8x128xbf16>
    %cst_80 = arith.constant dense<0.000000e+00> : vector<8x512xf32>
    %254 = tpu.matmul %253, %1, %cst_80 {dimension_numbers = #tpu.dot_dimension_numbers<[1], [0], [0], [1], [0, 0, 1, 1], [], []>} : vector<8x128xbf16>, vector<128x512xbf16>, vector<8x512xf32> -> vector<8x512xf32>
    %cst_81 = arith.constant dense<0.000000e+00> : vector<8x512xf32>
    %255 = tpu.matmul %253, %2, %cst_81 {dimension_numbers = #tpu.dot_dimension_numbers<[1], [0], [0], [1], [0, 0, 1, 1], [], []>} : vector<8x128xbf16>, vector<128x512xbf16>, vector<8x512xf32> -> vector<8x512xf32>
    %256 = arith.addf %255, %8 : vector<8x512xf32>
    %257 = arith.addf %256, %228 : vector<8x512xf32>
    %258 = math.tanh %257 : vector<8x512xf32>
    %259 = vector.extract_strided_slice %258 {offsets = [0, 0], sizes = [8, 128], strides = [1, 1]} : vector<8x512xf32> to vector<8x128xf32>
    %cst_82 = arith.constant 5.000000e-01 : f32
    %260 = vector.broadcast %cst_82 : f32 to vector<8x128xf32>
    %261 = arith.mulf %260, %259 : vector<8x128xf32>
    %cst_83 = arith.constant 5.000000e-01 : f32
    %262 = vector.broadcast %cst_83 : f32 to vector<8x128xf32>
    %263 = arith.addf %261, %262 : vector<8x128xf32>
    %264 = vector.extract_strided_slice %258 {offsets = [0, 128], sizes = [8, 128], strides = [1, 1]} : vector<8x512xf32> to vector<8x128xf32>
    %cst_84 = arith.constant 5.000000e-01 : f32
    %265 = vector.broadcast %cst_84 : f32 to vector<8x128xf32>
    %266 = arith.mulf %265, %264 : vector<8x128xf32>
    %cst_85 = arith.constant 5.000000e-01 : f32
    %267 = vector.broadcast %cst_85 : f32 to vector<8x128xf32>
    %268 = arith.addf %266, %267 : vector<8x128xf32>
    %269 = vector.extract_strided_slice %258 {offsets = [0, 256], sizes = [8, 128], strides = [1, 1]} : vector<8x512xf32> to vector<8x128xf32>
    %270 = vector.extract_strided_slice %258 {offsets = [0, 384], sizes = [8, 128], strides = [1, 1]} : vector<8x512xf32> to vector<8x128xf32>
    %cst_86 = arith.constant 5.000000e-01 : f32
    %271 = vector.broadcast %cst_86 : f32 to vector<8x128xf32>
    %272 = arith.mulf %271, %270 : vector<8x128xf32>
    %cst_87 = arith.constant 5.000000e-01 : f32
    %273 = vector.broadcast %cst_87 : f32 to vector<8x128xf32>
    %274 = arith.addf %272, %273 : vector<8x128xf32>
    %275 = arith.mulf %268, %224 : vector<8x128xf32>
    %276 = arith.mulf %263, %269 : vector<8x128xf32>
    %277 = arith.addf %275, %276 : vector<8x128xf32>
    %278 = math.tanh %277 : vector<8x128xf32>
    %279 = arith.mulf %274, %278 : vector<8x128xf32>
    %280 = arith.truncf %279 : vector<8x128xf32> to vector<8x128xbf16>
    %cst_88 = arith.constant dense<0.000000e+00> : vector<8x512xf32>
    %281 = tpu.matmul %280, %3, %cst_88 {dimension_numbers = #tpu.dot_dimension_numbers<[1], [0], [0], [1], [0, 0, 1, 1], [], []>} : vector<8x128xbf16>, vector<128x512xbf16>, vector<8x512xf32> -> vector<8x512xf32>
    %282 = vector.extract_strided_slice %13 {offsets = [40, 0], sizes = [8, 512], strides = [1, 1]} : vector<64x512xf32> to vector<8x512xf32>
    %283 = arith.addf %282, %254 : vector<8x512xf32>
    %284 = math.tanh %283 : vector<8x512xf32>
    %285 = vector.extract_strided_slice %284 {offsets = [0, 0], sizes = [8, 128], strides = [1, 1]} : vector<8x512xf32> to vector<8x128xf32>
    %cst_89 = arith.constant 5.000000e-01 : f32
    %286 = vector.broadcast %cst_89 : f32 to vector<8x128xf32>
    %287 = arith.mulf %286, %285 : vector<8x128xf32>
    %cst_90 = arith.constant 5.000000e-01 : f32
    %288 = vector.broadcast %cst_90 : f32 to vector<8x128xf32>
    %289 = arith.addf %287, %288 : vector<8x128xf32>
    %290 = vector.extract_strided_slice %284 {offsets = [0, 128], sizes = [8, 128], strides = [1, 1]} : vector<8x512xf32> to vector<8x128xf32>
    %cst_91 = arith.constant 5.000000e-01 : f32
    %291 = vector.broadcast %cst_91 : f32 to vector<8x128xf32>
    %292 = arith.mulf %291, %290 : vector<8x128xf32>
    %cst_92 = arith.constant 5.000000e-01 : f32
    %293 = vector.broadcast %cst_92 : f32 to vector<8x128xf32>
    %294 = arith.addf %292, %293 : vector<8x128xf32>
    %295 = vector.extract_strided_slice %284 {offsets = [0, 256], sizes = [8, 128], strides = [1, 1]} : vector<8x512xf32> to vector<8x128xf32>
    %296 = vector.extract_strided_slice %284 {offsets = [0, 384], sizes = [8, 128], strides = [1, 1]} : vector<8x512xf32> to vector<8x128xf32>
    %cst_93 = arith.constant 5.000000e-01 : f32
    %297 = vector.broadcast %cst_93 : f32 to vector<8x128xf32>
    %298 = arith.mulf %297, %296 : vector<8x128xf32>
    %cst_94 = arith.constant 5.000000e-01 : f32
    %299 = vector.broadcast %cst_94 : f32 to vector<8x128xf32>
    %300 = arith.addf %298, %299 : vector<8x128xf32>
    %301 = arith.mulf %294, %250 : vector<8x128xf32>
    %302 = arith.mulf %289, %295 : vector<8x128xf32>
    %303 = arith.addf %301, %302 : vector<8x128xf32>
    %304 = math.tanh %303 : vector<8x128xf32>
    %305 = arith.mulf %300, %304 : vector<8x128xf32>
    %306 = arith.truncf %305 : vector<8x128xf32> to vector<8x128xbf16>
    %cst_95 = arith.constant dense<0.000000e+00> : vector<8x512xf32>
    %307 = tpu.matmul %306, %1, %cst_95 {dimension_numbers = #tpu.dot_dimension_numbers<[1], [0], [0], [1], [0, 0, 1, 1], [], []>} : vector<8x128xbf16>, vector<128x512xbf16>, vector<8x512xf32> -> vector<8x512xf32>
    %cst_96 = arith.constant dense<0.000000e+00> : vector<8x512xf32>
    %308 = tpu.matmul %306, %2, %cst_96 {dimension_numbers = #tpu.dot_dimension_numbers<[1], [0], [0], [1], [0, 0, 1, 1], [], []>} : vector<8x128xbf16>, vector<128x512xbf16>, vector<8x512xf32> -> vector<8x512xf32>
    %309 = arith.addf %308, %8 : vector<8x512xf32>
    %310 = arith.addf %309, %281 : vector<8x512xf32>
    %311 = math.tanh %310 : vector<8x512xf32>
    %312 = vector.extract_strided_slice %311 {offsets = [0, 0], sizes = [8, 128], strides = [1, 1]} : vector<8x512xf32> to vector<8x128xf32>
    %cst_97 = arith.constant 5.000000e-01 : f32
    %313 = vector.broadcast %cst_97 : f32 to vector<8x128xf32>
    %314 = arith.mulf %313, %312 : vector<8x128xf32>
    %cst_98 = arith.constant 5.000000e-01 : f32
    %315 = vector.broadcast %cst_98 : f32 to vector<8x128xf32>
    %316 = arith.addf %314, %315 : vector<8x128xf32>
    %317 = vector.extract_strided_slice %311 {offsets = [0, 128], sizes = [8, 128], strides = [1, 1]} : vector<8x512xf32> to vector<8x128xf32>
    %cst_99 = arith.constant 5.000000e-01 : f32
    %318 = vector.broadcast %cst_99 : f32 to vector<8x128xf32>
    %319 = arith.mulf %318, %317 : vector<8x128xf32>
    %cst_100 = arith.constant 5.000000e-01 : f32
    %320 = vector.broadcast %cst_100 : f32 to vector<8x128xf32>
    %321 = arith.addf %319, %320 : vector<8x128xf32>
    %322 = vector.extract_strided_slice %311 {offsets = [0, 256], sizes = [8, 128], strides = [1, 1]} : vector<8x512xf32> to vector<8x128xf32>
    %323 = vector.extract_strided_slice %311 {offsets = [0, 384], sizes = [8, 128], strides = [1, 1]} : vector<8x512xf32> to vector<8x128xf32>
    %cst_101 = arith.constant 5.000000e-01 : f32
    %324 = vector.broadcast %cst_101 : f32 to vector<8x128xf32>
    %325 = arith.mulf %324, %323 : vector<8x128xf32>
    %cst_102 = arith.constant 5.000000e-01 : f32
    %326 = vector.broadcast %cst_102 : f32 to vector<8x128xf32>
    %327 = arith.addf %325, %326 : vector<8x128xf32>
    %328 = arith.mulf %321, %277 : vector<8x128xf32>
    %329 = arith.mulf %316, %322 : vector<8x128xf32>
    %330 = arith.addf %328, %329 : vector<8x128xf32>
    %331 = math.tanh %330 : vector<8x128xf32>
    %332 = arith.mulf %327, %331 : vector<8x128xf32>
    %333 = arith.truncf %332 : vector<8x128xf32> to vector<8x128xbf16>
    %cst_103 = arith.constant dense<0.000000e+00> : vector<8x512xf32>
    %334 = tpu.matmul %333, %3, %cst_103 {dimension_numbers = #tpu.dot_dimension_numbers<[1], [0], [0], [1], [0, 0, 1, 1], [], []>} : vector<8x128xbf16>, vector<128x512xbf16>, vector<8x512xf32> -> vector<8x512xf32>
    %335 = vector.extract_strided_slice %13 {offsets = [48, 0], sizes = [8, 512], strides = [1, 1]} : vector<64x512xf32> to vector<8x512xf32>
    %336 = arith.addf %335, %307 : vector<8x512xf32>
    %337 = math.tanh %336 : vector<8x512xf32>
    %338 = vector.extract_strided_slice %337 {offsets = [0, 0], sizes = [8, 128], strides = [1, 1]} : vector<8x512xf32> to vector<8x128xf32>
    %cst_104 = arith.constant 5.000000e-01 : f32
    %339 = vector.broadcast %cst_104 : f32 to vector<8x128xf32>
    %340 = arith.mulf %339, %338 : vector<8x128xf32>
    %cst_105 = arith.constant 5.000000e-01 : f32
    %341 = vector.broadcast %cst_105 : f32 to vector<8x128xf32>
    %342 = arith.addf %340, %341 : vector<8x128xf32>
    %343 = vector.extract_strided_slice %337 {offsets = [0, 128], sizes = [8, 128], strides = [1, 1]} : vector<8x512xf32> to vector<8x128xf32>
    %cst_106 = arith.constant 5.000000e-01 : f32
    %344 = vector.broadcast %cst_106 : f32 to vector<8x128xf32>
    %345 = arith.mulf %344, %343 : vector<8x128xf32>
    %cst_107 = arith.constant 5.000000e-01 : f32
    %346 = vector.broadcast %cst_107 : f32 to vector<8x128xf32>
    %347 = arith.addf %345, %346 : vector<8x128xf32>
    %348 = vector.extract_strided_slice %337 {offsets = [0, 256], sizes = [8, 128], strides = [1, 1]} : vector<8x512xf32> to vector<8x128xf32>
    %349 = vector.extract_strided_slice %337 {offsets = [0, 384], sizes = [8, 128], strides = [1, 1]} : vector<8x512xf32> to vector<8x128xf32>
    %cst_108 = arith.constant 5.000000e-01 : f32
    %350 = vector.broadcast %cst_108 : f32 to vector<8x128xf32>
    %351 = arith.mulf %350, %349 : vector<8x128xf32>
    %cst_109 = arith.constant 5.000000e-01 : f32
    %352 = vector.broadcast %cst_109 : f32 to vector<8x128xf32>
    %353 = arith.addf %351, %352 : vector<8x128xf32>
    %354 = arith.mulf %347, %303 : vector<8x128xf32>
    %355 = arith.mulf %342, %348 : vector<8x128xf32>
    %356 = arith.addf %354, %355 : vector<8x128xf32>
    %357 = math.tanh %356 : vector<8x128xf32>
    %358 = arith.mulf %353, %357 : vector<8x128xf32>
    %359 = arith.truncf %358 : vector<8x128xf32> to vector<8x128xbf16>
    %cst_110 = arith.constant dense<0.000000e+00> : vector<8x512xf32>
    %360 = tpu.matmul %359, %1, %cst_110 {dimension_numbers = #tpu.dot_dimension_numbers<[1], [0], [0], [1], [0, 0, 1, 1], [], []>} : vector<8x128xbf16>, vector<128x512xbf16>, vector<8x512xf32> -> vector<8x512xf32>
    %cst_111 = arith.constant dense<0.000000e+00> : vector<8x512xf32>
    %361 = tpu.matmul %359, %2, %cst_111 {dimension_numbers = #tpu.dot_dimension_numbers<[1], [0], [0], [1], [0, 0, 1, 1], [], []>} : vector<8x128xbf16>, vector<128x512xbf16>, vector<8x512xf32> -> vector<8x512xf32>
    %362 = arith.addf %361, %8 : vector<8x512xf32>
    %363 = arith.addf %362, %334 : vector<8x512xf32>
    %364 = math.tanh %363 : vector<8x512xf32>
    %365 = vector.extract_strided_slice %364 {offsets = [0, 0], sizes = [8, 128], strides = [1, 1]} : vector<8x512xf32> to vector<8x128xf32>
    %cst_112 = arith.constant 5.000000e-01 : f32
    %366 = vector.broadcast %cst_112 : f32 to vector<8x128xf32>
    %367 = arith.mulf %366, %365 : vector<8x128xf32>
    %cst_113 = arith.constant 5.000000e-01 : f32
    %368 = vector.broadcast %cst_113 : f32 to vector<8x128xf32>
    %369 = arith.addf %367, %368 : vector<8x128xf32>
    %370 = vector.extract_strided_slice %364 {offsets = [0, 128], sizes = [8, 128], strides = [1, 1]} : vector<8x512xf32> to vector<8x128xf32>
    %cst_114 = arith.constant 5.000000e-01 : f32
    %371 = vector.broadcast %cst_114 : f32 to vector<8x128xf32>
    %372 = arith.mulf %371, %370 : vector<8x128xf32>
    %cst_115 = arith.constant 5.000000e-01 : f32
    %373 = vector.broadcast %cst_115 : f32 to vector<8x128xf32>
    %374 = arith.addf %372, %373 : vector<8x128xf32>
    %375 = vector.extract_strided_slice %364 {offsets = [0, 256], sizes = [8, 128], strides = [1, 1]} : vector<8x512xf32> to vector<8x128xf32>
    %376 = vector.extract_strided_slice %364 {offsets = [0, 384], sizes = [8, 128], strides = [1, 1]} : vector<8x512xf32> to vector<8x128xf32>
    %cst_116 = arith.constant 5.000000e-01 : f32
    %377 = vector.broadcast %cst_116 : f32 to vector<8x128xf32>
    %378 = arith.mulf %377, %376 : vector<8x128xf32>
    %cst_117 = arith.constant 5.000000e-01 : f32
    %379 = vector.broadcast %cst_117 : f32 to vector<8x128xf32>
    %380 = arith.addf %378, %379 : vector<8x128xf32>
    %381 = arith.mulf %374, %330 : vector<8x128xf32>
    %382 = arith.mulf %369, %375 : vector<8x128xf32>
    %383 = arith.addf %381, %382 : vector<8x128xf32>
    %384 = math.tanh %383 : vector<8x128xf32>
    %385 = arith.mulf %380, %384 : vector<8x128xf32>
    %386 = arith.truncf %385 : vector<8x128xf32> to vector<8x128xbf16>
    %cst_118 = arith.constant dense<0.000000e+00> : vector<8x512xf32>
    %387 = tpu.matmul %386, %3, %cst_118 {dimension_numbers = #tpu.dot_dimension_numbers<[1], [0], [0], [1], [0, 0, 1, 1], [], []>} : vector<8x128xbf16>, vector<128x512xbf16>, vector<8x512xf32> -> vector<8x512xf32>
    %388 = vector.extract_strided_slice %13 {offsets = [56, 0], sizes = [8, 512], strides = [1, 1]} : vector<64x512xf32> to vector<8x512xf32>
    %389 = arith.addf %388, %360 : vector<8x512xf32>
    %390 = math.tanh %389 : vector<8x512xf32>
    %391 = vector.extract_strided_slice %390 {offsets = [0, 0], sizes = [8, 128], strides = [1, 1]} : vector<8x512xf32> to vector<8x128xf32>
    %cst_119 = arith.constant 5.000000e-01 : f32
    %392 = vector.broadcast %cst_119 : f32 to vector<8x128xf32>
    %393 = arith.mulf %392, %391 : vector<8x128xf32>
    %cst_120 = arith.constant 5.000000e-01 : f32
    %394 = vector.broadcast %cst_120 : f32 to vector<8x128xf32>
    %395 = arith.addf %393, %394 : vector<8x128xf32>
    %396 = vector.extract_strided_slice %390 {offsets = [0, 128], sizes = [8, 128], strides = [1, 1]} : vector<8x512xf32> to vector<8x128xf32>
    %cst_121 = arith.constant 5.000000e-01 : f32
    %397 = vector.broadcast %cst_121 : f32 to vector<8x128xf32>
    %398 = arith.mulf %397, %396 : vector<8x128xf32>
    %cst_122 = arith.constant 5.000000e-01 : f32
    %399 = vector.broadcast %cst_122 : f32 to vector<8x128xf32>
    %400 = arith.addf %398, %399 : vector<8x128xf32>
    %401 = vector.extract_strided_slice %390 {offsets = [0, 256], sizes = [8, 128], strides = [1, 1]} : vector<8x512xf32> to vector<8x128xf32>
    %402 = vector.extract_strided_slice %390 {offsets = [0, 384], sizes = [8, 128], strides = [1, 1]} : vector<8x512xf32> to vector<8x128xf32>
    %cst_123 = arith.constant 5.000000e-01 : f32
    %403 = vector.broadcast %cst_123 : f32 to vector<8x128xf32>
    %404 = arith.mulf %403, %402 : vector<8x128xf32>
    %cst_124 = arith.constant 5.000000e-01 : f32
    %405 = vector.broadcast %cst_124 : f32 to vector<8x128xf32>
    %406 = arith.addf %404, %405 : vector<8x128xf32>
    %407 = arith.mulf %400, %356 : vector<8x128xf32>
    %408 = arith.mulf %395, %401 : vector<8x128xf32>
    %409 = arith.addf %407, %408 : vector<8x128xf32>
    %410 = math.tanh %409 : vector<8x128xf32>
    %411 = arith.mulf %406, %410 : vector<8x128xf32>
    %412 = arith.truncf %411 : vector<8x128xf32> to vector<8x128xbf16>
    %cst_125 = arith.constant dense<0.000000e+00> : vector<8x512xf32>
    %413 = tpu.matmul %412, %2, %cst_125 {dimension_numbers = #tpu.dot_dimension_numbers<[1], [0], [0], [1], [0, 0, 1, 1], [], []>} : vector<8x128xbf16>, vector<128x512xbf16>, vector<8x512xf32> -> vector<8x512xf32>
    %414 = arith.addf %413, %8 : vector<8x512xf32>
    %415 = arith.addf %414, %387 : vector<8x512xf32>
    %416 = math.tanh %415 : vector<8x512xf32>
    %417 = vector.extract_strided_slice %416 {offsets = [0, 0], sizes = [8, 128], strides = [1, 1]} : vector<8x512xf32> to vector<8x128xf32>
    %cst_126 = arith.constant 5.000000e-01 : f32
    %418 = vector.broadcast %cst_126 : f32 to vector<8x128xf32>
    %419 = arith.mulf %418, %417 : vector<8x128xf32>
    %cst_127 = arith.constant 5.000000e-01 : f32
    %420 = vector.broadcast %cst_127 : f32 to vector<8x128xf32>
    %421 = arith.addf %419, %420 : vector<8x128xf32>
    %422 = vector.extract_strided_slice %416 {offsets = [0, 128], sizes = [8, 128], strides = [1, 1]} : vector<8x512xf32> to vector<8x128xf32>
    %cst_128 = arith.constant 5.000000e-01 : f32
    %423 = vector.broadcast %cst_128 : f32 to vector<8x128xf32>
    %424 = arith.mulf %423, %422 : vector<8x128xf32>
    %cst_129 = arith.constant 5.000000e-01 : f32
    %425 = vector.broadcast %cst_129 : f32 to vector<8x128xf32>
    %426 = arith.addf %424, %425 : vector<8x128xf32>
    %427 = vector.extract_strided_slice %416 {offsets = [0, 256], sizes = [8, 128], strides = [1, 1]} : vector<8x512xf32> to vector<8x128xf32>
    %428 = vector.extract_strided_slice %416 {offsets = [0, 384], sizes = [8, 128], strides = [1, 1]} : vector<8x512xf32> to vector<8x128xf32>
    %cst_130 = arith.constant 5.000000e-01 : f32
    %429 = vector.broadcast %cst_130 : f32 to vector<8x128xf32>
    %430 = arith.mulf %429, %428 : vector<8x128xf32>
    %cst_131 = arith.constant 5.000000e-01 : f32
    %431 = vector.broadcast %cst_131 : f32 to vector<8x128xf32>
    %432 = arith.addf %430, %431 : vector<8x128xf32>
    %433 = arith.mulf %426, %383 : vector<8x128xf32>
    %434 = arith.mulf %421, %427 : vector<8x128xf32>
    %435 = arith.addf %433, %434 : vector<8x128xf32>
    %436 = math.tanh %435 : vector<8x128xf32>
    %437 = arith.mulf %432, %436 : vector<8x128xf32>
    %438 = arith.truncf %437 : vector<8x128xf32> to vector<8x128xbf16>
    %cst_132 = arith.constant dense<0.000000e+00> : vector<8x128xf32>
    %439 = tpu.matmul %438, %4, %cst_132 {dimension_numbers = #tpu.dot_dimension_numbers<[1], [0], [0], [1], [0, 0, 1, 1], [], []>} : vector<8x128xbf16>, vector<128x128xbf16>, vector<8x128xf32> -> vector<8x128xf32>
    %440 = vector.broadcast %9 : vector<1x128xf32> to vector<8x128xf32>
    %441 = arith.addf %439, %440 : vector<8x128xf32>
    %c0_133 = arith.constant 0 : index
    %c0_134 = arith.constant 0 : index
    %442 = vector.load %arg3[%c0_133, %c0_134] : memref<8x128xf32, #tpu.memory_space<vmem>>, vector<8x128xf32>
    tpu.vector_store %arg3[%c0_133, %c0_134], %441 {strides = array<i32>} : memref<8x128xf32, #tpu.memory_space<vmem>>, vector<8x128xf32>,
    return
  }
}

</mosaic_0001>

<bundles_post_ra>
// kernel: lstm_forward.1
= control target key start
LH: loop header
LB: loop body
LE: loop exit
PB: predicated region body
PF: predicated region fallthrough
CT: control target
= control target key end

     0   :  { %v6555_v1 = vmov 0   ;;  %vm4055_vm0 = vmmov 0   ;;  %s6547_s1 = inlined_call_operand.vmem [shape: bf16[640,512], index: 1, kind: input, shape index: {}]   ;;  %s6548_s0 = inlined_call_operand.vmem [shape: bf16[64,128], index: 0, kind: input, shape index: {}]   ;;  %s6549_s2 = inlined_call_operand.vmem [shape: f32[8,512], index: 2, kind: input, shape index: {}]   ;;  %s6550_s3 = inlined_call_operand.vmem [shape: f32[8,128], index: 3, kind: output, shape index: {}]  }
   0x1   :  { %v3497_v0 = vld [vmem:[%s6547_s1 + $0x4] ss:$16 sps:$4 sm:$0xff]   ;;  %429 = vmatprep.mubr.bf16.mxu0 %v6555_v1  ;;  %502 = vmatprep.mubr.bf16.mxu1 %v6555_v1  ;;  %v3499_v2 = vld [vmem:[%s6547_s1] ss:$16 sps:$4 sm:$0xff]   ;;  %v3500_v3 = vld [vmem:[%s6547_s1 + $0xc] ss:$16 sps:$4 sm:$0xff]  }
   0x2   :  { %397 = vmatprep.subr.bf16.mxu0 %v3497_v0  ;;  %v3502_v4 = vld [vmem:[%s6547_s1 + $0x8] ss:$16 sps:$4 sm:$0xff]   ;;  %v3503_v5 = vld [vmem:[%s6547_s1 + $0x24] ss:$16 sps:$4 sm:$0xff]   ;;  %v3505_v6 = vld [vmem:[%s6547_s1 + $0x20] ss:$16 sps:$4 sm:$0xff]   ;;  %470 = vmatprep.subr.bf16.mxu1 %v3500_v3 }
   0x3   :  { %398 = vmatpush1.bf16.msra.mxu0 %v3499_v2  ;;  %v3506_v7 = vld [vmem:[%s6547_s1 + $0x2c] ss:$16 sps:$4 sm:$0xff]   ;;  %471 = vmatpush1.bf16.msra.mxu1 %v3502_v4  ;;  %v3508_v8 = vld [vmem:[%s6547_s1 + $0x28] ss:$16 sps:$4 sm:$0xff]   ;;  %v3509_v9 = vld [vmem:[%s6547_s1 + $0x44] ss:$16 sps:$4 sm:$0xff]  }
   0x4   :  { %399 = vmatprep.subr.bf16.mxu0 %v3503_v5  ;;  %472 = vmatprep.subr.bf16.mxu1 %v3506_v7  ;;  %v3511_v10 = vld [vmem:[%s6547_s1 + $0x40] ss:$16 sps:$4 sm:$0xff]   ;;  %v3512_v11 = vld [vmem:[%s6547_s1 + $0x4c] ss:$16 sps:$4 sm:$0xff]   ;;  %v3515_v12 = vld [vmem:[%s6547_s1 + $0x64] ss:$16 sps:$4 sm:$0xff]  }
   0x5   :  { %v3514_v13 = vld [vmem:[%s6547_s1 + $0x48] ss:$16 sps:$4 sm:$0xff]   ;;  %v3518_v14 = vld [vmem:[%s6547_s1 + $0x6c] ss:$16 sps:$4 sm:$0xff]   ;;  %v3517_v15 = vld [vmem:[%s6547_s1 + $0x60] ss:$16 sps:$4 sm:$0xff]  }
   0x6   :  { %v3521_v16 = vld [vmem:[%s6547_s1 + $0x84] ss:$16 sps:$4 sm:$0xff]   ;;  %v3520_v17 = vld [vmem:[%s6547_s1 + $0x68] ss:$16 sps:$4 sm:$0xff]   ;;  %v3524_v18 = vld [vmem:[%s6547_s1 + $0x8c] ss:$16 sps:$4 sm:$0xff]  }
   0x7   :  { %400 = vmatpush1.bf16.msra.mxu0 %v3505_v6  ;;  %473 = vmatpush1.bf16.msra.mxu1 %v3508_v8  ;;  %v3523_v19 = vld [vmem:[%s6547_s1 + $0x80] ss:$16 sps:$4 sm:$0xff]   ;;  %v3527_v20 = vld [vmem:[%s6547_s1 + $0xa4] ss:$16 sps:$4 sm:$0xff]   ;;  %v3526_v21 = vld [vmem:[%s6547_s1 + $0x88] ss:$16 sps:$4 sm:$0xff]   ;;  %v163_v8 = vlaneseq }
   0x8   :  { %401 = vmatprep.subr.bf16.mxu0 %v3509_v9  ;;  %474 = vmatprep.subr.bf16.mxu1 %v3512_v11  ;;  %v3530_v22 = vld [vmem:[%s6547_s1 + $0xac] ss:$16 sps:$4 sm:$0xff]   ;;  %v3529_v23 = vld [vmem:[%s6547_s1 + $0xa0] ss:$16 sps:$4 sm:$0xff]   ;;  %v3532_v24 = vld [vmem:[%s6547_s1 + $0xa8] ss:$16 sps:$4 sm:$0xff]  }
   0x9   :  { %v3533_v25 = vld [vmem:[%s6547_s1 + $0xc4] ss:$16 sps:$4 sm:$0xff]   ;;  %v3535_v26 = vld [vmem:[%s6547_s1 + $0xc0] ss:$16 sps:$4 sm:$0xff]   ;;  %v3536_v27 = vld [vmem:[%s6547_s1 + $0xcc] ss:$16 sps:$4 sm:$0xff]  }
   0xa   :  { %v3539_v28 = vld [vmem:[%s6547_s1 + $0xe4] ss:$16 sps:$4 sm:$0xff]   ;;  %v3538_v29 = vld [vmem:[%s6547_s1 + $0xc8] ss:$16 sps:$4 sm:$0xff]   ;;  %v3542_v30 = vld [vmem:[%s6547_s1 + $0xec] ss:$16 sps:$4 sm:$0xff]  }
   0xb   :  { %402 = vmatpush1.bf16.msra.mxu0 %v3511_v10  ;;  %475 = vmatpush1.bf16.msra.mxu1 %v3514_v13  ;;  %v3541_v31 = vld [vmem:[%s6547_s1 + $0xe0] ss:$16 sps:$4 sm:$0xff]   ;;  %v3544_v32 = vld [vmem:[%s6547_s1 + $0xe8] ss:$16 sps:$4 sm:$0xff]   ;;  %v4182_v34 = vld [vmem:[%s6547_s1 + $0x104] ss:$16 sps:$4 sm:$0xff]  }
   0xc   :  { %403 = vmatprep.subr.bf16.mxu0 %v3515_v12  ;;  %476 = vmatprep.subr.bf16.mxu1 %v3518_v14  ;;  %v3545_v33 = vld [vmem:[%s6548_s0] sm:$0xff]   ;;  %6806 = vst [vmem:[#allocation2_spill] sm:$0xff] %v4182_v34  ;;  %v4187_v35 = vld [vmem:[%s6547_s1 + $0x10c] ss:$16 sps:$4 sm:$0xff]   ;;  %v4197_v37 = vld [vmem:[%s6547_s1 + $0x108] ss:$16 sps:$4 sm:$0xff]  }
   0xd   :  { %6807 = vst [vmem:[#allocation3_spill] sm:$0xff] %v4187_v35  ;;  %v4192_v36 = vld [vmem:[%s6547_s1 + $0x100] ss:$16 sps:$4 sm:$0xff]   ;;  %v4206_v38 = vld [vmem:[%s6547_s1 + $0x124] ss:$16 sps:$4 sm:$0xff]   ;;  %v3558_v42 = vld [vmem:[%s6548_s0 + $0x8] sm:$0xff]  }
   0xe   :  { %v4211_v39 = vld [vmem:[%s6547_s1 + $0x12c] ss:$16 sps:$4 sm:$0xff]   ;;  %v4216_v40 = vld [vmem:[%s6547_s1 + $0x120] ss:$16 sps:$4 sm:$0xff]   ;;  %v4221_v41 = vld [vmem:[%s6547_s1 + $0x128] ss:$16 sps:$4 sm:$0xff]  }
   0xf   :  { %404 = vmatpush1.bf16.msra.mxu0 %v3517_v15  ;;  %477 = vmatpush1.bf16.msra.mxu1 %v3520_v17  ;;  %v4233_v43 = vld [vmem:[%s6547_s1 + $0x144] ss:$16 sps:$4 sm:$0xff]   ;;  %v4238_v44 = vld [vmem:[%s6547_s1 + $0x14c] ss:$16 sps:$4 sm:$0xff]   ;;  %v4243_v45 = vld [vmem:[%s6547_s1 + $0x140] ss:$16 sps:$4 sm:$0xff]  }
  0x10   :  { %405 = vmatprep.subr.bf16.mxu0 %v3521_v16  ;;  %478 = vmatprep.subr.bf16.mxu1 %v3524_v18  ;;  %v4248_v46 = vld [vmem:[%s6547_s1 + $0x148] ss:$16 sps:$4 sm:$0xff]   ;;  %v4259_v47 = vld [vmem:[%s6547_s1 + $0x164] ss:$16 sps:$4 sm:$0xff]   ;;  %v4264_v48 = vld [vmem:[%s6547_s1 + $0x16c] ss:$16 sps:$4 sm:$0xff]  }
  0x11   :  { %v4269_v49 = vld [vmem:[%s6547_s1 + $0x160] ss:$16 sps:$4 sm:$0xff]   ;;  %v4274_v50 = vld [vmem:[%s6547_s1 + $0x168] ss:$16 sps:$4 sm:$0xff]   ;;  %v4286_v52 = vld [vmem:[%s6547_s1 + $0x184] ss:$16 sps:$4 sm:$0xff]  }
  0x12   :  { %v3571_v51 = vld [vmem:[%s6548_s0 + $0x10] sm:$0xff]   ;;  %v4291_v53 = vld [vmem:[%s6547_s1 + $0x18c] ss:$16 sps:$4 sm:$0xff]   ;;  %v4301_v55 = vld [vmem:[%s6547_s1 + $0x188] ss:$16 sps:$4 sm:$0xff]   ;;  %v4398_v9 = vshrl.u32 %v163_v8, 7 }
  0x13   :  { %406 = vmatpush1.bf16.msra.mxu0 %v3523_v19  ;;  %479 = vmatpush1.bf16.msra.mxu1 %v3526_v21  ;;  %v4296_v54 = vld [vmem:[%s6547_s1 + $0x180] ss:$16 sps:$4 sm:$0xff]   ;;  %v4312_v56 = vld [vmem:[%s6547_s1 + $0x1a4] ss:$16 sps:$4 sm:$0xff]   ;;  %v4317_v57 = vld [vmem:[%s6547_s1 + $0x1ac] ss:$16 sps:$4 sm:$0xff]  }
  0x14   :  { %407 = vmatprep.subr.bf16.mxu0 %v3527_v20  ;;  %480 = vmatprep.subr.bf16.mxu1 %v3530_v22  ;;  %v4322_v58 = vld [vmem:[%s6547_s1 + $0x1a0] ss:$16 sps:$4 sm:$0xff]   ;;  %v4327_v59 = vld [vmem:[%s6547_s1 + $0x1a8] ss:$16 sps:$4 sm:$0xff]   ;;  %v4339_v61 = vld [vmem:[%s6547_s1 + $0x1c4] ss:$16 sps:$4 sm:$0xff]  }
  0x15   :  { %v3584_v60 = vld [vmem:[%s6548_s0 + $0x18] sm:$0xff]   ;;  %v4349_v63 = vld [vmem:[%s6547_s1 + $0x1c0] ss:$16 sps:$4 sm:$0xff]   ;;  %v4365_v2 = vld [vmem:[%s6547_s1 + $0x1e4] ss:$16 sps:$4 sm:$0xff]   ;;  %v6554_v10 = vsub.s32 0, %v4398_v9 }
  0x16   :  { %v4344_v62 = vld [vmem:[%s6547_s1 + $0x1cc] ss:$16 sps:$4 sm:$0xff]   ;;  %v4354_v0 = vld [vmem:[%s6547_s1 + $0x1c8] ss:$16 sps:$4 sm:$0xff]   ;;  %v4375_v4 = vld [vmem:[%s6547_s1 + $0x1e0] ss:$16 sps:$4 sm:$0xff]  }
  0x17   :  { %408 = vmatpush1.bf16.msra.mxu0 %v3529_v23  ;;  %481 = vmatpush1.bf16.msra.mxu1 %v3532_v24  ;;  %v4370_v3 = vld [vmem:[%s6547_s1 + $0x1ec] ss:$16 sps:$4 sm:$0xff]   ;;  %v4380_v5 = vld [vmem:[%s6547_s1 + $0x1e8] ss:$16 sps:$4 sm:$0xff]   ;;  %v4389_v6 = vld [vmem:[%s6547_s1 + $0x204] ss:$16 sps:$4 sm:$0xff]  }
  0x18   :  { %409 = vmatprep.subr.bf16.mxu0 %v3533_v25  ;;  %482 = vmatprep.subr.bf16.mxu1 %v3536_v27  ;;  %v4394_v7 = vld [vmem:[%s6547_s1 + $0x20c] ss:$16 sps:$4 sm:$0xff]   ;;  %v159_v11 = vld [vmem:[%s6549_s2] ss:$8 sm:$0xf]  ;;  %v6553_v12 = vsub.s32 1, %v4398_v9 }
  0x19   :  { %v6552_v13 = vsub.s32 2, %v4398_v9  ;;  %v4408_v14 = vrot.slane %v159_v11, %v6554_v10  ;;  %v6551_v25 = vsub.s32 3, %v4398_v9  ;;  %v4546_v10 = vld [vmem:[%s6547_s1 + $0x288] ss:$16 sps:$4 sm:$0xff]  }
  0x1a   :  { %v4412_v15 = vrot.slane %v159_v11, %v6553_v12  ;;  %v4541_v12 = vld [vmem:[%s6547_s1 + $0x280] ss:$16 sps:$4 sm:$0xff]   ;;  %6822 = vst [vmem:[#allocation18_spill] sm:$0xff] %v4546_v10 }
  0x1b   :  { %410 = vmatpush1.bf16.msra.mxu0 %v3535_v26  ;;  %483 = vmatpush1.bf16.msra.mxu1 %v3538_v29  ;;  %6808 = vst [vmem:[#allocation4_spill] sm:$0xff] %v4408_v14  ;;  %v4416_v16 = vrot.slane %v159_v11, %v6552_v13  ;;  %v4432_v29 = vrot.slane %v159_v11, %v6551_v25  ;;  %v4534_v13 = vld [vmem:[%s6547_s1 + $0x28c] ss:$16 sps:$4 sm:$0xff]   ;;  %6821 = vst [vmem:[#allocation17_spill] sm:$0xff] %v4541_v12 }
  0x1c   :  { %411 = vmatprep.subr.bf16.mxu0 %v3539_v28  ;;  %484 = vmatprep.subr.bf16.mxu1 %v3542_v30  ;;  %6809 = vst [vmem:[#allocation5_spill] sm:$0xff] %v4412_v15  ;;  %6820 = vst [vmem:[#allocation16_spill] sm:$0xff] %v4534_v13 }
  0x1d   :  { %6810 = vst [vmem:[#allocation6_spill] sm:$0xff] %v4416_v16  ;;  %6811 = vst [vmem:[#allocation7_spill] sm:$0xff] %v4432_v29 }
  0x1f   :  { %412 = vmatpush1.bf16.msra.mxu0 %v3541_v31  ;;  %485 = vmatpush1.bf16.msra.mxu1 %v3544_v32 }
  0x20   :  { %723 = vmatprep.subr.bf16.mxu0 %v4182_v34  ;;  %764 = vmatprep.subr.bf16.mxu1 %v4187_v35 }
  0x22   :  { %430 = vmatmul.mubr.bf16.vlgmr.msra.gmra.mrb[0].mxu0 %v3545_v33  ;;  %503 = vmatmul.mubr.bf16.vlgmr.msra.gmra.mrb[0].mxu1 %v3545_v33 }
  0x23   :  { %439 = vmatprep.mubr.bf16.mxu0 %v6555_v1  ;;  %512 = vmatprep.mubr.bf16.mxu1 %v6555_v1 }
  0x24   :  { %724 = vmatpush1.bf16.msra.mxu0 %v4192_v36  ;;  %765 = vmatpush1.bf16.msra.mxu1 %v4197_v37 }
  0x25   :  { %725 = vmatprep.subr.bf16.mxu0 %v4206_v38  ;;  %766 = vmatprep.subr.bf16.mxu1 %v4211_v39 }
  0x28   :  { %726 = vmatpush1.bf16.msra.mxu0 %v4216_v40  ;;  %767 = vmatpush1.bf16.msra.mxu1 %v4221_v41 }
  0x29   :  { %727 = vmatprep.subr.bf16.mxu0 %v4233_v43  ;;  %768 = vmatprep.subr.bf16.mxu1 %v4238_v44 }
  0x2a   :  { %440 = vmatmul.mubr.bf16.gmra.mrb[4].mxu0 %v3558_v42  ;;  %513 = vmatmul.mubr.bf16.gmra.mrb[4].mxu1 %v3558_v42 }
  0x2b   :  { %449 = vmatprep.mubr.bf16.mxu0 %v6555_v1  ;;  %522 = vmatprep.mubr.bf16.mxu1 %v6555_v1 }
  0x2c   :  { %728 = vmatpush1.bf16.msra.mxu0 %v4243_v45  ;;  %769 = vmatpush1.bf16.msra.mxu1 %v4248_v46 }
  0x2d   :  { %729 = vmatprep.subr.bf16.mxu0 %v4259_v47  ;;  %770 = vmatprep.subr.bf16.mxu1 %v4264_v48 }
  0x30   :  { %730 = vmatpush1.bf16.msra.mxu0 %v4269_v49  ;;  %771 = vmatpush1.bf16.msra.mxu1 %v4274_v50 }
  0x31   :  { %731 = vmatprep.subr.bf16.mxu0 %v4286_v52  ;;  %772 = vmatprep.subr.bf16.mxu1 %v4291_v53 }
  0x32   :  { %450 = vmatmul.mubr.bf16.gmra.mrb[8].mxu0 %v3571_v51  ;;  %523 = vmatmul.mubr.bf16.gmra.mrb[8].mxu1 %v3571_v51 }
  0x33   :  { %459 = vmatprep.mubr.bf16.mxu0 %v6555_v1  ;;  %532 = vmatprep.mubr.bf16.mxu1 %v6555_v1 }
  0x34   :  { %732 = vmatpush1.bf16.msra.mxu0 %v4296_v54  ;;  %773 = vmatpush1.bf16.msra.mxu1 %v4301_v55 }
  0x35   :  { %733 = vmatprep.subr.bf16.mxu0 %v4312_v56  ;;  %774 = vmatprep.subr.bf16.mxu1 %v4317_v57 }
  0x38   :  { %734 = vmatpush1.bf16.msra.mxu0 %v4322_v58  ;;  %775 = vmatpush1.bf16.msra.mxu1 %v4327_v59 }
  0x39   :  { %735 = vmatprep.subr.bf16.mxu0 %v4339_v61  ;;  %776 = vmatprep.subr.bf16.mxu1 %v4344_v62 }
  0x3a   :  { %460 = vmatmul.mubr.bf16.gmra.mrb[12].mxu0 %v3584_v60  ;;  %533 = vmatmul.mubr.bf16.gmra.mrb[12].mxu1 %v3584_v60 }
  0x3b   :  { %755 = vmatprep.mubr.bf16.mxu0 %v6555_v1  ;;  %796 = vmatprep.mubr.bf16.mxu1 %v6555_v1 }
  0x3c   :  { %736 = vmatpush1.bf16.msra.mxu0 %v4349_v63  ;;  %777 = vmatpush1.bf16.msra.mxu1 %v4354_v0 }
  0x3d   :  { %737 = vmatprep.subr.bf16.mxu0 %v4365_v2  ;;  %778 = vmatprep.subr.bf16.mxu1 %v4370_v3 }
  0x40   :  { %738 = vmatpush1.bf16.msra.mxu0 %v4375_v4  ;;  %779 = vmatpush1.bf16.msra.mxu1 %v4380_v5 }
  0x41   :  { %965 = vmatprep.subr.bf16.mxu0 %v4389_v6  ;;  %1006 = vmatprep.subr.bf16.mxu1 %v4394_v7 }
  0xf5   :  { %v431_v17 = vpop.f32.mrb[0].mxu0  ;;  %v504_v22 = vpop.f32.mrb[0].mxu1 }
  0xf6   :  { %v432_v18 = vadd.f32 %v431_v17, %v4408_v14  ;;  %v433_v19 = vpop.f32.mrb[1].mxu0  ;;  %v505_v23 = vadd.f32 %v504_v22, %v4416_v16  ;;  %v506_v26 = vpop.f32.mrb[1].mxu1 }
  0xf7   :  { %v434_v20 = vadd.f32 %v433_v19, %v4412_v15  ;;  %v4420_v21 = vpop.f32.mrb[2].mxu0  ;;  %v4426_v27 = vpop.f32.mrb[2].mxu1  ;;  %v507_v30 = vadd.f32 %v506_v26, %v4432_v29  ;;  %v4441_v26 = vld [vmem:[%s6547_s1 + $0x200] ss:$16 sps:$4 sm:$0xff]  }
  0xf8   :  { %3701 = vtanh.f32 %v432_v18  ;;  %v4423_v24 = vpop.f32.mrb[3].mxu0  ;;  %v4428_v28 = vpop.f32.mrb[3].mxu1 }
  0xf9   :  { %3703 = vtanh.f32 %v434_v20 }
  0xfa   :  { %3705 = vtanh.f32 %v505_v23 }
  0xfb   :  { %3707 = vtanh.f32 %v507_v30  ;;  %v4446_v30 = vld [vmem:[%s6547_s1 + $0x208] ss:$16 sps:$4 sm:$0xff]  }
 0x102   :  { %v3702_v31 = vpop.eup %3701 }
 0x103   :  { %v3704_v32 = vpop.eup %3703  ;;  %v551_v33 = vmul.f32 0.5, %v3702_v31 }
 0x104   :  { %v3706_v42 = vpop.eup %3705  ;;  %v553_v51 = vmul.f32 0.5, %v3704_v32  ;;  %v4453_v32 = vld [vmem:[%s6547_s1 + $0x224] ss:$16 sps:$4 sm:$0xff]  }
 0x105   :  { %v552_v60 = vadd.f32 0.5, %v551_v33  ;;  %v3708_v20 = vpop.eup %3707  ;;  %v4458_v33 = vld [vmem:[%s6547_s1 + $0x22c] ss:$16 sps:$4 sm:$0xff]  }
 0x106   :  { %v554_v8 = vadd.f32 0.5, %v553_v51  ;;  %v555_v22 = vmul.f32 0.5, %v3708_v20  ;;  %v4479_v51 = vld [vmem:[%s6547_s1 + $0x244] ss:$16 sps:$4 sm:$0xff]   ;;  %v4510_v20 = vld [vmem:[%s6547_s1 + $0x26c] ss:$16 sps:$4 sm:$0xff]  }
 0x107   :  { %v558_v17 = vmul.f32 %v3706_v42, %v552_v60  ;;  %v4472_v42 = vld [vmem:[%s6547_s1 + $0x228] ss:$16 sps:$4 sm:$0xff]   ;;  %v4484_v60 = vld [vmem:[%s6547_s1 + $0x24c] ss:$16 sps:$4 sm:$0xff]   ;;  %6816 = vst [vmem:[#allocation12_spill] sm:$0xff] %v4510_v20 }
 0x108   :  { %v557_v18 = vmul.f32 0.0, %v554_v8  ;;  %v556_v11 = vadd.f32 0.5, %v555_v22  ;;  %6812 = vst [vmem:[#allocation8_spill] sm:$0xff] %v4484_v60  ;;  %v4493_v8 = vld [vmem:[%s6547_s1 + $0x240] ss:$16 sps:$4 sm:$0xff]  }
 0x109   :  { %6813 = vst [vmem:[#allocation9_spill] sm:$0xff] %v4493_v8  ;;  %v4517_v22 = vld [vmem:[%s6547_s1 + $0x260] ss:$16 sps:$4 sm:$0xff]  }
 0x10a   :  { %v4435_v19 = vadd.f32 %v558_v17, %v557_v18  ;;  %v4498_v17 = vld [vmem:[%s6547_s1 + $0x248] ss:$16 sps:$4 sm:$0xff]   ;;  %v4505_v18 = vld [vmem:[%s6547_s1 + $0x264] ss:$16 sps:$4 sm:$0xff]   ;;  %6817 = vst [vmem:[#allocation13_spill] sm:$0xff] %v4517_v22 }
 0x10b   :  { %6814 = vst [vmem:[#allocation10_spill] sm:$0xff] %v4498_v17  ;;  %6815 = vst [vmem:[#allocation11_spill] sm:$0xff] %v4505_v18 }
 0x10c   :  { %3709 = vtanh.f32 %v4435_v19 }
 0x116   :  { %v3710_v23 = vpop.eup %3709 }
 0x117   :  { %v561_v25 = vmul.f32 %v3710_v23, %v556_v11  ;;  %v4522_v11 = vld [vmem:[%s6547_s1 + $0x268] ss:$16 sps:$4 sm:$0xff]   ;;  %v4529_v23 = vld [vmem:[%s6547_s1 + $0x284] ss:$16 sps:$4 sm:$0xff]  }
 0x118   :  { %6818 = vst [vmem:[#allocation14_spill] sm:$0xff] %v4522_v11  ;;  %6819 = vst [vmem:[#allocation15_spill] sm:$0xff] %v4529_v23 }
 0x119   :  { %v4448_v31 = vpack.c.bf16 %v561_v25, %v561_v25  ;;  %v4467_v25 = vld [vmem:[%s6547_s1 + $0x220] ss:$16 sps:$4 sm:$0xff]  }
 0x11b   :  { %756 = vmatmul.mubr.bf16.vlgmr.msra.gmra.mrb[16].mxu0 %v4448_v31  ;;  %797 = vmatmul.mubr.bf16.vlgmr.msra.gmra.mrb[16].mxu1 %v4448_v31 }
 0x11c   :  { %966 = vmatpush1.bf16.msra.mxu0 %v4441_v26  ;;  %1007 = vmatpush1.bf16.msra.mxu1 %v4446_v30 }
 0x11d   :  { %967 = vmatprep.subr.bf16.mxu0 %v4453_v32  ;;  %1008 = vmatprep.subr.bf16.mxu1 %v4458_v33 }
 0x11e   :  { %997 = vmatprep.mubr.bf16.mxu0 %v6555_v1  ;;  %1038 = vmatprep.mubr.bf16.mxu1 %v6555_v1  ;;  %v4553_v1 = vld [vmem:[%s6547_s1 + $0x2a4] ss:$16 sps:$4 sm:$0xff]  }
 0x11f   :  { %6823 = vst [vmem:[#allocation19_spill] sm:$0xff] %v4553_v1 }
 0x120   :  { %968 = vmatpush1.bf16.msra.mxu0 %v4467_v25  ;;  %1009 = vmatpush1.bf16.msra.mxu1 %v4472_v42 }
 0x121   :  { %969 = vmatprep.subr.bf16.mxu0 %v4479_v51  ;;  %1010 = vmatprep.subr.bf16.mxu1 %v4484_v60 }
 0x124   :  { %970 = vmatpush1.bf16.msra.mxu0 %v4493_v8  ;;  %1011 = vmatpush1.bf16.msra.mxu1 %v4498_v17 }
 0x125   :  { %971 = vmatprep.subr.bf16.mxu0 %v4505_v18  ;;  %1012 = vmatprep.subr.bf16.mxu1 %v4510_v20 }
 0x128   :  { %972 = vmatpush1.bf16.msra.mxu0 %v4517_v22  ;;  %1013 = vmatpush1.bf16.msra.mxu1 %v4522_v11  ;;  %v4558_v11 = vld [vmem:[%s6547_s1 + $0x2ac] ss:$16 sps:$4 sm:$0xff]   ;;  %v4630_v22 = vpop.f32.mrb[4].mxu1 }
 0x129   :  { %973 = vmatprep.subr.bf16.mxu0 %v4529_v23  ;;  %1014 = vmatprep.subr.bf16.mxu1 %v4534_v13  ;;  %6824 = vst [vmem:[#allocation20_spill] sm:$0xff] %v4558_v11  ;;  %v4565_v23 = vld [vmem:[%s6547_s1 + $0x2a0] ss:$16 sps:$4 sm:$0xff]   ;;  %v4570_v13 = vld [vmem:[%s6547_s1 + $0x2a8] ss:$16 sps:$4 sm:$0xff]   ;;  %6837 = vst [vmem:[#allocation32_spill] sm:$0xff] %v4630_v22 }
 0x12a   :  { %6825 = vst [vmem:[#allocation21_spill] sm:$0xff] %v4565_v23  ;;  %6826 = vst [vmem:[#allocation22_spill] sm:$0xff] %v4570_v13 }
 0x12c   :  { %974 = vmatpush1.bf16.msra.mxu0 %v4541_v12  ;;  %1015 = vmatpush1.bf16.msra.mxu1 %v4546_v10  ;;  %v4577_v12 = vld [vmem:[%s6547_s1 + $0x2c4] ss:$16 sps:$4 sm:$0xff]   ;;  %v4582_v10 = vld [vmem:[%s6547_s1 + $0x2cc] ss:$16 sps:$4 sm:$0xff]  }
 0x12d   :  { %975 = vmatprep.subr.bf16.mxu0 %v4553_v1  ;;  %1016 = vmatprep.subr.bf16.mxu1 %v4558_v11  ;;  %6827 = vst [vmem:[#allocation23_spill] sm:$0xff] %v4577_v12  ;;  %6828 = vst [vmem:[#allocation24_spill] sm:$0xff] %v4582_v10  ;;  %v4589_v1 = vld [vmem:[%s6547_s1 + $0x2c0] ss:$16 sps:$4 sm:$0xff]   ;;  %v4594_v11 = vld [vmem:[%s6547_s1 + $0x2c8] ss:$16 sps:$4 sm:$0xff]  }
 0x12e   :  { %6829 = vst [vmem:[#allocation25_spill] sm:$0xff] %v4589_v1  ;;  %6830 = vst [vmem:[#allocation26_spill] sm:$0xff] %v4594_v11 }
 0x130   :  { %976 = vmatpush1.bf16.msra.mxu0 %v4565_v23  ;;  %1017 = vmatpush1.bf16.msra.mxu1 %v4570_v13  ;;  %v4601_v23 = vld [vmem:[%s6547_s1 + $0x2e4] ss:$16 sps:$4 sm:$0xff]   ;;  %v4606_v13 = vld [vmem:[%s6547_s1 + $0x2ec] ss:$16 sps:$4 sm:$0xff]  }
 0x131   :  { %977 = vmatprep.subr.bf16.mxu0 %v4577_v12  ;;  %1018 = vmatprep.subr.bf16.mxu1 %v4582_v10  ;;  %6831 = vst [vmem:[#allocation27_spill] sm:$0xff] %v4601_v23  ;;  %6832 = vst [vmem:[#allocation28_spill] sm:$0xff] %v4606_v13  ;;  %v4613_v12 = vld [vmem:[%s6547_s1 + $0x2e0] ss:$16 sps:$4 sm:$0xff]   ;;  %v4618_v10 = vld [vmem:[%s6547_s1 + $0x2e8] ss:$16 sps:$4 sm:$0xff]  }
 0x132   :  { %6833 = vst [vmem:[#allocation29_spill] sm:$0xff] %v4613_v12  ;;  %6834 = vst [vmem:[#allocation30_spill] sm:$0xff] %v4618_v10 }
 0x134   :  { %978 = vmatpush1.bf16.msra.mxu0 %v4589_v1  ;;  %1019 = vmatpush1.bf16.msra.mxu1 %v4594_v11  ;;  %v6835_v11 = vmov 0   ;;  %v4628_v1 = vpop.f32.mrb[4].mxu0 }
 0x135   :  { %979 = vmatprep.subr.bf16.mxu0 %v4601_v23  ;;  %1020 = vmatprep.subr.bf16.mxu1 %v4606_v13  ;;  %6836 = vst [vmem:[#allocation31_spill] sm:$0xff] %v4628_v1  ;;  %v4632_v20 = vpop.f32.mrb[5].mxu0  ;;  %v4634_v23 = vpop.f32.mrb[5].mxu1 }
 0x136   :  { %6838 = vst [vmem:[#allocation33_spill] sm:$0xff] %v4632_v20  ;;  %6839 = vst [vmem:[#allocation34_spill] sm:$0xff] %v4634_v23  ;;  %v4636_v13 = vpop.f32.mrb[6].mxu0 }
 0x137   :  { %6840 = vst [vmem:[#allocation35_spill] sm:$0xff] %v4636_v13 }
 0x138   :  { %980 = vmatpush1.bf16.msra.mxu0 %v4613_v12  ;;  %1021 = vmatpush1.bf16.msra.mxu1 %v4618_v10  ;;  %v4638_v12 = vpop.f32.mrb[6].mxu1  ;;  %v4640_v10 = vpop.f32.mrb[7].mxu0 }
 0x139   :  { %6841 = vst [vmem:[#allocation36_spill] sm:$0xff] %v4638_v12  ;;  %6842 = vst [vmem:[#allocation37_spill] sm:$0xff] %v4640_v10  ;;  %v4642_v18 = vpop.f32.mrb[7].mxu1 }
 0x13a   :  { %6843 = vst [vmem:[#allocation38_spill] sm:$0xff] %v4642_v18  ;;  %v4646_v17 = vpop.f32.mrb[8].mxu1 }
 0x13b   :  { %998 = vmatmul.mubr.bf16.vlgmr.msra.gmra.mrb[20].mxu0 %v4448_v31  ;;  %1039 = vmatmul.mubr.bf16.vlgmr.msra.gmra.mrb[20].mxu1 %v4448_v31  ;;  %v4644_v31 = vpop.f32.mrb[8].mxu0  ;;  %6845 = vst [vmem:[#allocation40_spill] sm:$0xff] %v4646_v17  ;;  %v4650_v1 = vpop.f32.mrb[9].mxu1 }
 0x13c   :  { %1259 = vmatprep.mubr.bf16.mxu0 %v6835_v11  ;;  %1300 = vmatprep.mubr.bf16.mxu1 %v6835_v11  ;;  %6844 = vst [vmem:[#allocation39_spill] sm:$0xff] %v4644_v31  ;;  %v4648_v8 = vpop.f32.mrb[9].mxu0  ;;  %6847 = vst [vmem:[#allocation42_spill] sm:$0xff] %v4650_v1  ;;  %v4654_v20 = vpop.f32.mrb[10].mxu1 }
 0x13d   :  { %6846 = vst [vmem:[#allocation41_spill] sm:$0xff] %v4648_v8  ;;  %v4652_v22 = vpop.f32.mrb[10].mxu0  ;;  %6849 = vst [vmem:[#allocation44_spill] sm:$0xff] %v4654_v20  ;;  %v4658_v13 = vpop.f32.mrb[11].mxu1  ;;  %v4737_v20 = vld [vmem:[%s6547_s1 + $0x340] ss:$16 sps:$4 sm:$0xff]  }
 0x13e   :  { %6848 = vst [vmem:[#allocation43_spill] sm:$0xff] %v4652_v22  ;;  %v4656_v23 = vpop.f32.mrb[11].mxu0  ;;  %6851 = vst [vmem:[#allocation46_spill] sm:$0xff] %v4658_v13  ;;  %v4662_v10 = vpop.f32.mrb[12].mxu1  ;;  %v4679_v13 = vld [vmem:[%s6547_s1 + $0x304] ss:$16 sps:$4 sm:$0xff]  }
 0x13f   :  { %6850 = vst [vmem:[#allocation45_spill] sm:$0xff] %v4656_v23  ;;  %v4660_v12 = vpop.f32.mrb[12].mxu0  ;;  %6853 = vst [vmem:[#allocation48_spill] sm:$0xff] %v4662_v10  ;;  %v4666_v31 = vpop.f32.mrb[13].mxu1  ;;  %v4684_v10 = vld [vmem:[%s6547_s1 + $0x30c] ss:$16 sps:$4 sm:$0xff]   ;;  %1227 = vmatprep.subr.bf16.mxu0 %v4679_v13 }
 0x140   :  { %6852 = vst [vmem:[#allocation47_spill] sm:$0xff] %v4660_v12  ;;  %v4664_v18 = vpop.f32.mrb[13].mxu0  ;;  %6855 = vst [vmem:[#allocation50_spill] sm:$0xff] %v4666_v31  ;;  %v4670_v8 = vpop.f32.mrb[14].mxu1  ;;  %1268 = vmatprep.subr.bf16.mxu1 %v4684_v10  ;;  %v4713_v31 = vld [vmem:[%s6547_s1 + $0x320] ss:$16 sps:$4 sm:$0xff]  }
 0x141   :  { %6854 = vst [vmem:[#allocation49_spill] sm:$0xff] %v4664_v18  ;;  %v4668_v17 = vpop.f32.mrb[14].mxu0  ;;  %6857 = vst [vmem:[#allocation52_spill] sm:$0xff] %v4670_v8  ;;  %v4674_v22 = vpop.f32.mrb[15].mxu1  ;;  %v4708_v8 = vld [vmem:[%s6547_s1 + $0x32c] ss:$16 sps:$4 sm:$0xff]  }
 0x142   :  { %6856 = vst [vmem:[#allocation51_spill] sm:$0xff] %v4668_v17  ;;  %v4672_v1 = vpop.f32.mrb[15].mxu0  ;;  %6859 = vst [vmem:[#allocation54_spill] sm:$0xff] %v4674_v22  ;;  %v4689_v17 = vld [vmem:[%s6547_s1 + $0x300] ss:$16 sps:$4 sm:$0xff]  }
 0x143   :  { %6858 = vst [vmem:[#allocation53_spill] sm:$0xff] %v4672_v1  ;;  %6860 = vst [vmem:[#allocation55_spill] sm:$0xff] %v4679_v13  ;;  %v4694_v1 = vld [vmem:[%s6547_s1 + $0x308] ss:$16 sps:$4 sm:$0xff]   ;;  %1228 = vmatpush1.bf16.msra.mxu0 %v4689_v17  ;;  %v4703_v22 = vld [vmem:[%s6547_s1 + $0x324] ss:$16 sps:$4 sm:$0xff]  }
 0x144   :  { %6861 = vst [vmem:[#allocation56_spill] sm:$0xff] %v4684_v10  ;;  %6862 = vst [vmem:[#allocation57_spill] sm:$0xff] %v4689_v17  ;;  %1269 = vmatpush1.bf16.msra.mxu1 %v4694_v1  ;;  %v4718_v18 = vld [vmem:[%s6547_s1 + $0x328] ss:$16 sps:$4 sm:$0xff]   ;;  %1229 = vmatprep.subr.bf16.mxu0 %v4703_v22  ;;  %v4727_v12 = vld [vmem:[%s6547_s1 + $0x344] ss:$16 sps:$4 sm:$0xff]  }
 0x145   :  { %6863 = vst [vmem:[#allocation58_spill] sm:$0xff] %v4694_v1  ;;  %6864 = vst [vmem:[#allocation59_spill] sm:$0xff] %v4703_v22  ;;  %1270 = vmatprep.subr.bf16.mxu1 %v4708_v8  ;;  %v4732_v23 = vld [vmem:[%s6547_s1 + $0x34c] ss:$16 sps:$4 sm:$0xff]   ;;  %v438_v22 = vadd.f32 %v4423_v24, %v4412_v15 }
 0x146   :  { %6865 = vst [vmem:[#allocation60_spill] sm:$0xff] %v4708_v8  ;;  %6866 = vst [vmem:[#allocation61_spill] sm:$0xff] %v4713_v31  ;;  %v4756_v8 = vld [vmem:[%s6547_s1 + $0x36c] ss:$16 sps:$4 sm:$0xff]  }
 0x147   :  { %6867 = vst [vmem:[#allocation62_spill] sm:$0xff] %v4718_v18  ;;  %1230 = vmatpush1.bf16.msra.mxu0 %v4713_v31  ;;  %6868 = vst [vmem:[#allocation63_spill] sm:$0xff] %v4727_v12  ;;  %v4742_v31 = vld [vmem:[%s6547_s1 + $0x348] ss:$16 sps:$4 sm:$0xff]  }
 0x148   :  { %1271 = vmatpush1.bf16.msra.mxu1 %v4718_v18  ;;  %6869 = vst [vmem:[#allocation64_spill] sm:$0xff] %v4732_v23  ;;  %6870 = vst [vmem:[#allocation65_spill] sm:$0xff] %v4737_v20  ;;  %1231 = vmatprep.subr.bf16.mxu0 %v4727_v12  ;;  %v4751_v18 = vld [vmem:[%s6547_s1 + $0x364] ss:$16 sps:$4 sm:$0xff]   ;;  %v4761_v12 = vld [vmem:[%s6547_s1 + $0x360] ss:$16 sps:$4 sm:$0xff]  }
 0x149   :  { %6871 = vst [vmem:[#allocation66_spill] sm:$0xff] %v4742_v31  ;;  %1272 = vmatprep.subr.bf16.mxu1 %v4732_v23  ;;  %6872 = vst [vmem:[#allocation67_spill] sm:$0xff] %v4751_v18  ;;  %v4780_v23 = vld [vmem:[%s6547_s1 + $0x38c] ss:$16 sps:$4 sm:$0xff]  }
 0x14a   :  { %6873 = vst [vmem:[#allocation68_spill] sm:$0xff] %v4756_v8  ;;  %6874 = vst [vmem:[#allocation69_spill] sm:$0xff] %v4761_v12 }
 0x14b   :  { %1232 = vmatpush1.bf16.msra.mxu0 %v4737_v20  ;;  %v4766_v20 = vld [vmem:[%s6547_s1 + $0x368] ss:$16 sps:$4 sm:$0xff]   ;;  %6877 = vst [vmem:[#allocation72_spill] sm:$0xff] %v4780_v23 }
 0x14c   :  { %1273 = vmatpush1.bf16.msra.mxu1 %v4742_v31  ;;  %6875 = vst [vmem:[#allocation70_spill] sm:$0xff] %v4766_v20  ;;  %1233 = vmatprep.subr.bf16.mxu0 %v4751_v18  ;;  %v4775_v31 = vld [vmem:[%s6547_s1 + $0x384] ss:$16 sps:$4 sm:$0xff]   ;;  %v4785_v18 = vld [vmem:[%s6547_s1 + $0x380] ss:$16 sps:$4 sm:$0xff]  }
 0x14d   :  { %1274 = vmatprep.subr.bf16.mxu1 %v4756_v8  ;;  %6876 = vst [vmem:[#allocation71_spill] sm:$0xff] %v4775_v31  ;;  %6878 = vst [vmem:[#allocation73_spill] sm:$0xff] %v4785_v18  ;;  %v4804_v8 = vld [vmem:[%s6547_s1 + $0x3ac] ss:$16 sps:$4 sm:$0xff]  }
 0x14e   :  { %6881 = vst [vmem:[#allocation76_spill] sm:$0xff] %v4804_v8 }
 0x14f   :  { %1234 = vmatpush1.bf16.msra.mxu0 %v4761_v12  ;;  %v4790_v12 = vld [vmem:[%s6547_s1 + $0x388] ss:$16 sps:$4 sm:$0xff]  }
 0x150   :  { %1275 = vmatpush1.bf16.msra.mxu1 %v4766_v20  ;;  %6879 = vst [vmem:[#allocation74_spill] sm:$0xff] %v4790_v12  ;;  %1235 = vmatprep.subr.bf16.mxu0 %v4775_v31  ;;  %v4799_v20 = vld [vmem:[%s6547_s1 + $0x3a4] ss:$16 sps:$4 sm:$0xff]   ;;  %v4809_v31 = vld [vmem:[%s6547_s1 + $0x3a0] ss:$16 sps:$4 sm:$0xff]  }
 0x151   :  { %1276 = vmatprep.subr.bf16.mxu1 %v4780_v23  ;;  %6880 = vst [vmem:[#allocation75_spill] sm:$0xff] %v4799_v20  ;;  %6882 = vst [vmem:[#allocation77_spill] sm:$0xff] %v4809_v31  ;;  %v4828_v23 = vld [vmem:[%s6547_s1 + $0x3cc] ss:$16 sps:$4 sm:$0xff]  }
 0x152   :  { %6885 = vst [vmem:[#allocation80_spill] sm:$0xff] %v4828_v23 }
 0x153   :  { %1236 = vmatpush1.bf16.msra.mxu0 %v4785_v18  ;;  %v4814_v18 = vld [vmem:[%s6547_s1 + $0x3a8] ss:$16 sps:$4 sm:$0xff]  }
 0x154   :  { %1277 = vmatpush1.bf16.msra.mxu1 %v4790_v12  ;;  %6883 = vst [vmem:[#allocation78_spill] sm:$0xff] %v4814_v18  ;;  %1237 = vmatprep.subr.bf16.mxu0 %v4799_v20  ;;  %v4823_v12 = vld [vmem:[%s6547_s1 + $0x3c4] ss:$16 sps:$4 sm:$0xff]   ;;  %v4833_v20 = vld [vmem:[%s6547_s1 + $0x3c0] ss:$16 sps:$4 sm:$0xff]  }
 0x155   :  { %1278 = vmatprep.subr.bf16.mxu1 %v4804_v8  ;;  %6884 = vst [vmem:[#allocation79_spill] sm:$0xff] %v4823_v12  ;;  %6886 = vst [vmem:[#allocation81_spill] sm:$0xff] %v4833_v20  ;;  %v4852_v8 = vld [vmem:[%s6547_s1 + $0x3ec] ss:$16 sps:$4 sm:$0xff]  }
 0x156   :  { %6889 = vst [vmem:[#allocation84_spill] sm:$0xff] %v4852_v8 }
 0x157   :  { %1238 = vmatpush1.bf16.msra.mxu0 %v4809_v31  ;;  %v4838_v31 = vld [vmem:[%s6547_s1 + $0x3c8] ss:$16 sps:$4 sm:$0xff]  }
 0x158   :  { %1279 = vmatpush1.bf16.msra.mxu1 %v4814_v18  ;;  %6887 = vst [vmem:[#allocation82_spill] sm:$0xff] %v4838_v31  ;;  %1239 = vmatprep.subr.bf16.mxu0 %v4823_v12  ;;  %v4847_v18 = vld [vmem:[%s6547_s1 + $0x3e4] ss:$16 sps:$4 sm:$0xff]   ;;  %v4857_v12 = vld [vmem:[%s6547_s1 + $0x3e0] ss:$16 sps:$4 sm:$0xff]  }
 0x159   :  { %1280 = vmatprep.subr.bf16.mxu1 %v4828_v23  ;;  %6888 = vst [vmem:[#allocation83_spill] sm:$0xff] %v4847_v18  ;;  %6890 = vst [vmem:[#allocation85_spill] sm:$0xff] %v4857_v12  ;;  %v509_v23 = vadd.f32 %v4426_v27, %v4416_v16 }
 0x15b   :  { %1240 = vmatpush1.bf16.msra.mxu0 %v4833_v20  ;;  %v4862_v20 = vld [vmem:[%s6547_s1 + $0x3e8] ss:$16 sps:$4 sm:$0xff]  }
 0x15c   :  { %1281 = vmatpush1.bf16.msra.mxu1 %v4838_v31  ;;  %6891 = vst [vmem:[#allocation86_spill] sm:$0xff] %v4862_v20  ;;  %1241 = vmatprep.subr.bf16.mxu0 %v4847_v18  ;;  %v436_v31 = vadd.f32 %v4420_v21, %v4408_v14 }
 0x15d   :  { %1282 = vmatprep.subr.bf16.mxu1 %v4852_v8  ;;  %v511_v8 = vadd.f32 %v4428_v28, %v4432_v29 }
 0x15f   :  { %1242 = vmatpush1.bf16.msra.mxu0 %v4857_v12 }
 0x160   :  { %1283 = vmatpush1.bf16.msra.mxu1 %v4862_v20  ;;  %1329 = vmatprep.subr.bf16.mxu0 %v4182_v34 }
 0x161   :  { %1370 = vmatprep.subr.bf16.mxu1 %v4187_v35 }
 0x1ee   :  { %v757_v18 = vpop.f32.mrb[16].mxu0  ;;  %v798_v12 = vpop.f32.mrb[16].mxu1 }
 0x1ef   :  { %v1309_v1 = vadd.f32 %v757_v18, %v436_v31  ;;  %v1311_v20 = vadd.f32 %v798_v12, %v509_v23  ;;  %v759_v17 = vpop.f32.mrb[17].mxu0  ;;  %v800_v34 = vpop.f32.mrb[17].mxu1 }
 0x1f0   :  { %v1310_v10 = vadd.f32 %v759_v17, %v438_v22  ;;  %v4878_v35 = vadd.f32 %v800_v34, %v511_v8  ;;  %v761_v13 = vpop.f32.mrb[18].mxu0  ;;  %v802_v21 = vpop.f32.mrb[18].mxu1  ;;  %v6892_v34 = vsub.s32 0, %v4398_v9 }
 0x1f1   :  { %3711 = vtanh.f32 %v1309_v1  ;;  %v762_v14 = vpop.f32.mrb[19].mxu0  ;;  %v803_v27 = vpop.f32.mrb[19].mxu1  ;;  %v3240_v1 = vld [vmem:[%s6549_s2 + $0x1] ss:$8 sm:$0xf]  ;;  %v6893_v13 = vsub.s32 1, %v4398_v9 }
 0x1f2   :  { %3713 = vtanh.f32 %v1310_v10  ;;  %v4888_v10 = vrot.slane %v3240_v1, %v6892_v34 }
 0x1f3   :  { %3715 = vtanh.f32 %v1311_v20  ;;  %v4892_v14 = vrot.slane %v3240_v1, %v6893_v13 }
 0x1fb   :  { %v3712_v24 = vpop.eup %3711 }
 0x1fc   :  { %v1317_v15 = vmul.f32 0.5, %v3712_v24  ;;  %v3714_v16 = vpop.eup %3713 }
 0x1fd   :  { %v1319_v29 = vmul.f32 0.5, %v3714_v16  ;;  %v3716_v60 = vpop.eup %3715 }
 0x1fe   :  { %v1318_v28 = vadd.f32 0.5, %v1317_v15  ;;  %v6894_v15 = vsub.s32 2, %v4398_v9 }
 0x1ff   :  { %v1320_v18 = vadd.f32 0.5, %v1319_v29 }
 0x200   :  { %v1324_v12 = vmul.f32 %v3716_v60, %v1318_v28  ;;  %v4896_v16 = vrot.slane %v3240_v1, %v6894_v15 }
 0x201   :  { %v1323_v23 = vmul.f32 %v1320_v18, %v4435_v19  ;;  %v6895_v18 = vsub.s32 3, %v4398_v9 }
 0x203   :  { %v4881_v17 = vadd.f32 %v1324_v12, %v1323_v23  ;;  %v4903_v12 = vrot.slane %v3240_v1, %v6895_v18  ;;  %v6909_v18 = vld [vmem:[#allocation21_spill] sm:$0xff] }
 0x20e   :  { %v999_v29 = vpop.f32.mrb[20].mxu0  ;;  %v1040_v19 = vpop.f32.mrb[20].mxu1 }
 0x20f   :  { %v1000_v60 = vadd.f32 %v999_v29, %v4888_v10  ;;  %v1001_v8 = vpop.f32.mrb[21].mxu0  ;;  %v1042_v20 = vpop.f32.mrb[21].mxu1  ;;  %v1041_v27 = vadd.f32 %v1040_v19, %v4896_v16 }
 0x210   :  { %v1002_v22 = vadd.f32 %v1001_v8, %v4892_v14  ;;  %v1003_v31 = vpop.f32.mrb[22].mxu0  ;;  %v1044_v21 = vpop.f32.mrb[22].mxu1  ;;  %v1043_v23 = vadd.f32 %v1042_v20, %v4903_v12 }
 0x211   :  { %3717 = vtanh.f32 %v1000_v60  ;;  %v1004_v24 = vpop.f32.mrb[23].mxu0  ;;  %v1045_v28 = vpop.f32.mrb[23].mxu1 }
 0x212   :  { %3719 = vtanh.f32 %v1002_v22 }
 0x213   :  { %3721 = vtanh.f32 %v1041_v27 }
 0x214   :  { %3723 = vtanh.f32 %v1043_v23  ;;  %v6910_v23 = vld [vmem:[#allocation22_spill] sm:$0xff] }
 0x21b   :  { %v3718_v34 = vpop.eup %3717 }
 0x21c   :  { %v1055_v13 = vmul.f32 0.5, %v3718_v34  ;;  %v3720_v15 = vpop.eup %3719  ;;  %v6911_v34 = vld [vmem:[#allocation23_spill] sm:$0xff] }
 0x21d   :  { %v1057_v8 = vmul.f32 0.5, %v3720_v15  ;;  %v3722_v31 = vpop.eup %3721  ;;  %v6913_v15 = vld [vmem:[#allocation25_spill] sm:$0xff] }
 0x21e   :  { %v1056_v29 = vadd.f32 0.5, %v1055_v13  ;;  %v3724_v22 = vpop.eup %3723  ;;  %v6912_v13 = vld [vmem:[#allocation24_spill] sm:$0xff] }
 0x21f   :  { %v1058_v60 = vadd.f32 0.5, %v1057_v8  ;;  %v1059_v9 = vmul.f32 0.5, %v3724_v22  ;;  %v6915_v8 = vld [vmem:[#allocation27_spill] sm:$0xff]  ;;  %v6920_v22 = vld [vmem:[#allocation56_spill] sm:$0xff] }
 0x220   :  { %v1062_v21 = vmul.f32 %v3722_v31, %v1056_v29  ;;  %v6914_v29 = vld [vmem:[#allocation26_spill] sm:$0xff]  ;;  %v6916_v31 = vld [vmem:[#allocation28_spill] sm:$0xff] }
 0x221   :  { %v1061_v19 = vmul.f32 0.0, %v1058_v60  ;;  %v1060_v1 = vadd.f32 0.5, %v1059_v9  ;;  %v6917_v60 = vld [vmem:[#allocation29_spill] sm:$0xff] }
 0x222   :  { %v6921_v9 = vld [vmem:[#allocation57_spill] sm:$0xff] }
 0x223   :  { %v4906_v24 = vadd.f32 %v1062_v21, %v1061_v19  ;;  %v6918_v21 = vld [vmem:[#allocation30_spill] sm:$0xff]  ;;  %v6919_v19 = vld [vmem:[#allocation55_spill] sm:$0xff] }
 0x225   :  { %3725 = vtanh.f32 %v4906_v24 }
 0x226   :  { %3727 = vtanh.f32 %v4878_v35 }
 0x227   :  { %3729 = vtanh.f32 %v4881_v17 }
 0x22f   :  { %v3726_v27 = vpop.eup %3725 }
 0x230   :  { %v1065_v28 = vmul.f32 %v3726_v27, %v1060_v1  ;;  %v6922_v1 = vld [vmem:[#allocation58_spill] sm:$0xff]  ;;  %v6923_v27 = vld [vmem:[#allocation59_spill] sm:$0xff] }
 0x232   :  { %v1066_v20 = vpack.c.bf16 %v1065_v28, %v1065_v28  ;;  %v6924_v28 = vld [vmem:[#allocation60_spill] sm:$0xff] }
 0x234   :  { %1260 = vmatmul.mubr.bf16.vlgmr.msra.gmra.mrb[24].mxu0 %v1066_v20  ;;  %1301 = vmatmul.mubr.bf16.vlgmr.msra.gmra.mrb[24].mxu1 %v1066_v20  ;;  %v6925_v20 = vld [vmem:[#allocation61_spill] sm:$0xff] }
 0x235   :  { %1330 = vmatpush1.bf16.msra.mxu0 %v4192_v36  ;;  %1371 = vmatpush1.bf16.msra.mxu1 %v4197_v37  ;;  %v3728_v36 = vpop.eup %3727 }
 0x236   :  { %1331 = vmatprep.subr.bf16.mxu0 %v4206_v38  ;;  %1372 = vmatprep.subr.bf16.mxu1 %v4211_v39  ;;  %v1321_v35 = vmul.f32 0.5, %v3728_v36  ;;  %v3730_v37 = vpop.eup %3729  ;;  %v6926_v36 = vld [vmem:[#allocation62_spill] sm:$0xff] }
 0x237   :  { %1361 = vmatprep.mubr.bf16.mxu0 %v6835_v11  ;;  %1402 = vmatprep.mubr.bf16.mxu1 %v6835_v11 }
 0x238   :  { %v1322_v38 = vadd.f32 0.5, %v1321_v35  ;;  %v6927_v35 = vld [vmem:[#allocation63_spill] sm:$0xff] }
 0x239   :  { %1332 = vmatpush1.bf16.msra.mxu0 %v4216_v40  ;;  %1373 = vmatpush1.bf16.msra.mxu1 %v4221_v41  ;;  %v6896_v41 = vld [vmem:[#allocation8_spill] sm:$0xff] }
 0x23a   :  { %1333 = vmatprep.subr.bf16.mxu0 %v4233_v43  ;;  %1374 = vmatprep.subr.bf16.mxu1 %v4238_v44  ;;  %v1327_v39 = vmul.f32 %v3730_v37, %v1322_v38  ;;  %v6897_v43 = vld [vmem:[#allocation9_spill] sm:$0xff]  ;;  %v6898_v44 = vld [vmem:[#allocation10_spill] sm:$0xff]  ;;  %v6928_v37 = vld [vmem:[#allocation64_spill] sm:$0xff] }
 0x23b   :  { %v6929_v38 = vld [vmem:[#allocation65_spill] sm:$0xff] }
 0x23c   :  { %v1328_v40 = vpack.c.bf16 %v1327_v39, %v1327_v39  ;;  %v6930_v39 = vld [vmem:[#allocation66_spill] sm:$0xff] }
 0x23d   :  { %1334 = vmatpush1.bf16.msra.mxu0 %v4243_v45  ;;  %1375 = vmatpush1.bf16.msra.mxu1 %v4248_v46  ;;  %v6899_v45 = vld [vmem:[#allocation11_spill] sm:$0xff]  ;;  %v6900_v46 = vld [vmem:[#allocation12_spill] sm:$0xff] }
 0x23e   :  { %1335 = vmatprep.subr.bf16.mxu0 %v4259_v47  ;;  %1376 = vmatprep.subr.bf16.mxu1 %v4264_v48  ;;  %v6901_v47 = vld [vmem:[#allocation13_spill] sm:$0xff]  ;;  %v6902_v48 = vld [vmem:[#allocation14_spill] sm:$0xff] }
 0x241   :  { %1336 = vmatpush1.bf16.msra.mxu0 %v4269_v49  ;;  %1377 = vmatpush1.bf16.msra.mxu1 %v4274_v50  ;;  %v6903_v49 = vld [vmem:[#allocation15_spill] sm:$0xff]  ;;  %v6904_v50 = vld [vmem:[#allocation16_spill] sm:$0xff] }
 0x242   :  { %1337 = vmatprep.subr.bf16.mxu0 %v4286_v52  ;;  %1378 = vmatprep.subr.bf16.mxu1 %v4291_v53  ;;  %v6905_v52 = vld [vmem:[#allocation17_spill] sm:$0xff]  ;;  %v6906_v53 = vld [vmem:[#allocation18_spill] sm:$0xff] }
 0x245   :  { %1338 = vmatpush1.bf16.msra.mxu0 %v4296_v54  ;;  %1379 = vmatpush1.bf16.msra.mxu1 %v4301_v55  ;;  %v6907_v54 = vld [vmem:[#allocation19_spill] sm:$0xff]  ;;  %v6908_v55 = vld [vmem:[#allocation20_spill] sm:$0xff] }
 0x246   :  { %1339 = vmatprep.subr.bf16.mxu0 %v4312_v56  ;;  %1380 = vmatprep.subr.bf16.mxu1 %v4317_v57 }
 0x249   :  { %1340 = vmatpush1.bf16.msra.mxu0 %v4322_v58  ;;  %1381 = vmatpush1.bf16.msra.mxu1 %v4327_v59 }
 0x24a   :  { %1341 = vmatprep.subr.bf16.mxu0 %v4339_v61  ;;  %1382 = vmatprep.subr.bf16.mxu1 %v4344_v62 }
 0x24d   :  { %1342 = vmatpush1.bf16.msra.mxu0 %v4349_v63  ;;  %1383 = vmatpush1.bf16.msra.mxu1 %v4354_v0 }
 0x24e   :  { %1343 = vmatprep.subr.bf16.mxu0 %v4365_v2  ;;  %1384 = vmatprep.subr.bf16.mxu1 %v4370_v3 }
 0x251   :  { %1344 = vmatpush1.bf16.msra.mxu0 %v4375_v4  ;;  %1385 = vmatpush1.bf16.msra.mxu1 %v4380_v5 }
 0x252   :  { %1411 = vmatprep.subr.bf16.mxu0 %v4389_v6  ;;  %1452 = vmatprep.subr.bf16.mxu1 %v4394_v7 }
 0x254   :  { %1362 = vmatmul.mubr.bf16.vlgmr.msra.gmra.mrb[28].mxu0 %v1328_v40  ;;  %1403 = vmatmul.mubr.bf16.vlgmr.msra.gmra.mrb[28].mxu1 %v1328_v40 }
 0x255   :  { %1412 = vmatpush1.bf16.msra.mxu0 %v4441_v26  ;;  %1453 = vmatpush1.bf16.msra.mxu1 %v4446_v30 }
 0x256   :  { %1413 = vmatprep.subr.bf16.mxu0 %v4453_v32  ;;  %1454 = vmatprep.subr.bf16.mxu1 %v4458_v33 }
 0x257   :  { %1443 = vmatprep.mubr.bf16.mxu0 %v6835_v11  ;;  %1484 = vmatprep.mubr.bf16.mxu1 %v6835_v11 }
 0x259   :  { %1414 = vmatpush1.bf16.msra.mxu0 %v4467_v25  ;;  %1455 = vmatpush1.bf16.msra.mxu1 %v4472_v42 }
 0x25a   :  { %1415 = vmatprep.subr.bf16.mxu0 %v4479_v51  ;;  %1456 = vmatprep.subr.bf16.mxu1 %v6896_v41 }
 0x25d   :  { %1416 = vmatpush1.bf16.msra.mxu0 %v6897_v43  ;;  %1457 = vmatpush1.bf16.msra.mxu1 %v6898_v44 }
 0x25e   :  { %1417 = vmatprep.subr.bf16.mxu0 %v6899_v45  ;;  %1458 = vmatprep.subr.bf16.mxu1 %v6900_v46 }
 0x261   :  { %1418 = vmatpush1.bf16.msra.mxu0 %v6901_v47  ;;  %1459 = vmatpush1.bf16.msra.mxu1 %v6902_v48 }
 0x262   :  { %1419 = vmatprep.subr.bf16.mxu0 %v6903_v49  ;;  %1460 = vmatprep.subr.bf16.mxu1 %v6904_v50 }
 0x265   :  { %1420 = vmatpush1.bf16.msra.mxu0 %v6905_v52  ;;  %1461 = vmatpush1.bf16.msra.mxu1 %v6906_v53 }
 0x266   :  { %1421 = vmatprep.subr.bf16.mxu0 %v6907_v54  ;;  %1462 = vmatprep.subr.bf16.mxu1 %v6908_v55 }
 0x269   :  { %1422 = vmatpush1.bf16.msra.mxu0 %v6909_v18  ;;  %1463 = vmatpush1.bf16.msra.mxu1 %v6910_v23 }
 0x26a   :  { %1423 = vmatprep.subr.bf16.mxu0 %v6911_v34  ;;  %1464 = vmatprep.subr.bf16.mxu1 %v6912_v13 }
 0x26d   :  { %1424 = vmatpush1.bf16.msra.mxu0 %v6913_v15  ;;  %1465 = vmatpush1.bf16.msra.mxu1 %v6914_v29 }
 0x26e   :  { %1425 = vmatprep.subr.bf16.mxu0 %v6915_v8  ;;  %1466 = vmatprep.subr.bf16.mxu1 %v6916_v31  ;;  %v6960_v31 = vld [vmem:[#allocation34_spill] sm:$0xff] }
 0x271   :  { %1426 = vmatpush1.bf16.msra.mxu0 %v6917_v60  ;;  %1467 = vmatpush1.bf16.msra.mxu1 %v6918_v21  ;;  %v6957_v21 = vld [vmem:[#allocation5_spill] sm:$0xff] }
 0x272   :  { %1513 = vmatprep.subr.bf16.mxu0 %v6919_v19  ;;  %1554 = vmatprep.subr.bf16.mxu1 %v6920_v22  ;;  %v6956_v19 = vld [vmem:[#allocation32_spill] sm:$0xff] }
 0x274   :  { %1444 = vmatmul.mubr.bf16.vlgmr.msra.gmra.mrb[24].mxu0 %v1328_v40  ;;  %1485 = vmatmul.mubr.bf16.vlgmr.msra.gmra.mrb[24].mxu1 %v1328_v40  ;;  %v6931_v40 = vld [vmem:[#allocation67_spill] sm:$0xff] }
 0x275   :  { %1514 = vmatpush1.bf16.msra.mxu0 %v6921_v9  ;;  %1555 = vmatpush1.bf16.msra.mxu1 %v6922_v1  ;;  %v6934_v1 = vld [vmem:[#allocation70_spill] sm:$0xff]  ;;  %v6935_v9 = vld [vmem:[#allocation71_spill] sm:$0xff] }
 0x276   :  { %1515 = vmatprep.subr.bf16.mxu0 %v6923_v27  ;;  %1556 = vmatprep.subr.bf16.mxu1 %v6924_v28  ;;  %v6932_v27 = vld [vmem:[#allocation68_spill] sm:$0xff]  ;;  %v6933_v28 = vld [vmem:[#allocation69_spill] sm:$0xff] }
 0x277   :  { %1545 = vmatprep.mubr.bf16.mxu0 %v6835_v11  ;;  %1586 = vmatprep.mubr.bf16.mxu1 %v6835_v11 }
 0x279   :  { %1516 = vmatpush1.bf16.msra.mxu0 %v6925_v20  ;;  %1557 = vmatpush1.bf16.msra.mxu1 %v6926_v36  ;;  %v6936_v20 = vld [vmem:[#allocation72_spill] sm:$0xff]  ;;  %v6937_v36 = vld [vmem:[#allocation73_spill] sm:$0xff] }
 0x27a   :  { %1517 = vmatprep.subr.bf16.mxu0 %v6927_v35  ;;  %1558 = vmatprep.subr.bf16.mxu1 %v6928_v37  ;;  %v6938_v35 = vld [vmem:[#allocation74_spill] sm:$0xff]  ;;  %v6939_v37 = vld [vmem:[#allocation75_spill] sm:$0xff] }
 0x27d   :  { %1518 = vmatpush1.bf16.msra.mxu0 %v6929_v38  ;;  %1559 = vmatpush1.bf16.msra.mxu1 %v6930_v39  ;;  %v6940_v38 = vld [vmem:[#allocation76_spill] sm:$0xff]  ;;  %v6941_v39 = vld [vmem:[#allocation77_spill] sm:$0xff] }
 0x27e   :  { %1519 = vmatprep.subr.bf16.mxu0 %v6931_v40  ;;  %1560 = vmatprep.subr.bf16.mxu1 %v6932_v27  ;;  %v6942_v40 = vld [vmem:[#allocation78_spill] sm:$0xff]  ;;  %v6943_v27 = vld [vmem:[#allocation79_spill] sm:$0xff] }
 0x281   :  { %1520 = vmatpush1.bf16.msra.mxu0 %v6933_v28  ;;  %1561 = vmatpush1.bf16.msra.mxu1 %v6934_v1  ;;  %v6944_v28 = vld [vmem:[#allocation80_spill] sm:$0xff]  ;;  %v6945_v1 = vld [vmem:[#allocation81_spill] sm:$0xff] }
 0x282   :  { %1521 = vmatprep.subr.bf16.mxu0 %v6935_v9  ;;  %1562 = vmatprep.subr.bf16.mxu1 %v6936_v20  ;;  %v6946_v9 = vld [vmem:[#allocation82_spill] sm:$0xff]  ;;  %v6947_v20 = vld [vmem:[#allocation83_spill] sm:$0xff] }
 0x285   :  { %1522 = vmatpush1.bf16.msra.mxu0 %v6937_v36  ;;  %1563 = vmatpush1.bf16.msra.mxu1 %v6938_v35  ;;  %v6948_v36 = vld [vmem:[#allocation84_spill] sm:$0xff]  ;;  %v6949_v35 = vld [vmem:[#allocation85_spill] sm:$0xff] }
 0x286   :  { %1523 = vmatprep.subr.bf16.mxu0 %v6939_v37  ;;  %1564 = vmatprep.subr.bf16.mxu1 %v6940_v38  ;;  %v6950_v37 = vld [vmem:[#allocation86_spill] sm:$0xff] }
 0x287   :  { %v6951_v38 = vld [vmem:[#allocation2_spill] sm:$0xff] }
 0x289   :  { %1524 = vmatpush1.bf16.msra.mxu0 %v6941_v39  ;;  %1565 = vmatpush1.bf16.msra.mxu1 %v6942_v40  ;;  %v6952_v39 = vld [vmem:[#allocation3_spill] sm:$0xff]  ;;  %v6953_v40 = vld [vmem:[#allocation4_spill] sm:$0xff] }
 0x28a   :  { %1525 = vmatprep.subr.bf16.mxu0 %v6943_v27  ;;  %1566 = vmatprep.subr.bf16.mxu1 %v6944_v28  ;;  %v6954_v27 = vld [vmem:[#allocation31_spill] sm:$0xff]  ;;  %v6955_v28 = vld [vmem:[#allocation6_spill] sm:$0xff] }
 0x28b   :  { %v442_v22 = vadd.f32 %v6954_v27, %v6953_v40 }
 0x28d   :  { %1526 = vmatpush1.bf16.msra.mxu0 %v6945_v1  ;;  %1567 = vmatpush1.bf16.msra.mxu1 %v6946_v9  ;;  %v515_v1 = vadd.f32 %v6956_v19, %v6955_v28  ;;  %v6958_v9 = vld [vmem:[#allocation33_spill] sm:$0xff] }
 0x28e   :  { %1527 = vmatprep.subr.bf16.mxu0 %v6947_v20  ;;  %1568 = vmatprep.subr.bf16.mxu1 %v6948_v36  ;;  %v444_v60 = vadd.f32 %v6958_v9, %v6957_v21  ;;  %v6959_v20 = vld [vmem:[#allocation7_spill] sm:$0xff] }
 0x28f   :  { %v517_v36 = vadd.f32 %v6960_v31, %v6959_v20 }
 0x291   :  { %1528 = vmatpush1.bf16.msra.mxu0 %v6949_v35  ;;  %1569 = vmatpush1.bf16.msra.mxu1 %v6950_v37 }
 0x292   :  { %1615 = vmatprep.subr.bf16.mxu0 %v6951_v38  ;;  %1656 = vmatprep.subr.bf16.mxu1 %v6952_v39 }
 0x327   :  { %v1363_v8 = vpop.f32.mrb[28].mxu0  ;;  %v1404_v35 = vpop.f32.mrb[28].mxu1 }
 0x328   :  { %v1595_v29 = vadd.f32 %v1363_v8, %v442_v22  ;;  %v1597_v37 = vadd.f32 %v1404_v35, %v515_v1  ;;  %v1365_v15 = vpop.f32.mrb[29].mxu0  ;;  %v1406_v38 = vpop.f32.mrb[29].mxu1 }
 0x329   :  { %v1596_v13 = vadd.f32 %v1365_v15, %v444_v60  ;;  %v5021_v39 = vadd.f32 %v1406_v38, %v517_v36  ;;  %v1367_v34 = vpop.f32.mrb[30].mxu0  ;;  %v1408_v27 = vpop.f32.mrb[30].mxu1 }
 0x32a   :  { %3731 = vtanh.f32 %v1595_v29  ;;  %v1368_v40 = vpop.f32.mrb[31].mxu0  ;;  %v1409_v19 = vpop.f32.mrb[31].mxu1 }
 0x32b   :  { %3733 = vtanh.f32 %v1596_v13 }
 0x32c   :  { %3735 = vtanh.f32 %v1597_v37 }
 0x334   :  { %v3732_v9 = vpop.eup %3731 }
 0x335   :  { %v1603_v21 = vmul.f32 0.5, %v3732_v9  ;;  %v3734_v28 = vpop.eup %3733 }
 0x336   :  { %v1605_v20 = vmul.f32 0.5, %v3734_v28  ;;  %v3736_v23 = vpop.eup %3735 }
 0x337   :  { %v1604_v31 = vadd.f32 0.5, %v1603_v21 }
 0x338   :  { %v1606_v8 = vadd.f32 0.5, %v1605_v20 }
 0x339   :  { %v1610_v22 = vmul.f32 %v3736_v23, %v1604_v31 }
 0x33a   :  { %v1609_v1 = vmul.f32 %v1606_v8, %v4881_v17 }
 0x33c   :  { %v5024_v15 = vadd.f32 %v1610_v22, %v1609_v1 }
 0x347   :  { %v1445_v60 = vpop.f32.mrb[24].mxu0  ;;  %v1486_v34 = vpop.f32.mrb[24].mxu1 }
 0x348   :  { %v1446_v29 = vadd.f32 %v1445_v60, %v4888_v10  ;;  %v1447_v36 = vpop.f32.mrb[25].mxu0  ;;  %v1488_v35 = vpop.f32.mrb[25].mxu1  ;;  %v1487_v21 = vadd.f32 %v1486_v34, %v4896_v16 }
 0x349   :  { %v1448_v13 = vadd.f32 %v1447_v36, %v4892_v14  ;;  %v1449_v37 = vpop.f32.mrb[26].mxu0  ;;  %v1490_v40 = vpop.f32.mrb[26].mxu1  ;;  %v1489_v17 = vadd.f32 %v1488_v35, %v4903_v12 }
 0x34a   :  { %3737 = vtanh.f32 %v1446_v29  ;;  %v1450_v28 = vpop.f32.mrb[27].mxu0  ;;  %v1491_v20 = vpop.f32.mrb[27].mxu1  ;;  %v5037_v40 = vld [vmem:[%s6547_s1 + $0x100] ss:$16 sps:$4 sm:$0xff]  }
 0x34b   :  { %3739 = vtanh.f32 %v1448_v13  ;;  %v5055_v28 = vld [vmem:[%s6547_s1 + $0x12c] ss:$16 sps:$4 sm:$0xff]   ;;  %v5063_v20 = vld [vmem:[%s6547_s1 + $0x120] ss:$16 sps:$4 sm:$0xff]  }
 0x34c   :  { %3741 = vtanh.f32 %v1487_v21  ;;  %v5049_v21 = vld [vmem:[%s6547_s1 + $0x124] ss:$16 sps:$4 sm:$0xff]  }
 0x34d   :  { %3743 = vtanh.f32 %v1489_v17  ;;  %v5069_v17 = vld [vmem:[%s6547_s1 + $0x128] ss:$16 sps:$4 sm:$0xff]  }
 0x354   :  { %v3738_v23 = vpop.eup %3737 }
 0x355   :  { %v1501_v38 = vmul.f32 0.5, %v3738_v23  ;;  %v3740_v27 = vpop.eup %3739  ;;  %v5075_v23 = vld [vmem:[%s6547_s1 + $0x144] ss:$16 sps:$4 sm:$0xff]  }
 0x356   :  { %v1503_v9 = vmul.f32 0.5, %v3740_v27  ;;  %v3742_v31 = vpop.eup %3741  ;;  %v5088_v27 = vld [vmem:[%s6547_s1 + $0x140] ss:$16 sps:$4 sm:$0xff]  }
 0x357   :  { %v1502_v19 = vadd.f32 0.5, %v1501_v38  ;;  %v3744_v34 = vpop.eup %3743  ;;  %v5081_v38 = vld [vmem:[%s6547_s1 + $0x14c] ss:$16 sps:$4 sm:$0xff]  }
 0x358   :  { %v1504_v8 = vadd.f32 0.5, %v1503_v9  ;;  %v1505_v29 = vmul.f32 0.5, %v3744_v34  ;;  %v5100_v9 = vld [vmem:[%s6547_s1 + $0x164] ss:$16 sps:$4 sm:$0xff]  }
 0x359   :  { %v1508_v22 = vmul.f32 %v3742_v31, %v1502_v19  ;;  %v5094_v19 = vld [vmem:[%s6547_s1 + $0x148] ss:$16 sps:$4 sm:$0xff]   ;;  %v5113_v31 = vld [vmem:[%s6547_s1 + $0x160] ss:$16 sps:$4 sm:$0xff]  }
 0x35a   :  { %v1507_v1 = vmul.f32 %v1504_v8, %v4906_v24  ;;  %v1506_v36 = vadd.f32 0.5, %v1505_v29  ;;  %v5043_v24 = vld [vmem:[%s6547_s1 + $0x108] ss:$16 sps:$4 sm:$0xff]   ;;  %v5137_v29 = vld [vmem:[%s6547_s1 + $0x180] ss:$16 sps:$4 sm:$0xff]  }
 0x35b   :  { %v5119_v8 = vld [vmem:[%s6547_s1 + $0x168] ss:$16 sps:$4 sm:$0xff]  }
 0x35c   :  { %v5031_v60 = vadd.f32 %v1508_v22, %v1507_v1  ;;  %v5125_v22 = vld [vmem:[%s6547_s1 + $0x184] ss:$16 sps:$4 sm:$0xff]   ;;  %v5131_v1 = vld [vmem:[%s6547_s1 + $0x18c] ss:$16 sps:$4 sm:$0xff]  }
 0x35e   :  { %3745 = vtanh.f32 %v5031_v60 }
 0x35f   :  { %3747 = vtanh.f32 %v5021_v39  ;;  %v5106_v39 = vld [vmem:[%s6547_s1 + $0x16c] ss:$16 sps:$4 sm:$0xff]  }
 0x360   :  { %3749 = vtanh.f32 %v5024_v15 }
 0x368   :  { %v3746_v13 = vpop.eup %3745 }
 0x369   :  { %v1511_v35 = vmul.f32 %v3746_v13, %v1506_v36  ;;  %v3748_v34 = vpop.eup %3747  ;;  %v5143_v36 = vld [vmem:[%s6547_s1 + $0x188] ss:$16 sps:$4 sm:$0xff]  }
 0x36a   :  { %6961 = vst [vmem:[#allocation8_spill] sm:$0xff] %v5143_v36  ;;  %v1607_v13 = vmul.f32 0.5, %v3748_v34  ;;  %v6996_v34 = vld [vmem:[#allocation80_spill] sm:$0xff] }
 0x36b   :  { %v1512_v37 = vpack.c.bf16 %v1511_v35, %v1511_v35  ;;  %v3750_v35 = vpop.eup %3749 }
 0x36d   :  { %1546 = vmatmul.mubr.bf16.vlgmr.msra.gmra.mrb[32].mxu0 %v1512_v37  ;;  %1587 = vmatmul.mubr.bf16.vlgmr.msra.gmra.mrb[32].mxu1 %v1512_v37  ;;  %v1608_v37 = vadd.f32 0.5, %v1607_v13  ;;  %v6998_v13 = vld [vmem:[#allocation82_spill] sm:$0xff] }
 0x36e   :  { %1616 = vmatpush1.bf16.msra.mxu0 %v5037_v40  ;;  %1657 = vmatpush1.bf16.msra.mxu1 %v5043_v24 }
 0x36f   :  { %1617 = vmatprep.subr.bf16.mxu0 %v5049_v21  ;;  %1658 = vmatprep.subr.bf16.mxu1 %v5055_v28 }
 0x370   :  { %1647 = vmatprep.mubr.bf16.mxu0 %v6835_v11  ;;  %1688 = vmatprep.mubr.bf16.mxu1 %v6835_v11 }
 0x372   :  { %1618 = vmatpush1.bf16.msra.mxu0 %v5063_v20  ;;  %1659 = vmatpush1.bf16.msra.mxu1 %v5069_v17 }
 0x373   :  { %1619 = vmatprep.subr.bf16.mxu0 %v5075_v23  ;;  %1660 = vmatprep.subr.bf16.mxu1 %v5081_v38 }
 0x376   :  { %1620 = vmatpush1.bf16.msra.mxu0 %v5088_v27  ;;  %1661 = vmatpush1.bf16.msra.mxu1 %v5094_v19 }
 0x377   :  { %1621 = vmatprep.subr.bf16.mxu0 %v5100_v9  ;;  %1662 = vmatprep.subr.bf16.mxu1 %v5106_v39 }
 0x37a   :  { %1622 = vmatpush1.bf16.msra.mxu0 %v5113_v31  ;;  %1663 = vmatpush1.bf16.msra.mxu1 %v5119_v8 }
 0x37b   :  { %1623 = vmatprep.subr.bf16.mxu0 %v5125_v22  ;;  %1664 = vmatprep.subr.bf16.mxu1 %v5131_v1 }
 0x37e   :  { %1624 = vmatpush1.bf16.msra.mxu0 %v5137_v29  ;;  %1665 = vmatpush1.bf16.msra.mxu1 %v5143_v36  ;;  %v1613_v36 = vmul.f32 %v3750_v35, %v1608_v37  ;;  %v6999_v35 = vld [vmem:[#allocation83_spill] sm:$0xff]  ;;  %v7000_v37 = vld [vmem:[#allocation84_spill] sm:$0xff] }
 0x37f   :  { %1625 = vmatprep.subr.bf16.mxu0 %v4312_v56  ;;  %1666 = vmatprep.subr.bf16.mxu1 %v4317_v57  ;;  %v6962_v57 = vld [vmem:[#allocation22_spill] sm:$0xff] }
 0x380   :  { %v1614_v56 = vpack.c.bf16 %v1613_v36, %v1613_v36  ;;  %v6997_v36 = vld [vmem:[#allocation81_spill] sm:$0xff] }
 0x382   :  { %1626 = vmatpush1.bf16.msra.mxu0 %v4322_v58  ;;  %1667 = vmatpush1.bf16.msra.mxu1 %v4327_v59  ;;  %v6963_v58 = vld [vmem:[#allocation23_spill] sm:$0xff]  ;;  %v6964_v59 = vld [vmem:[#allocation24_spill] sm:$0xff] }
 0x383   :  { %1627 = vmatprep.subr.bf16.mxu0 %v4339_v61  ;;  %1668 = vmatprep.subr.bf16.mxu1 %v4344_v62  ;;  %v6965_v61 = vld [vmem:[#allocation25_spill] sm:$0xff]  ;;  %v6966_v62 = vld [vmem:[#allocation26_spill] sm:$0xff] }
 0x386   :  { %1628 = vmatpush1.bf16.msra.mxu0 %v4349_v63  ;;  %1669 = vmatpush1.bf16.msra.mxu1 %v4354_v0  ;;  %v6967_v63 = vld [vmem:[#allocation27_spill] sm:$0xff]  ;;  %v6968_v0 = vld [vmem:[#allocation28_spill] sm:$0xff] }
 0x387   :  { %1629 = vmatprep.subr.bf16.mxu0 %v4365_v2  ;;  %1670 = vmatprep.subr.bf16.mxu1 %v4370_v3  ;;  %v6969_v2 = vld [vmem:[#allocation29_spill] sm:$0xff]  ;;  %v6970_v3 = vld [vmem:[#allocation30_spill] sm:$0xff] }
 0x38a   :  { %1630 = vmatpush1.bf16.msra.mxu0 %v4375_v4  ;;  %1671 = vmatpush1.bf16.msra.mxu1 %v4380_v5  ;;  %v6971_v4 = vld [vmem:[#allocation55_spill] sm:$0xff]  ;;  %v6972_v5 = vld [vmem:[#allocation56_spill] sm:$0xff] }
 0x38b   :  { %1697 = vmatprep.subr.bf16.mxu0 %v4389_v6  ;;  %1738 = vmatprep.subr.bf16.mxu1 %v4394_v7  ;;  %v6973_v6 = vld [vmem:[#allocation57_spill] sm:$0xff]  ;;  %v6974_v7 = vld [vmem:[#allocation58_spill] sm:$0xff] }
 0x38d   :  { %1648 = vmatmul.mubr.bf16.vlgmr.msra.gmra.mrb[36].mxu0 %v1614_v56  ;;  %1689 = vmatmul.mubr.bf16.vlgmr.msra.gmra.mrb[36].mxu1 %v1614_v56 }
 0x38e   :  { %1698 = vmatpush1.bf16.msra.mxu0 %v4441_v26  ;;  %1739 = vmatpush1.bf16.msra.mxu1 %v4446_v30  ;;  %v6975_v26 = vld [vmem:[#allocation59_spill] sm:$0xff]  ;;  %v6976_v30 = vld [vmem:[#allocation60_spill] sm:$0xff] }
 0x38f   :  { %1699 = vmatprep.subr.bf16.mxu0 %v4453_v32  ;;  %1740 = vmatprep.subr.bf16.mxu1 %v4458_v33  ;;  %v6977_v32 = vld [vmem:[#allocation61_spill] sm:$0xff]  ;;  %v6978_v33 = vld [vmem:[#allocation62_spill] sm:$0xff] }
 0x390   :  { %1729 = vmatprep.mubr.bf16.mxu0 %v6835_v11  ;;  %1770 = vmatprep.mubr.bf16.mxu1 %v6835_v11 }
 0x392   :  { %1700 = vmatpush1.bf16.msra.mxu0 %v4467_v25  ;;  %1741 = vmatpush1.bf16.msra.mxu1 %v4472_v42  ;;  %v6979_v25 = vld [vmem:[#allocation63_spill] sm:$0xff]  ;;  %v6980_v42 = vld [vmem:[#allocation64_spill] sm:$0xff] }
 0x393   :  { %1701 = vmatprep.subr.bf16.mxu0 %v4479_v51  ;;  %1742 = vmatprep.subr.bf16.mxu1 %v6896_v41  ;;  %v6981_v51 = vld [vmem:[#allocation65_spill] sm:$0xff]  ;;  %v6982_v41 = vld [vmem:[#allocation66_spill] sm:$0xff] }
 0x396   :  { %1702 = vmatpush1.bf16.msra.mxu0 %v6897_v43  ;;  %1743 = vmatpush1.bf16.msra.mxu1 %v6898_v44  ;;  %v6983_v43 = vld [vmem:[#allocation67_spill] sm:$0xff]  ;;  %v6984_v44 = vld [vmem:[#allocation68_spill] sm:$0xff] }
 0x397   :  { %1703 = vmatprep.subr.bf16.mxu0 %v6899_v45  ;;  %1744 = vmatprep.subr.bf16.mxu1 %v6900_v46  ;;  %v6985_v45 = vld [vmem:[#allocation69_spill] sm:$0xff]  ;;  %v6986_v46 = vld [vmem:[#allocation70_spill] sm:$0xff] }
 0x39a   :  { %1704 = vmatpush1.bf16.msra.mxu0 %v6901_v47  ;;  %1745 = vmatpush1.bf16.msra.mxu1 %v6902_v48  ;;  %v6987_v47 = vld [vmem:[#allocation71_spill] sm:$0xff]  ;;  %v6988_v48 = vld [vmem:[#allocation72_spill] sm:$0xff] }
 0x39b   :  { %1705 = vmatprep.subr.bf16.mxu0 %v6903_v49  ;;  %1746 = vmatprep.subr.bf16.mxu1 %v6904_v50  ;;  %v6989_v49 = vld [vmem:[#allocation73_spill] sm:$0xff]  ;;  %v6990_v50 = vld [vmem:[#allocation74_spill] sm:$0xff] }
 0x39e   :  { %1706 = vmatpush1.bf16.msra.mxu0 %v6905_v52  ;;  %1747 = vmatpush1.bf16.msra.mxu1 %v6906_v53  ;;  %v6991_v52 = vld [vmem:[#allocation75_spill] sm:$0xff]  ;;  %v6992_v53 = vld [vmem:[#allocation76_spill] sm:$0xff] }
 0x39f   :  { %1707 = vmatprep.subr.bf16.mxu0 %v6907_v54  ;;  %1748 = vmatprep.subr.bf16.mxu1 %v6908_v55  ;;  %v6993_v54 = vld [vmem:[#allocation77_spill] sm:$0xff]  ;;  %v6994_v55 = vld [vmem:[#allocation78_spill] sm:$0xff] }
 0x3a2   :  { %1708 = vmatpush1.bf16.msra.mxu0 %v6909_v18  ;;  %1749 = vmatpush1.bf16.msra.mxu1 %v6962_v57  ;;  %v6995_v18 = vld [vmem:[#allocation79_spill] sm:$0xff]  ;;  %v7002_v57 = vld [vmem:[#allocation86_spill] sm:$0xff] }
 0x3a3   :  { %1709 = vmatprep.subr.bf16.mxu0 %v6963_v58  ;;  %1750 = vmatprep.subr.bf16.mxu1 %v6964_v59  ;;  %v5229_v58 = vld [vmem:[%s6547_s1 + $0x104] ss:$16 sps:$4 sm:$0xff]   ;;  %v5235_v59 = vld [vmem:[%s6547_s1 + $0x10c] ss:$16 sps:$4 sm:$0xff]  }
 0x3a4   :  { %7003 = vst [vmem:[#allocation9_spill] sm:$0xff] %v5229_v58  ;;  %7004 = vst [vmem:[#allocation10_spill] sm:$0xff] %v5235_v59 }
 0x3a6   :  { %1710 = vmatpush1.bf16.msra.mxu0 %v6965_v61  ;;  %1751 = vmatpush1.bf16.msra.mxu1 %v6966_v62  ;;  %v7005_v61 = vld [vmem:[#allocation4_spill] sm:$0xff]  ;;  %v7006_v62 = vld [vmem:[#allocation35_spill] sm:$0xff] }
 0x3a7   :  { %1711 = vmatprep.subr.bf16.mxu0 %v6967_v63  ;;  %1752 = vmatprep.subr.bf16.mxu1 %v6968_v0  ;;  %v446_v63 = vadd.f32 %v7006_v62, %v7005_v61  ;;  %v7007_v0 = vld [vmem:[#allocation6_spill] sm:$0xff] }
 0x3aa   :  { %1712 = vmatpush1.bf16.msra.mxu0 %v6969_v2  ;;  %1753 = vmatpush1.bf16.msra.mxu1 %v6970_v3  ;;  %v7008_v2 = vld [vmem:[#allocation36_spill] sm:$0xff] }
 0x3ab   :  { %1799 = vmatprep.subr.bf16.mxu0 %v6971_v4  ;;  %1840 = vmatprep.subr.bf16.mxu1 %v6972_v5  ;;  %v519_v3 = vadd.f32 %v7008_v2, %v7007_v0  ;;  %v7009_v4 = vld [vmem:[#allocation5_spill] sm:$0xff] }
 0x3ac   :  { %v7010_v5 = vld [vmem:[#allocation37_spill] sm:$0xff] }
 0x3ad   :  { %1730 = vmatmul.mubr.bf16.vlgmr.msra.gmra.mrb[32].mxu0 %v1614_v56  ;;  %1771 = vmatmul.mubr.bf16.vlgmr.msra.gmra.mrb[32].mxu1 %v1614_v56  ;;  %v7001_v56 = vld [vmem:[#allocation85_spill] sm:$0xff] }
 0x3ae   :  { %1800 = vmatpush1.bf16.msra.mxu0 %v6973_v6  ;;  %1841 = vmatpush1.bf16.msra.mxu1 %v6974_v7  ;;  %v448_v6 = vadd.f32 %v7010_v5, %v7009_v4  ;;  %v7011_v7 = vld [vmem:[#allocation7_spill] sm:$0xff] }
 0x3af   :  { %1801 = vmatprep.subr.bf16.mxu0 %v6975_v26  ;;  %1842 = vmatprep.subr.bf16.mxu1 %v6976_v30  ;;  %v7012_v26 = vld [vmem:[#allocation38_spill] sm:$0xff] }
 0x3b0   :  { %1831 = vmatprep.mubr.bf16.mxu0 %v6835_v11  ;;  %1872 = vmatprep.mubr.bf16.mxu1 %v6835_v11  ;;  %v521_v30 = vadd.f32 %v7012_v26, %v7011_v7 }
 0x3b2   :  { %1802 = vmatpush1.bf16.msra.mxu0 %v6977_v32  ;;  %1843 = vmatpush1.bf16.msra.mxu1 %v6978_v33 }
 0x3b3   :  { %1803 = vmatprep.subr.bf16.mxu0 %v6979_v25  ;;  %1844 = vmatprep.subr.bf16.mxu1 %v6980_v42 }
 0x3b6   :  { %1804 = vmatpush1.bf16.msra.mxu0 %v6981_v51  ;;  %1845 = vmatpush1.bf16.msra.mxu1 %v6982_v41 }
 0x3b7   :  { %1805 = vmatprep.subr.bf16.mxu0 %v6983_v43  ;;  %1846 = vmatprep.subr.bf16.mxu1 %v6984_v44 }
 0x3ba   :  { %1806 = vmatpush1.bf16.msra.mxu0 %v6985_v45  ;;  %1847 = vmatpush1.bf16.msra.mxu1 %v6986_v46 }
 0x3bb   :  { %1807 = vmatprep.subr.bf16.mxu0 %v6987_v47  ;;  %1848 = vmatprep.subr.bf16.mxu1 %v6988_v48 }
 0x3be   :  { %1808 = vmatpush1.bf16.msra.mxu0 %v6989_v49  ;;  %1849 = vmatpush1.bf16.msra.mxu1 %v6990_v50 }
 0x3bf   :  { %1809 = vmatprep.subr.bf16.mxu0 %v6991_v52  ;;  %1850 = vmatprep.subr.bf16.mxu1 %v6992_v53 }
 0x3c2   :  { %1810 = vmatpush1.bf16.msra.mxu0 %v6993_v54  ;;  %1851 = vmatpush1.bf16.msra.mxu1 %v6994_v55 }
 0x3c3   :  { %1811 = vmatprep.subr.bf16.mxu0 %v6995_v18  ;;  %1852 = vmatprep.subr.bf16.mxu1 %v6996_v34 }
 0x3c6   :  { %1812 = vmatpush1.bf16.msra.mxu0 %v6997_v36  ;;  %1853 = vmatpush1.bf16.msra.mxu1 %v6998_v13 }
 0x3c7   :  { %1813 = vmatprep.subr.bf16.mxu0 %v6999_v35  ;;  %1854 = vmatprep.subr.bf16.mxu1 %v7000_v37 }
 0x3ca   :  { %1814 = vmatpush1.bf16.msra.mxu0 %v7001_v56  ;;  %1855 = vmatpush1.bf16.msra.mxu1 %v7002_v57 }
 0x3cb   :  { %1901 = vmatprep.subr.bf16.mxu0 %v5229_v58  ;;  %1942 = vmatprep.subr.bf16.mxu1 %v5235_v59 }
 0x460   :  { %v1649_v32 = vpop.f32.mrb[36].mxu0  ;;  %v1690_v33 = vpop.f32.mrb[36].mxu1 }
 0x461   :  { %v1881_v25 = vadd.f32 %v1649_v32, %v446_v63  ;;  %v1883_v42 = vadd.f32 %v1690_v33, %v519_v3  ;;  %v1651_v51 = vpop.f32.mrb[37].mxu0  ;;  %v1692_v41 = vpop.f32.mrb[37].mxu1 }
 0x462   :  { %v1882_v43 = vadd.f32 %v1651_v51, %v448_v6  ;;  %v1884_v44 = vadd.f32 %v1692_v41, %v521_v30  ;;  %v1653_v45 = vpop.f32.mrb[38].mxu0  ;;  %v1694_v46 = vpop.f32.mrb[38].mxu1 }
 0x463   :  { %3751 = vtanh.f32 %v1881_v25  ;;  %v1654_v47 = vpop.f32.mrb[39].mxu0  ;;  %v1695_v48 = vpop.f32.mrb[39].mxu1 }
 0x464   :  { %3753 = vtanh.f32 %v1882_v43 }
 0x465   :  { %3755 = vtanh.f32 %v1883_v42 }
 0x46d   :  { %v3752_v49 = vpop.eup %3751 }
 0x46e   :  { %v1889_v50 = vmul.f32 0.5, %v3752_v49  ;;  %v3754_v52 = vpop.eup %3753 }
 0x46f   :  { %v1891_v54 = vmul.f32 0.5, %v3754_v52  ;;  %v3756_v55 = vpop.eup %3755 }
 0x470   :  { %v1890_v53 = vadd.f32 0.5, %v1889_v50 }
 0x471   :  { %v1892_v18 = vadd.f32 0.5, %v1891_v54  ;;  %v5281_v54 = vld [vmem:[%s6547_s1 + $0x1a4] ss:$16 sps:$4 sm:$0xff]  }
 0x472   :  { %v1896_v34 = vmul.f32 %v3756_v55, %v1890_v53  ;;  %v5287_v55 = vld [vmem:[%s6547_s1 + $0x1ac] ss:$16 sps:$4 sm:$0xff]  }
 0x473   :  { %v1895_v36 = vmul.f32 %v1892_v18, %v5024_v15 }
 0x475   :  { %v5247_v13 = vadd.f32 %v1896_v34, %v1895_v36  ;;  %v5293_v34 = vld [vmem:[%s6547_s1 + $0x1a0] ss:$16 sps:$4 sm:$0xff]   ;;  %v5299_v36 = vld [vmem:[%s6547_s1 + $0x1a8] ss:$16 sps:$4 sm:$0xff]  }
 0x480   :  { %v1731_v35 = vpop.f32.mrb[32].mxu0  ;;  %v1772_v37 = vpop.f32.mrb[32].mxu1 }
 0x481   :  { %v1732_v56 = vadd.f32 %v1731_v35, %v4888_v10  ;;  %v1733_v57 = vpop.f32.mrb[33].mxu0  ;;  %v1774_v62 = vpop.f32.mrb[33].mxu1  ;;  %v1773_v5 = vadd.f32 %v1772_v37, %v4896_v16  ;;  %v5305_v35 = vld [vmem:[%s6547_s1 + $0x1c4] ss:$16 sps:$4 sm:$0xff]   ;;  %v5311_v37 = vld [vmem:[%s6547_s1 + $0x1cc] ss:$16 sps:$4 sm:$0xff]  }
 0x482   :  { %v1734_v63 = vadd.f32 %v1733_v57, %v4892_v14  ;;  %v1735_v2 = vpop.f32.mrb[34].mxu0  ;;  %v1776_v3 = vpop.f32.mrb[34].mxu1  ;;  %v1775_v15 = vadd.f32 %v1774_v62, %v4903_v12  ;;  %v5317_v62 = vld [vmem:[%s6547_s1 + $0x1c0] ss:$16 sps:$4 sm:$0xff]  }
 0x483   :  { %3757 = vtanh.f32 %v1732_v56  ;;  %v1736_v6 = vpop.f32.mrb[35].mxu0  ;;  %v1777_v26 = vpop.f32.mrb[35].mxu1  ;;  %v5329_v3 = vld [vmem:[%s6547_s1 + $0x1e4] ss:$16 sps:$4 sm:$0xff]  }
 0x484   :  { %3759 = vtanh.f32 %v1734_v63  ;;  %v5323_v63 = vld [vmem:[%s6547_s1 + $0x1c8] ss:$16 sps:$4 sm:$0xff]   ;;  %v5341_v6 = vld [vmem:[%s6547_s1 + $0x1e0] ss:$16 sps:$4 sm:$0xff]  }
 0x485   :  { %3761 = vtanh.f32 %v1773_v5  ;;  %v5335_v5 = vld [vmem:[%s6547_s1 + $0x1ec] ss:$16 sps:$4 sm:$0xff]   ;;  %v5347_v26 = vld [vmem:[%s6547_s1 + $0x1e8] ss:$16 sps:$4 sm:$0xff]  }
 0x486   :  { %3763 = vtanh.f32 %v1775_v15 }
 0x48d   :  { %v3758_v30 = vpop.eup %3757 }
 0x48e   :  { %v1787_v32 = vmul.f32 0.5, %v3758_v30  ;;  %v3760_v33 = vpop.eup %3759  ;;  %v5355_v30 = vld [vmem:[%s6547_s1 + $0x204] ss:$16 sps:$4 sm:$0xff]  }
 0x48f   :  { %v1789_v42 = vmul.f32 0.5, %v3760_v33  ;;  %v3762_v51 = vpop.eup %3761  ;;  %v5369_v33 = vld [vmem:[%s6547_s1 + $0x200] ss:$16 sps:$4 sm:$0xff]  }
 0x490   :  { %v1788_v25 = vadd.f32 0.5, %v1787_v32  ;;  %v3764_v47 = vpop.eup %3763  ;;  %v5361_v32 = vld [vmem:[%s6547_s1 + $0x20c] ss:$16 sps:$4 sm:$0xff]  }
 0x491   :  { %v1790_v41 = vadd.f32 0.5, %v1789_v42  ;;  %v1791_v48 = vmul.f32 0.5, %v3764_v47  ;;  %v5381_v42 = vld [vmem:[%s6547_s1 + $0x224] ss:$16 sps:$4 sm:$0xff]   ;;  %v5413_v47 = vld [vmem:[%s6547_s1 + $0x24c] ss:$16 sps:$4 sm:$0xff]  }
 0x492   :  { %v1794_v43 = vmul.f32 %v3762_v51, %v1788_v25  ;;  %v5375_v25 = vld [vmem:[%s6547_s1 + $0x208] ss:$16 sps:$4 sm:$0xff]   ;;  %7014 = vst [vmem:[#allocation11_spill] sm:$0xff] %v5381_v42  ;;  %v5387_v51 = vld [vmem:[%s6547_s1 + $0x22c] ss:$16 sps:$4 sm:$0xff]   ;;  %7019 = vst [vmem:[#allocation16_spill] sm:$0xff] %v5413_v47 }
 0x493   :  { %v1793_v45 = vmul.f32 %v1790_v41, %v5031_v60  ;;  %v1792_v49 = vadd.f32 0.5, %v1791_v48  ;;  %7015 = vst [vmem:[#allocation12_spill] sm:$0xff] %v5387_v51  ;;  %v5395_v41 = vld [vmem:[%s6547_s1 + $0x220] ss:$16 sps:$4 sm:$0xff]  }
 0x494   :  { %7016 = vst [vmem:[#allocation13_spill] sm:$0xff] %v5395_v41  ;;  %v5419_v48 = vld [vmem:[%s6547_s1 + $0x240] ss:$16 sps:$4 sm:$0xff]  }
 0x495   :  { %v5254_v46 = vadd.f32 %v1794_v43, %v1793_v45  ;;  %v5401_v43 = vld [vmem:[%s6547_s1 + $0x228] ss:$16 sps:$4 sm:$0xff]   ;;  %v5407_v45 = vld [vmem:[%s6547_s1 + $0x244] ss:$16 sps:$4 sm:$0xff]   ;;  %7020 = vst [vmem:[#allocation17_spill] sm:$0xff] %v5419_v48 }
 0x496   :  { %7017 = vst [vmem:[#allocation14_spill] sm:$0xff] %v5401_v43  ;;  %7018 = vst [vmem:[#allocation15_spill] sm:$0xff] %v5407_v45 }
 0x497   :  { %3765 = vtanh.f32 %v5254_v46 }
 0x498   :  { %3767 = vtanh.f32 %v1884_v44  ;;  %v7013_v44 = vld [vmem:[#allocation8_spill] sm:$0xff] }
 0x499   :  { %3769 = vtanh.f32 %v5247_v13 }
 0x4a1   :  { %v3766_v50 = vpop.eup %3765 }
 0x4a2   :  { %v1797_v52 = vmul.f32 %v3766_v50, %v1792_v49  ;;  %v3768_v60 = vpop.eup %3767  ;;  %v5425_v49 = vld [vmem:[%s6547_s1 + $0x248] ss:$16 sps:$4 sm:$0xff]   ;;  %v5431_v50 = vld [vmem:[%s6547_s1 + $0x264] ss:$16 sps:$4 sm:$0xff]  }
 0x4a3   :  { %v1893_v18 = vmul.f32 0.5, %v3768_v60  ;;  %v3770_v56 = vpop.eup %3769  ;;  %7021 = vst [vmem:[#allocation18_spill] sm:$0xff] %v5425_v49  ;;  %7022 = vst [vmem:[#allocation19_spill] sm:$0xff] %v5431_v50  ;;  %v5449_v60 = vld [vmem:[%s6547_s1 + $0x268] ss:$16 sps:$4 sm:$0xff]  }
 0x4a4   :  { %v1798_v53 = vpack.c.bf16 %v1797_v52, %v1797_v52  ;;  %v5437_v52 = vld [vmem:[%s6547_s1 + $0x26c] ss:$16 sps:$4 sm:$0xff]   ;;  %7025 = vst [vmem:[#allocation2_spill] sm:$0xff] %v5449_v60 }
 0x4a5   :  { %v1894_v57 = vadd.f32 0.5, %v1893_v18  ;;  %7023 = vst [vmem:[#allocation20_spill] sm:$0xff] %v5437_v52  ;;  %v5455_v18 = vld [vmem:[%s6547_s1 + $0x284] ss:$16 sps:$4 sm:$0xff]  }
 0x4a6   :  { %1832 = vmatmul.mubr.bf16.vlgmr.msra.gmra.mrb[40].mxu0 %v1798_v53  ;;  %1873 = vmatmul.mubr.bf16.vlgmr.msra.gmra.mrb[40].mxu1 %v1798_v53  ;;  %v5443_v53 = vld [vmem:[%s6547_s1 + $0x260] ss:$16 sps:$4 sm:$0xff]   ;;  %7026 = vst [vmem:[#allocation3_spill] sm:$0xff] %v5455_v18 }
 0x4a7   :  { %1902 = vmatpush1.bf16.msra.mxu0 %v5037_v40  ;;  %1943 = vmatpush1.bf16.msra.mxu1 %v5043_v24  ;;  %v1899_v2 = vmul.f32 %v3770_v56, %v1894_v57  ;;  %7024 = vst [vmem:[#allocation21_spill] sm:$0xff] %v5443_v53  ;;  %v5461_v56 = vld [vmem:[%s6547_s1 + $0x28c] ss:$16 sps:$4 sm:$0xff]   ;;  %v5467_v57 = vld [vmem:[%s6547_s1 + $0x280] ss:$16 sps:$4 sm:$0xff]  }
 0x4a8   :  { %1903 = vmatprep.subr.bf16.mxu0 %v5049_v21  ;;  %1944 = vmatprep.subr.bf16.mxu1 %v5055_v28  ;;  %7027 = vst [vmem:[#allocation31_spill] sm:$0xff] %v5461_v56  ;;  %7028 = vst [vmem:[#allocation32_spill] sm:$0xff] %v5467_v57 }
 0x4a9   :  { %1933 = vmatprep.mubr.bf16.mxu0 %v6835_v11  ;;  %1974 = vmatprep.mubr.bf16.mxu1 %v6835_v11  ;;  %v5350_v15 = vpack.c.bf16 %v1899_v2, %v1899_v2  ;;  %v5473_v2 = vld [vmem:[%s6547_s1 + $0x288] ss:$16 sps:$4 sm:$0xff]  }
 0x4aa   :  { %7029 = vst [vmem:[#allocation33_spill] sm:$0xff] %v5473_v2 }
 0x4ab   :  { %1904 = vmatpush1.bf16.msra.mxu0 %v5063_v20  ;;  %1945 = vmatpush1.bf16.msra.mxu1 %v5069_v17 }
 0x4ac   :  { %1905 = vmatprep.subr.bf16.mxu0 %v5075_v23  ;;  %1946 = vmatprep.subr.bf16.mxu1 %v5081_v38 }
 0x4af   :  { %1906 = vmatpush1.bf16.msra.mxu0 %v5088_v27  ;;  %1947 = vmatpush1.bf16.msra.mxu1 %v5094_v19 }
 0x4b0   :  { %1907 = vmatprep.subr.bf16.mxu0 %v5100_v9  ;;  %1948 = vmatprep.subr.bf16.mxu1 %v5106_v39 }
 0x4b3   :  { %1908 = vmatpush1.bf16.msra.mxu0 %v5113_v31  ;;  %1949 = vmatpush1.bf16.msra.mxu1 %v5119_v8 }
 0x4b4   :  { %1909 = vmatprep.subr.bf16.mxu0 %v5125_v22  ;;  %1950 = vmatprep.subr.bf16.mxu1 %v5131_v1 }
 0x4b7   :  { %1910 = vmatpush1.bf16.msra.mxu0 %v5137_v29  ;;  %1951 = vmatpush1.bf16.msra.mxu1 %v7013_v44 }
 0x4b8   :  { %1911 = vmatprep.subr.bf16.mxu0 %v5281_v54  ;;  %1952 = vmatprep.subr.bf16.mxu1 %v5287_v55 }
 0x4bb   :  { %1912 = vmatpush1.bf16.msra.mxu0 %v5293_v34  ;;  %1953 = vmatpush1.bf16.msra.mxu1 %v5299_v36 }
 0x4bc   :  { %1913 = vmatprep.subr.bf16.mxu0 %v5305_v35  ;;  %1954 = vmatprep.subr.bf16.mxu1 %v5311_v37 }
 0x4bf   :  { %1914 = vmatpush1.bf16.msra.mxu0 %v5317_v62  ;;  %1955 = vmatpush1.bf16.msra.mxu1 %v5323_v63 }
 0x4c0   :  { %1915 = vmatprep.subr.bf16.mxu0 %v5329_v3  ;;  %1956 = vmatprep.subr.bf16.mxu1 %v5335_v5 }
 0x4c3   :  { %1916 = vmatpush1.bf16.msra.mxu0 %v5341_v6  ;;  %1957 = vmatpush1.bf16.msra.mxu1 %v5347_v26 }
 0x4c4   :  { %1983 = vmatprep.subr.bf16.mxu0 %v5355_v30  ;;  %2024 = vmatprep.subr.bf16.mxu1 %v5361_v32 }
 0x4c6   :  { %1934 = vmatmul.mubr.bf16.vlgmr.msra.gmra.mrb[44].mxu0 %v5350_v15  ;;  %1975 = vmatmul.mubr.bf16.vlgmr.msra.gmra.mrb[44].mxu1 %v5350_v15 }
 0x4c7   :  { %1984 = vmatpush1.bf16.msra.mxu0 %v5369_v33  ;;  %2025 = vmatpush1.bf16.msra.mxu1 %v5375_v25 }
 0x4c8   :  { %1985 = vmatprep.subr.bf16.mxu0 %v5381_v42  ;;  %2026 = vmatprep.subr.bf16.mxu1 %v5387_v51 }
 0x4c9   :  { %2015 = vmatprep.mubr.bf16.mxu0 %v6835_v11  ;;  %2056 = vmatprep.mubr.bf16.mxu1 %v6835_v11 }
 0x4cb   :  { %1986 = vmatpush1.bf16.msra.mxu0 %v5395_v41  ;;  %2027 = vmatpush1.bf16.msra.mxu1 %v5401_v43 }
 0x4cc   :  { %1987 = vmatprep.subr.bf16.mxu0 %v5407_v45  ;;  %2028 = vmatprep.subr.bf16.mxu1 %v5413_v47 }
 0x4cf   :  { %1988 = vmatpush1.bf16.msra.mxu0 %v5419_v48  ;;  %2029 = vmatpush1.bf16.msra.mxu1 %v5425_v49 }
 0x4d0   :  { %1989 = vmatprep.subr.bf16.mxu0 %v5431_v50  ;;  %2030 = vmatprep.subr.bf16.mxu1 %v5437_v52  ;;  %v7077_v52 = vld [vmem:[#allocation42_spill] sm:$0xff] }
 0x4d1   :  { %v527_v50 = vadd.f32 %v7077_v52, %v7011_v7 }
 0x4d3   :  { %1990 = vmatpush1.bf16.msra.mxu0 %v5443_v53  ;;  %2031 = vmatpush1.bf16.msra.mxu1 %v5449_v60  ;;  %v7076_v53 = vld [vmem:[#allocation41_spill] sm:$0xff] }
 0x4d4   :  { %1991 = vmatprep.subr.bf16.mxu0 %v5455_v18  ;;  %2032 = vmatprep.subr.bf16.mxu1 %v5461_v56  ;;  %v5479_v18 = vld [vmem:[%s6547_s1 + $0x2a4] ss:$16 sps:$4 sm:$0xff]   ;;  %v5485_v56 = vld [vmem:[%s6547_s1 + $0x2ac] ss:$16 sps:$4 sm:$0xff]  }
 0x4d5   :  { %7030 = vst [vmem:[#allocation34_spill] sm:$0xff] %v5479_v18  ;;  %7031 = vst [vmem:[#allocation22_spill] sm:$0xff] %v5485_v56 }
 0x4d7   :  { %1992 = vmatpush1.bf16.msra.mxu0 %v5467_v57  ;;  %2033 = vmatpush1.bf16.msra.mxu1 %v5473_v2  ;;  %v5491_v57 = vld [vmem:[%s6547_s1 + $0x2a0] ss:$16 sps:$4 sm:$0xff]   ;;  %v5497_v2 = vld [vmem:[%s6547_s1 + $0x2a8] ss:$16 sps:$4 sm:$0xff]  }
 0x4d8   :  { %1993 = vmatprep.subr.bf16.mxu0 %v5479_v18  ;;  %2034 = vmatprep.subr.bf16.mxu1 %v5485_v56  ;;  %7032 = vst [vmem:[#allocation23_spill] sm:$0xff] %v5491_v57  ;;  %7033 = vst [vmem:[#allocation24_spill] sm:$0xff] %v5497_v2  ;;  %v5503_v18 = vld [vmem:[%s6547_s1 + $0x2c4] ss:$16 sps:$4 sm:$0xff]   ;;  %v5509_v56 = vld [vmem:[%s6547_s1 + $0x2cc] ss:$16 sps:$4 sm:$0xff]  }
 0x4d9   :  { %7034 = vst [vmem:[#allocation25_spill] sm:$0xff] %v5503_v18  ;;  %7035 = vst [vmem:[#allocation26_spill] sm:$0xff] %v5509_v56 }
 0x4db   :  { %1994 = vmatpush1.bf16.msra.mxu0 %v5491_v57  ;;  %2035 = vmatpush1.bf16.msra.mxu1 %v5497_v2  ;;  %v5515_v57 = vld [vmem:[%s6547_s1 + $0x2c0] ss:$16 sps:$4 sm:$0xff]   ;;  %v5521_v2 = vld [vmem:[%s6547_s1 + $0x2c8] ss:$16 sps:$4 sm:$0xff]  }
 0x4dc   :  { %1995 = vmatprep.subr.bf16.mxu0 %v5503_v18  ;;  %2036 = vmatprep.subr.bf16.mxu1 %v5509_v56  ;;  %7036 = vst [vmem:[#allocation27_spill] sm:$0xff] %v5515_v57  ;;  %7037 = vst [vmem:[#allocation28_spill] sm:$0xff] %v5521_v2  ;;  %v5527_v18 = vld [vmem:[%s6547_s1 + $0x2e4] ss:$16 sps:$4 sm:$0xff]   ;;  %v5533_v56 = vld [vmem:[%s6547_s1 + $0x2ec] ss:$16 sps:$4 sm:$0xff]  }
 0x4dd   :  { %7038 = vst [vmem:[#allocation29_spill] sm:$0xff] %v5527_v18  ;;  %7039 = vst [vmem:[#allocation30_spill] sm:$0xff] %v5533_v56 }
 0x4df   :  { %1996 = vmatpush1.bf16.msra.mxu0 %v5515_v57  ;;  %2037 = vmatpush1.bf16.msra.mxu1 %v5521_v2  ;;  %v5539_v57 = vld [vmem:[%s6547_s1 + $0x2e0] ss:$16 sps:$4 sm:$0xff]   ;;  %v5545_v2 = vld [vmem:[%s6547_s1 + $0x2e8] ss:$16 sps:$4 sm:$0xff]  }
 0x4e0   :  { %1997 = vmatprep.subr.bf16.mxu0 %v5527_v18  ;;  %2038 = vmatprep.subr.bf16.mxu1 %v5533_v56  ;;  %7040 = vst [vmem:[#allocation55_spill] sm:$0xff] %v5539_v57  ;;  %7041 = vst [vmem:[#allocation56_spill] sm:$0xff] %v5545_v2  ;;  %v5551_v18 = vld [vmem:[%s6547_s1 + $0x304] ss:$16 sps:$4 sm:$0xff]   ;;  %v5557_v56 = vld [vmem:[%s6547_s1 + $0x30c] ss:$16 sps:$4 sm:$0xff]  }
 0x4e1   :  { %7042 = vst [vmem:[#allocation57_spill] sm:$0xff] %v5551_v18  ;;  %7043 = vst [vmem:[#allocation58_spill] sm:$0xff] %v5557_v56 }
 0x4e3   :  { %1998 = vmatpush1.bf16.msra.mxu0 %v5539_v57  ;;  %2039 = vmatpush1.bf16.msra.mxu1 %v5545_v2  ;;  %v5565_v2 = vld [vmem:[%s6547_s1 + $0x300] ss:$16 sps:$4 sm:$0xff]  }
 0x4e4   :  { %2085 = vmatprep.subr.bf16.mxu0 %v5551_v18  ;;  %2126 = vmatprep.subr.bf16.mxu1 %v5557_v56  ;;  %7044 = vst [vmem:[#allocation59_spill] sm:$0xff] %v5565_v2  ;;  %v5571_v18 = vld [vmem:[%s6547_s1 + $0x308] ss:$16 sps:$4 sm:$0xff]   ;;  %v5577_v56 = vld [vmem:[%s6547_s1 + $0x324] ss:$16 sps:$4 sm:$0xff]  }
 0x4e5   :  { %7045 = vst [vmem:[#allocation60_spill] sm:$0xff] %v5571_v18  ;;  %7046 = vst [vmem:[#allocation61_spill] sm:$0xff] %v5577_v56  ;;  %v7075_v57 = vld [vmem:[#allocation40_spill] sm:$0xff] }
 0x4e6   :  { %2016 = vmatmul.mubr.bf16.vlgmr.msra.gmra.mrb[40].mxu0 %v5350_v15  ;;  %2057 = vmatmul.mubr.bf16.vlgmr.msra.gmra.mrb[40].mxu1 %v5350_v15  ;;  %v5583_v15 = vld [vmem:[%s6547_s1 + $0x32c] ss:$16 sps:$4 sm:$0xff]   ;;  %v525_v60 = vadd.f32 %v7075_v57, %v7007_v0 }
 0x4e7   :  { %2086 = vmatpush1.bf16.msra.mxu0 %v5565_v2  ;;  %2127 = vmatpush1.bf16.msra.mxu1 %v5571_v18  ;;  %7047 = vst [vmem:[#allocation62_spill] sm:$0xff] %v5583_v15  ;;  %v5591_v18 = vld [vmem:[%s6547_s1 + $0x320] ss:$16 sps:$4 sm:$0xff]   ;;  %v5609_v2 = vld [vmem:[%s6547_s1 + $0x34c] ss:$16 sps:$4 sm:$0xff]  }
 0x4e8   :  { %2087 = vmatprep.subr.bf16.mxu0 %v5577_v56  ;;  %2128 = vmatprep.subr.bf16.mxu1 %v5583_v15  ;;  %7048 = vst [vmem:[#allocation63_spill] sm:$0xff] %v5591_v18  ;;  %v5597_v56 = vld [vmem:[%s6547_s1 + $0x328] ss:$16 sps:$4 sm:$0xff]   ;;  %v5603_v15 = vld [vmem:[%s6547_s1 + $0x344] ss:$16 sps:$4 sm:$0xff]   ;;  %7051 = vst [vmem:[#allocation66_spill] sm:$0xff] %v5609_v2 }
 0x4e9   :  { %2117 = vmatprep.mubr.bf16.mxu0 %v6835_v11  ;;  %2158 = vmatprep.mubr.bf16.mxu1 %v6835_v11  ;;  %7049 = vst [vmem:[#allocation64_spill] sm:$0xff] %v5597_v56  ;;  %7050 = vst [vmem:[#allocation65_spill] sm:$0xff] %v5603_v15 }
 0x4eb   :  { %2088 = vmatpush1.bf16.msra.mxu0 %v5591_v18  ;;  %2129 = vmatpush1.bf16.msra.mxu1 %v5597_v56  ;;  %v5615_v18 = vld [vmem:[%s6547_s1 + $0x340] ss:$16 sps:$4 sm:$0xff]   ;;  %v5621_v56 = vld [vmem:[%s6547_s1 + $0x348] ss:$16 sps:$4 sm:$0xff]  }
 0x4ec   :  { %2089 = vmatprep.subr.bf16.mxu0 %v5603_v15  ;;  %2130 = vmatprep.subr.bf16.mxu1 %v5609_v2  ;;  %7052 = vst [vmem:[#allocation67_spill] sm:$0xff] %v5615_v18  ;;  %7053 = vst [vmem:[#allocation68_spill] sm:$0xff] %v5621_v56  ;;  %v5627_v15 = vld [vmem:[%s6547_s1 + $0x364] ss:$16 sps:$4 sm:$0xff]   ;;  %v5633_v2 = vld [vmem:[%s6547_s1 + $0x36c] ss:$16 sps:$4 sm:$0xff]  }
 0x4ed   :  { %7054 = vst [vmem:[#allocation69_spill] sm:$0xff] %v5627_v15  ;;  %7055 = vst [vmem:[#allocation70_spill] sm:$0xff] %v5633_v2 }
 0x4ef   :  { %2090 = vmatpush1.bf16.msra.mxu0 %v5615_v18  ;;  %2131 = vmatpush1.bf16.msra.mxu1 %v5621_v56  ;;  %v5639_v18 = vld [vmem:[%s6547_s1 + $0x360] ss:$16 sps:$4 sm:$0xff]   ;;  %v5645_v56 = vld [vmem:[%s6547_s1 + $0x368] ss:$16 sps:$4 sm:$0xff]  }
 0x4f0   :  { %2091 = vmatprep.subr.bf16.mxu0 %v5627_v15  ;;  %2132 = vmatprep.subr.bf16.mxu1 %v5633_v2  ;;  %7056 = vst [vmem:[#allocation71_spill] sm:$0xff] %v5639_v18  ;;  %7057 = vst [vmem:[#allocation72_spill] sm:$0xff] %v5645_v56  ;;  %v5651_v15 = vld [vmem:[%s6547_s1 + $0x384] ss:$16 sps:$4 sm:$0xff]   ;;  %v5657_v2 = vld [vmem:[%s6547_s1 + $0x38c] ss:$16 sps:$4 sm:$0xff]  }
 0x4f1   :  { %7058 = vst [vmem:[#allocation73_spill] sm:$0xff] %v5651_v15  ;;  %7059 = vst [vmem:[#allocation74_spill] sm:$0xff] %v5657_v2 }
 0x4f3   :  { %2092 = vmatpush1.bf16.msra.mxu0 %v5639_v18  ;;  %2133 = vmatpush1.bf16.msra.mxu1 %v5645_v56  ;;  %v5663_v18 = vld [vmem:[%s6547_s1 + $0x380] ss:$16 sps:$4 sm:$0xff]   ;;  %v5669_v56 = vld [vmem:[%s6547_s1 + $0x388] ss:$16 sps:$4 sm:$0xff]  }
 0x4f4   :  { %2093 = vmatprep.subr.bf16.mxu0 %v5651_v15  ;;  %2134 = vmatprep.subr.bf16.mxu1 %v5657_v2  ;;  %7060 = vst [vmem:[#allocation75_spill] sm:$0xff] %v5663_v18  ;;  %7061 = vst [vmem:[#allocation76_spill] sm:$0xff] %v5669_v56  ;;  %v5675_v15 = vld [vmem:[%s6547_s1 + $0x3a4] ss:$16 sps:$4 sm:$0xff]   ;;  %v5681_v2 = vld [vmem:[%s6547_s1 + $0x3ac] ss:$16 sps:$4 sm:$0xff]  }
 0x4f5   :  { %7062 = vst [vmem:[#allocation77_spill] sm:$0xff] %v5675_v15  ;;  %7063 = vst [vmem:[#allocation78_spill] sm:$0xff] %v5681_v2 }
 0x4f7   :  { %2094 = vmatpush1.bf16.msra.mxu0 %v5663_v18  ;;  %2135 = vmatpush1.bf16.msra.mxu1 %v5669_v56  ;;  %v5687_v18 = vld [vmem:[%s6547_s1 + $0x3a0] ss:$16 sps:$4 sm:$0xff]   ;;  %v5693_v56 = vld [vmem:[%s6547_s1 + $0x3a8] ss:$16 sps:$4 sm:$0xff]  }
 0x4f8   :  { %2095 = vmatprep.subr.bf16.mxu0 %v5675_v15  ;;  %2136 = vmatprep.subr.bf16.mxu1 %v5681_v2  ;;  %7064 = vst [vmem:[#allocation79_spill] sm:$0xff] %v5687_v18  ;;  %7065 = vst [vmem:[#allocation80_spill] sm:$0xff] %v5693_v56  ;;  %v5699_v15 = vld [vmem:[%s6547_s1 + $0x3c4] ss:$16 sps:$4 sm:$0xff]   ;;  %v5705_v2 = vld [vmem:[%s6547_s1 + $0x3cc] ss:$16 sps:$4 sm:$0xff]  }
 0x4f9   :  { %7066 = vst [vmem:[#allocation81_spill] sm:$0xff] %v5699_v15  ;;  %7067 = vst [vmem:[#allocation82_spill] sm:$0xff] %v5705_v2 }
 0x4fb   :  { %2096 = vmatpush1.bf16.msra.mxu0 %v5687_v18  ;;  %2137 = vmatpush1.bf16.msra.mxu1 %v5693_v56  ;;  %v5711_v18 = vld [vmem:[%s6547_s1 + $0x3c0] ss:$16 sps:$4 sm:$0xff]   ;;  %v5717_v56 = vld [vmem:[%s6547_s1 + $0x3c8] ss:$16 sps:$4 sm:$0xff]  }
 0x4fc   :  { %2097 = vmatprep.subr.bf16.mxu0 %v5699_v15  ;;  %2138 = vmatprep.subr.bf16.mxu1 %v5705_v2  ;;  %7068 = vst [vmem:[#allocation83_spill] sm:$0xff] %v5711_v18  ;;  %7069 = vst [vmem:[#allocation84_spill] sm:$0xff] %v5717_v56  ;;  %v5723_v15 = vld [vmem:[%s6547_s1 + $0x3e4] ss:$16 sps:$4 sm:$0xff]   ;;  %v5729_v2 = vld [vmem:[%s6547_s1 + $0x3ec] ss:$16 sps:$4 sm:$0xff]  }
 0x4fd   :  { %7070 = vst [vmem:[#allocation85_spill] sm:$0xff] %v5723_v15  ;;  %7071 = vst [vmem:[#allocation86_spill] sm:$0xff] %v5729_v2 }
 0x4ff   :  { %2098 = vmatpush1.bf16.msra.mxu0 %v5711_v18  ;;  %2139 = vmatpush1.bf16.msra.mxu1 %v5717_v56  ;;  %v5735_v18 = vld [vmem:[%s6547_s1 + $0x3e0] ss:$16 sps:$4 sm:$0xff]   ;;  %v5741_v56 = vld [vmem:[%s6547_s1 + $0x3e8] ss:$16 sps:$4 sm:$0xff]  }
 0x500   :  { %2099 = vmatprep.subr.bf16.mxu0 %v5723_v15  ;;  %2140 = vmatprep.subr.bf16.mxu1 %v5729_v2  ;;  %7072 = vst [vmem:[#allocation35_spill] sm:$0xff] %v5735_v18  ;;  %7073 = vst [vmem:[#allocation36_spill] sm:$0xff] %v5741_v56  ;;  %v7074_v2 = vld [vmem:[#allocation39_spill] sm:$0xff] }
 0x501   :  { %v452_v15 = vadd.f32 %v7074_v2, %v7005_v61 }
 0x503   :  { %2100 = vmatpush1.bf16.msra.mxu0 %v5735_v18  ;;  %2141 = vmatpush1.bf16.msra.mxu1 %v5741_v56  ;;  %v454_v18 = vadd.f32 %v7076_v53, %v7009_v4 }
 0x504   :  { %2187 = vmatprep.subr.bf16.mxu0 %v5229_v58  ;;  %2228 = vmatprep.subr.bf16.mxu1 %v5235_v59 }
 0x599   :  { %v1935_v49 = vpop.f32.mrb[44].mxu0  ;;  %v1976_v48 = vpop.f32.mrb[44].mxu1 }
 0x59a   :  { %v2167_v47 = vadd.f32 %v1935_v49, %v452_v15  ;;  %v2169_v56 = vadd.f32 %v1976_v48, %v525_v60  ;;  %v1937_v45 = vpop.f32.mrb[45].mxu0  ;;  %v1978_v58 = vpop.f32.mrb[45].mxu1 }
 0x59b   :  { %v2168_v43 = vadd.f32 %v1937_v45, %v454_v18  ;;  %v2170_v59 = vadd.f32 %v1978_v58, %v527_v50  ;;  %v1939_v41 = vpop.f32.mrb[46].mxu0  ;;  %v1980_v51 = vpop.f32.mrb[46].mxu1 }
 0x59c   :  { %3771 = vtanh.f32 %v2167_v47  ;;  %v1940_v2 = vpop.f32.mrb[47].mxu0  ;;  %v1981_v61 = vpop.f32.mrb[47].mxu1 }
 0x59d   :  { %3773 = vtanh.f32 %v2168_v43 }
 0x59e   :  { %3775 = vtanh.f32 %v2169_v56 }
 0x5a6   :  { %v3772_v57 = vpop.eup %3771 }
 0x5a7   :  { %v2175_v53 = vmul.f32 0.5, %v3772_v57  ;;  %v3774_v4 = vpop.eup %3773 }
 0x5a8   :  { %v2177_v52 = vmul.f32 0.5, %v3774_v4  ;;  %v3776_v7 = vpop.eup %3775 }
 0x5a9   :  { %v2176_v0 = vadd.f32 0.5, %v2175_v53 }
 0x5aa   :  { %v2178_v42 = vadd.f32 0.5, %v2177_v52 }
 0x5ab   :  { %v2182_v49 = vmul.f32 %v3776_v7, %v2176_v0 }
 0x5ac   :  { %v2181_v48 = vmul.f32 %v2178_v42, %v5247_v13 }
 0x5ae   :  { %v5755_v60 = vadd.f32 %v2182_v49, %v2181_v48 }
 0x5b9   :  { %v2017_v58 = vpop.f32.mrb[40].mxu0  ;;  %v2058_v41 = vpop.f32.mrb[40].mxu1 }
 0x5ba   :  { %v2018_v51 = vadd.f32 %v2017_v58, %v4888_v10  ;;  %v2019_v45 = vpop.f32.mrb[41].mxu0  ;;  %v2060_v61 = vpop.f32.mrb[41].mxu1  ;;  %v2059_v4 = vadd.f32 %v2058_v41, %v4896_v16 }
 0x5bb   :  { %v2020_v43 = vadd.f32 %v2019_v45, %v4892_v14  ;;  %v2021_v47 = vpop.f32.mrb[42].mxu0  ;;  %v2062_v50 = vpop.f32.mrb[42].mxu1  ;;  %v2061_v0 = vadd.f32 %v2060_v61, %v4903_v12 }
 0x5bc   :  { %3777 = vtanh.f32 %v2018_v51  ;;  %v2022_v18 = vpop.f32.mrb[43].mxu0  ;;  %v2063_v56 = vpop.f32.mrb[43].mxu1  ;;  %v7092_v47 = vld [vmem:[#allocation32_spill] sm:$0xff]  ;;  %v7093_v50 = vld [vmem:[#allocation33_spill] sm:$0xff] }
 0x5bd   :  { %3779 = vtanh.f32 %v2020_v43  ;;  %v7095_v18 = vld [vmem:[#allocation22_spill] sm:$0xff]  ;;  %v7096_v56 = vld [vmem:[#allocation23_spill] sm:$0xff] }
 0x5be   :  { %3781 = vtanh.f32 %v2059_v4  ;;  %v7094_v4 = vld [vmem:[#allocation34_spill] sm:$0xff] }
 0x5bf   :  { %3783 = vtanh.f32 %v2061_v0  ;;  %v7097_v0 = vld [vmem:[#allocation24_spill] sm:$0xff] }
 0x5c6   :  { %v3778_v7 = vpop.eup %3777 }
 0x5c7   :  { %v2073_v13 = vmul.f32 0.5, %v3778_v7  ;;  %v3780_v42 = vpop.eup %3779  ;;  %v7098_v7 = vld [vmem:[#allocation25_spill] sm:$0xff] }
 0x5c8   :  { %v2075_v2 = vmul.f32 0.5, %v3780_v42  ;;  %v3782_v57 = vpop.eup %3781  ;;  %v7100_v42 = vld [vmem:[#allocation27_spill] sm:$0xff] }
 0x5c9   :  { %v2074_v15 = vadd.f32 0.5, %v2073_v13  ;;  %v3784_v58 = vpop.eup %3783  ;;  %v7099_v13 = vld [vmem:[#allocation26_spill] sm:$0xff] }
 0x5ca   :  { %v2076_v53 = vadd.f32 0.5, %v2075_v2  ;;  %v2077_v41 = vmul.f32 0.5, %v3784_v58  ;;  %v7102_v2 = vld [vmem:[#allocation29_spill] sm:$0xff]  ;;  %v7107_v58 = vld [vmem:[#allocation58_spill] sm:$0xff] }
 0x5cb   :  { %v2080_v52 = vmul.f32 %v3782_v57, %v2074_v15  ;;  %v7101_v15 = vld [vmem:[#allocation28_spill] sm:$0xff]  ;;  %v7103_v57 = vld [vmem:[#allocation30_spill] sm:$0xff] }
 0x5cc   :  { %v2079_v49 = vmul.f32 %v2076_v53, %v5254_v46  ;;  %v2078_v51 = vadd.f32 0.5, %v2077_v41  ;;  %v7090_v46 = vld [vmem:[#allocation3_spill] sm:$0xff] }
 0x5cd   :  { %v7104_v53 = vld [vmem:[#allocation55_spill] sm:$0xff] }
 0x5ce   :  { %v5762_v48 = vadd.f32 %v2080_v52, %v2079_v49  ;;  %v7105_v52 = vld [vmem:[#allocation56_spill] sm:$0xff]  ;;  %v7106_v49 = vld [vmem:[#allocation57_spill] sm:$0xff]  ;;  %v7108_v41 = vld [vmem:[#allocation59_spill] sm:$0xff] }
 0x5d0   :  { %3785 = vtanh.f32 %v5762_v48 }
 0x5d1   :  { %3787 = vtanh.f32 %v2170_v59  ;;  %v7089_v59 = vld [vmem:[#allocation2_spill] sm:$0xff] }
 0x5d2   :  { %3789 = vtanh.f32 %v5755_v60 }
 0x5da   :  { %v3786_v45 = vpop.eup %3785 }
 0x5db   :  { %v2083_v61 = vmul.f32 %v3786_v45, %v2078_v51  ;;  %v7109_v51 = vld [vmem:[#allocation60_spill] sm:$0xff]  ;;  %v7110_v45 = vld [vmem:[#allocation61_spill] sm:$0xff] }
 0x5dd   :  { %v2084_v43 = vpack.c.bf16 %v2083_v61, %v2083_v61  ;;  %v7111_v61 = vld [vmem:[#allocation62_spill] sm:$0xff] }
 0x5df   :  { %2118 = vmatmul.mubr.bf16.vlgmr.msra.gmra.mrb[48].mxu0 %v2084_v43  ;;  %2159 = vmatmul.mubr.bf16.vlgmr.msra.gmra.mrb[48].mxu1 %v2084_v43  ;;  %v7112_v43 = vld [vmem:[#allocation63_spill] sm:$0xff] }
 0x5e0   :  { %2188 = vmatpush1.bf16.msra.mxu0 %v5037_v40  ;;  %2229 = vmatpush1.bf16.msra.mxu1 %v5043_v24  ;;  %v3788_v40 = vpop.eup %3787 }
 0x5e1   :  { %2189 = vmatprep.subr.bf16.mxu0 %v5049_v21  ;;  %2230 = vmatprep.subr.bf16.mxu1 %v5055_v28  ;;  %v2179_v24 = vmul.f32 0.5, %v3788_v40  ;;  %v3790_v21 = vpop.eup %3789  ;;  %v7113_v40 = vld [vmem:[#allocation64_spill] sm:$0xff] }
 0x5e2   :  { %2219 = vmatprep.mubr.bf16.mxu0 %v6835_v11  ;;  %2260 = vmatprep.mubr.bf16.mxu1 %v6835_v11 }
 0x5e3   :  { %v2180_v28 = vadd.f32 0.5, %v2179_v24  ;;  %v7114_v24 = vld [vmem:[#allocation65_spill] sm:$0xff] }
 0x5e4   :  { %2190 = vmatpush1.bf16.msra.mxu0 %v5063_v20  ;;  %2231 = vmatpush1.bf16.msra.mxu1 %v5069_v17 }
 0x5e5   :  { %2191 = vmatprep.subr.bf16.mxu0 %v5075_v23  ;;  %2232 = vmatprep.subr.bf16.mxu1 %v5081_v38  ;;  %v2185_v20 = vmul.f32 %v3790_v21, %v2180_v28  ;;  %v7078_v23 = vld [vmem:[#allocation11_spill] sm:$0xff]  ;;  %v7079_v38 = vld [vmem:[#allocation12_spill] sm:$0xff]  ;;  %v7115_v21 = vld [vmem:[#allocation66_spill] sm:$0xff] }
 0x5e6   :  { %v7116_v28 = vld [vmem:[#allocation67_spill] sm:$0xff] }
 0x5e7   :  { %v2186_v17 = vpack.c.bf16 %v2185_v20, %v2185_v20  ;;  %v7117_v20 = vld [vmem:[#allocation68_spill] sm:$0xff] }
 0x5e8   :  { %2192 = vmatpush1.bf16.msra.mxu0 %v5088_v27  ;;  %2233 = vmatpush1.bf16.msra.mxu1 %v5094_v19  ;;  %v7080_v27 = vld [vmem:[#allocation13_spill] sm:$0xff]  ;;  %v7081_v19 = vld [vmem:[#allocation14_spill] sm:$0xff] }
 0x5e9   :  { %2193 = vmatprep.subr.bf16.mxu0 %v5100_v9  ;;  %2234 = vmatprep.subr.bf16.mxu1 %v5106_v39  ;;  %v7082_v9 = vld [vmem:[#allocation15_spill] sm:$0xff]  ;;  %v7083_v39 = vld [vmem:[#allocation16_spill] sm:$0xff] }
 0x5ec   :  { %2194 = vmatpush1.bf16.msra.mxu0 %v5113_v31  ;;  %2235 = vmatpush1.bf16.msra.mxu1 %v5119_v8  ;;  %v7084_v31 = vld [vmem:[#allocation17_spill] sm:$0xff]  ;;  %v7085_v8 = vld [vmem:[#allocation18_spill] sm:$0xff] }
 0x5ed   :  { %2195 = vmatprep.subr.bf16.mxu0 %v5125_v22  ;;  %2236 = vmatprep.subr.bf16.mxu1 %v5131_v1  ;;  %v7086_v22 = vld [vmem:[#allocation19_spill] sm:$0xff]  ;;  %v7087_v1 = vld [vmem:[#allocation20_spill] sm:$0xff] }
 0x5f0   :  { %2196 = vmatpush1.bf16.msra.mxu0 %v5137_v29  ;;  %2237 = vmatpush1.bf16.msra.mxu1 %v7013_v44  ;;  %v7088_v29 = vld [vmem:[#allocation21_spill] sm:$0xff]  ;;  %v7091_v44 = vld [vmem:[#allocation31_spill] sm:$0xff] }
 0x5f1   :  { %2197 = vmatprep.subr.bf16.mxu0 %v5281_v54  ;;  %2238 = vmatprep.subr.bf16.mxu1 %v5287_v55 }
 0x5f4   :  { %2198 = vmatpush1.bf16.msra.mxu0 %v5293_v34  ;;  %2239 = vmatpush1.bf16.msra.mxu1 %v5299_v36 }
 0x5f5   :  { %2199 = vmatprep.subr.bf16.mxu0 %v5305_v35  ;;  %2240 = vmatprep.subr.bf16.mxu1 %v5311_v37 }
 0x5f8   :  { %2200 = vmatpush1.bf16.msra.mxu0 %v5317_v62  ;;  %2241 = vmatpush1.bf16.msra.mxu1 %v5323_v63 }
 0x5f9   :  { %2201 = vmatprep.subr.bf16.mxu0 %v5329_v3  ;;  %2242 = vmatprep.subr.bf16.mxu1 %v5335_v5 }
 0x5fc   :  { %2202 = vmatpush1.bf16.msra.mxu0 %v5341_v6  ;;  %2243 = vmatpush1.bf16.msra.mxu1 %v5347_v26 }
 0x5fd   :  { %2269 = vmatprep.subr.bf16.mxu0 %v5355_v30  ;;  %2310 = vmatprep.subr.bf16.mxu1 %v5361_v32 }
 0x5ff   :  { %2220 = vmatmul.mubr.bf16.vlgmr.msra.gmra.mrb[52].mxu0 %v2186_v17  ;;  %2261 = vmatmul.mubr.bf16.vlgmr.msra.gmra.mrb[52].mxu1 %v2186_v17 }
 0x600   :  { %2270 = vmatpush1.bf16.msra.mxu0 %v5369_v33  ;;  %2311 = vmatpush1.bf16.msra.mxu1 %v5375_v25 }
 0x601   :  { %2271 = vmatprep.subr.bf16.mxu0 %v7078_v23  ;;  %2312 = vmatprep.subr.bf16.mxu1 %v7079_v38 }
 0x602   :  { %2301 = vmatprep.mubr.bf16.mxu0 %v6835_v11  ;;  %2342 = vmatprep.mubr.bf16.mxu1 %v6835_v11 }
 0x604   :  { %2272 = vmatpush1.bf16.msra.mxu0 %v7080_v27  ;;  %2313 = vmatpush1.bf16.msra.mxu1 %v7081_v19 }
 0x605   :  { %2273 = vmatprep.subr.bf16.mxu0 %v7082_v9  ;;  %2314 = vmatprep.subr.bf16.mxu1 %v7083_v39 }
 0x608   :  { %2274 = vmatpush1.bf16.msra.mxu0 %v7084_v31  ;;  %2315 = vmatpush1.bf16.msra.mxu1 %v7085_v8 }
 0x609   :  { %2275 = vmatprep.subr.bf16.mxu0 %v7086_v22  ;;  %2316 = vmatprep.subr.bf16.mxu1 %v7087_v1 }
 0x60c   :  { %2276 = vmatpush1.bf16.msra.mxu0 %v7088_v29  ;;  %2317 = vmatpush1.bf16.msra.mxu1 %v7089_v59 }
 0x60d   :  { %2277 = vmatprep.subr.bf16.mxu0 %v7090_v46  ;;  %2318 = vmatprep.subr.bf16.mxu1 %v7091_v44 }
 0x610   :  { %2278 = vmatpush1.bf16.msra.mxu0 %v7092_v47  ;;  %2319 = vmatpush1.bf16.msra.mxu1 %v7093_v50 }
 0x611   :  { %2279 = vmatprep.subr.bf16.mxu0 %v7094_v4  ;;  %2320 = vmatprep.subr.bf16.mxu1 %v7095_v18 }
 0x614   :  { %2280 = vmatpush1.bf16.msra.mxu0 %v7096_v56  ;;  %2321 = vmatpush1.bf16.msra.mxu1 %v7097_v0 }
 0x615   :  { %2281 = vmatprep.subr.bf16.mxu0 %v7098_v7  ;;  %2322 = vmatprep.subr.bf16.mxu1 %v7099_v13 }
 0x618   :  { %2282 = vmatpush1.bf16.msra.mxu0 %v7100_v42  ;;  %2323 = vmatpush1.bf16.msra.mxu1 %v7101_v15 }
 0x619   :  { %2283 = vmatprep.subr.bf16.mxu0 %v7102_v2  ;;  %2324 = vmatprep.subr.bf16.mxu1 %v7103_v57  ;;  %v7147_v57 = vld [vmem:[#allocation46_spill] sm:$0xff] }
 0x61c   :  { %2284 = vmatpush1.bf16.msra.mxu0 %v7104_v53  ;;  %2325 = vmatpush1.bf16.msra.mxu1 %v7105_v52  ;;  %v7144_v52 = vld [vmem:[#allocation5_spill] sm:$0xff] }
 0x61d   :  { %2371 = vmatprep.subr.bf16.mxu0 %v7106_v49  ;;  %2412 = vmatprep.subr.bf16.mxu1 %v7107_v58  ;;  %v7143_v49 = vld [vmem:[#allocation44_spill] sm:$0xff] }
 0x61f   :  { %2302 = vmatmul.mubr.bf16.vlgmr.msra.gmra.mrb[48].mxu0 %v2186_v17  ;;  %2343 = vmatmul.mubr.bf16.vlgmr.msra.gmra.mrb[48].mxu1 %v2186_v17  ;;  %v7118_v17 = vld [vmem:[#allocation69_spill] sm:$0xff] }
 0x620   :  { %2372 = vmatpush1.bf16.msra.mxu0 %v7108_v41  ;;  %2413 = vmatpush1.bf16.msra.mxu1 %v7109_v51  ;;  %v7121_v51 = vld [vmem:[#allocation72_spill] sm:$0xff]  ;;  %v7122_v41 = vld [vmem:[#allocation73_spill] sm:$0xff] }
 0x621   :  { %2373 = vmatprep.subr.bf16.mxu0 %v7110_v45  ;;  %2414 = vmatprep.subr.bf16.mxu1 %v7111_v61  ;;  %v7119_v45 = vld [vmem:[#allocation70_spill] sm:$0xff]  ;;  %v7120_v61 = vld [vmem:[#allocation71_spill] sm:$0xff] }
 0x622   :  { %2403 = vmatprep.mubr.bf16.mxu0 %v6835_v11  ;;  %2444 = vmatprep.mubr.bf16.mxu1 %v6835_v11 }
 0x624   :  { %2374 = vmatpush1.bf16.msra.mxu0 %v7112_v43  ;;  %2415 = vmatpush1.bf16.msra.mxu1 %v7113_v40  ;;  %v7123_v43 = vld [vmem:[#allocation74_spill] sm:$0xff]  ;;  %v7124_v40 = vld [vmem:[#allocation75_spill] sm:$0xff] }
 0x625   :  { %2375 = vmatprep.subr.bf16.mxu0 %v7114_v24  ;;  %2416 = vmatprep.subr.bf16.mxu1 %v7115_v21  ;;  %v7125_v24 = vld [vmem:[#allocation76_spill] sm:$0xff]  ;;  %v7126_v21 = vld [vmem:[#allocation77_spill] sm:$0xff] }
 0x628   :  { %2376 = vmatpush1.bf16.msra.mxu0 %v7116_v28  ;;  %2417 = vmatpush1.bf16.msra.mxu1 %v7117_v20  ;;  %v7127_v28 = vld [vmem:[#allocation78_spill] sm:$0xff]  ;;  %v7128_v20 = vld [vmem:[#allocation79_spill] sm:$0xff] }
 0x629   :  { %2377 = vmatprep.subr.bf16.mxu0 %v7118_v17  ;;  %2418 = vmatprep.subr.bf16.mxu1 %v7119_v45  ;;  %v7129_v17 = vld [vmem:[#allocation80_spill] sm:$0xff]  ;;  %v7130_v45 = vld [vmem:[#allocation81_spill] sm:$0xff] }
 0x62c   :  { %2378 = vmatpush1.bf16.msra.mxu0 %v7120_v61  ;;  %2419 = vmatpush1.bf16.msra.mxu1 %v7121_v51  ;;  %v7131_v61 = vld [vmem:[#allocation82_spill] sm:$0xff]  ;;  %v7132_v51 = vld [vmem:[#allocation83_spill] sm:$0xff] }
 0x62d   :  { %2379 = vmatprep.subr.bf16.mxu0 %v7122_v41  ;;  %2420 = vmatprep.subr.bf16.mxu1 %v7123_v43  ;;  %v7133_v41 = vld [vmem:[#allocation84_spill] sm:$0xff]  ;;  %v7134_v43 = vld [vmem:[#allocation85_spill] sm:$0xff] }
 0x630   :  { %2380 = vmatpush1.bf16.msra.mxu0 %v7124_v40  ;;  %2421 = vmatpush1.bf16.msra.mxu1 %v7125_v24  ;;  %v7135_v40 = vld [vmem:[#allocation86_spill] sm:$0xff]  ;;  %v7136_v24 = vld [vmem:[#allocation35_spill] sm:$0xff] }
 0x631   :  { %2381 = vmatprep.subr.bf16.mxu0 %v7126_v21  ;;  %2422 = vmatprep.subr.bf16.mxu1 %v7127_v28  ;;  %v7137_v21 = vld [vmem:[#allocation36_spill] sm:$0xff]  ;;  %v7138_v28 = vld [vmem:[#allocation9_spill] sm:$0xff] }
 0x634   :  { %2382 = vmatpush1.bf16.msra.mxu0 %v7128_v20  ;;  %2423 = vmatpush1.bf16.msra.mxu1 %v7129_v17  ;;  %v7139_v20 = vld [vmem:[#allocation10_spill] sm:$0xff]  ;;  %v7140_v17 = vld [vmem:[#allocation4_spill] sm:$0xff] }
 0x635   :  { %2383 = vmatprep.subr.bf16.mxu0 %v7130_v45  ;;  %2424 = vmatprep.subr.bf16.mxu1 %v7131_v61  ;;  %v7141_v45 = vld [vmem:[#allocation43_spill] sm:$0xff]  ;;  %v7142_v61 = vld [vmem:[#allocation6_spill] sm:$0xff] }
 0x636   :  { %v456_v58 = vadd.f32 %v7141_v45, %v7140_v17 }
 0x638   :  { %2384 = vmatpush1.bf16.msra.mxu0 %v7132_v51  ;;  %2425 = vmatpush1.bf16.msra.mxu1 %v7133_v41  ;;  %v529_v51 = vadd.f32 %v7143_v49, %v7142_v61  ;;  %v7145_v41 = vld [vmem:[#allocation45_spill] sm:$0xff] }
 0x639   :  { %2385 = vmatprep.subr.bf16.mxu0 %v7134_v43  ;;  %2426 = vmatprep.subr.bf16.mxu1 %v7135_v40  ;;  %v458_v53 = vadd.f32 %v7145_v41, %v7144_v52  ;;  %v7146_v43 = vld [vmem:[#allocation7_spill] sm:$0xff] }
 0x63a   :  { %v531_v40 = vadd.f32 %v7147_v57, %v7146_v43 }
 0x63c   :  { %2386 = vmatpush1.bf16.msra.mxu0 %v7136_v24  ;;  %2427 = vmatpush1.bf16.msra.mxu1 %v7137_v21 }
 0x63d   :  { %2473 = vmatprep.subr.bf16.mxu0 %v7138_v28  ;;  %2514 = vmatprep.subr.bf16.mxu1 %v7139_v20 }
 0x6d2   :  { %v2221_v2 = vpop.f32.mrb[52].mxu0  ;;  %v2262_v24 = vpop.f32.mrb[52].mxu1 }
 0x6d3   :  { %v2453_v15 = vadd.f32 %v2221_v2, %v456_v58  ;;  %v2455_v21 = vadd.f32 %v2262_v24, %v529_v51  ;;  %v2223_v42 = vpop.f32.mrb[53].mxu0  ;;  %v2264_v28 = vpop.f32.mrb[53].mxu1 }
 0x6d4   :  { %v2454_v13 = vadd.f32 %v2223_v42, %v458_v53  ;;  %v5876_v20 = vadd.f32 %v2264_v28, %v531_v40  ;;  %v2225_v7 = vpop.f32.mrb[54].mxu0  ;;  %v2266_v45 = vpop.f32.mrb[54].mxu1 }
 0x6d5   :  { %3791 = vtanh.f32 %v2453_v15  ;;  %v2226_v17 = vpop.f32.mrb[55].mxu0  ;;  %v2267_v49 = vpop.f32.mrb[55].mxu1 }
 0x6d6   :  { %3793 = vtanh.f32 %v2454_v13 }
 0x6d7   :  { %3795 = vtanh.f32 %v2455_v21 }
 0x6df   :  { %v3792_v41 = vpop.eup %3791 }
 0x6e0   :  { %v2461_v52 = vmul.f32 0.5, %v3792_v41  ;;  %v3794_v61 = vpop.eup %3793 }
 0x6e1   :  { %v2463_v43 = vmul.f32 0.5, %v3794_v61  ;;  %v3796_v0 = vpop.eup %3795 }
 0x6e2   :  { %v2462_v57 = vadd.f32 0.5, %v2461_v52 }
 0x6e3   :  { %v2464_v2 = vadd.f32 0.5, %v2463_v43 }
 0x6e4   :  { %v2468_v58 = vmul.f32 %v3796_v0, %v2462_v57 }
 0x6e5   :  { %v2467_v51 = vmul.f32 %v2464_v2, %v5755_v60 }
 0x6e7   :  { %v5879_v42 = vadd.f32 %v2468_v58, %v2467_v51 }
 0x6f2   :  { %v2303_v53 = vpop.f32.mrb[48].mxu0  ;;  %v2344_v7 = vpop.f32.mrb[48].mxu1 }
 0x6f3   :  { %v2304_v15 = vadd.f32 %v2303_v53, %v4888_v10  ;;  %v2305_v40 = vpop.f32.mrb[49].mxu0  ;;  %v2346_v24 = vpop.f32.mrb[49].mxu1  ;;  %v2345_v52 = vadd.f32 %v2344_v7, %v4896_v16 }
 0x6f4   :  { %v2306_v13 = vadd.f32 %v2305_v40, %v4892_v14  ;;  %v2307_v21 = vpop.f32.mrb[50].mxu0  ;;  %v2348_v17 = vpop.f32.mrb[50].mxu1  ;;  %v2347_v60 = vadd.f32 %v2346_v24, %v4903_v12 }
 0x6f5   :  { %3797 = vtanh.f32 %v2304_v15  ;;  %v2308_v61 = vpop.f32.mrb[51].mxu0  ;;  %v2349_v43 = vpop.f32.mrb[51].mxu1  ;;  %v5892_v17 = vld [vmem:[%s6547_s1 + $0x100] ss:$16 sps:$4 sm:$0xff]  }
 0x6f6   :  { %3799 = vtanh.f32 %v2306_v13  ;;  %v5910_v61 = vld [vmem:[%s6547_s1 + $0x12c] ss:$16 sps:$4 sm:$0xff]   ;;  %v5918_v43 = vld [vmem:[%s6547_s1 + $0x120] ss:$16 sps:$4 sm:$0xff]  }
 0x6f7   :  { %3801 = vtanh.f32 %v2345_v52  ;;  %v5904_v52 = vld [vmem:[%s6547_s1 + $0x124] ss:$16 sps:$4 sm:$0xff]  }
 0x6f8   :  { %3803 = vtanh.f32 %v2347_v60  ;;  %v5924_v60 = vld [vmem:[%s6547_s1 + $0x128] ss:$16 sps:$4 sm:$0xff]  }
 0x6ff   :  { %v3798_v0 = vpop.eup %3797 }
 0x700   :  { %v2359_v28 = vmul.f32 0.5, %v3798_v0  ;;  %v3800_v45 = vpop.eup %3799  ;;  %v5930_v0 = vld [vmem:[%s6547_s1 + $0x144] ss:$16 sps:$4 sm:$0xff]  }
 0x701   :  { %v2361_v41 = vmul.f32 0.5, %v3800_v45  ;;  %v3802_v57 = vpop.eup %3801  ;;  %v5943_v45 = vld [vmem:[%s6547_s1 + $0x140] ss:$16 sps:$4 sm:$0xff]  }
 0x702   :  { %v2360_v49 = vadd.f32 0.5, %v2359_v28  ;;  %v3804_v7 = vpop.eup %3803  ;;  %v5936_v28 = vld [vmem:[%s6547_s1 + $0x14c] ss:$16 sps:$4 sm:$0xff]  }
 0x703   :  { %v2362_v2 = vadd.f32 0.5, %v2361_v41  ;;  %v2363_v15 = vmul.f32 0.5, %v3804_v7  ;;  %v5955_v41 = vld [vmem:[%s6547_s1 + $0x164] ss:$16 sps:$4 sm:$0xff]  }
 0x704   :  { %v2366_v58 = vmul.f32 %v3802_v57, %v2360_v49  ;;  %v5949_v49 = vld [vmem:[%s6547_s1 + $0x148] ss:$16 sps:$4 sm:$0xff]   ;;  %v5968_v57 = vld [vmem:[%s6547_s1 + $0x160] ss:$16 sps:$4 sm:$0xff]  }
 0x705   :  { %v2365_v51 = vmul.f32 %v2362_v2, %v5762_v48  ;;  %v2364_v40 = vadd.f32 0.5, %v2363_v15  ;;  %v5898_v48 = vld [vmem:[%s6547_s1 + $0x108] ss:$16 sps:$4 sm:$0xff]   ;;  %v5992_v15 = vld [vmem:[%s6547_s1 + $0x180] ss:$16 sps:$4 sm:$0xff]  }
 0x706   :  { %v5974_v2 = vld [vmem:[%s6547_s1 + $0x168] ss:$16 sps:$4 sm:$0xff]  }
 0x707   :  { %v5886_v53 = vadd.f32 %v2366_v58, %v2365_v51  ;;  %v5980_v58 = vld [vmem:[%s6547_s1 + $0x184] ss:$16 sps:$4 sm:$0xff]   ;;  %v5986_v51 = vld [vmem:[%s6547_s1 + $0x18c] ss:$16 sps:$4 sm:$0xff]  }
 0x709   :  { %3805 = vtanh.f32 %v5886_v53 }
 0x70a   :  { %3807 = vtanh.f32 %v5876_v20  ;;  %v5961_v20 = vld [vmem:[%s6547_s1 + $0x16c] ss:$16 sps:$4 sm:$0xff]  }
 0x70b   :  { %3809 = vtanh.f32 %v5879_v42 }
 0x713   :  { %v3806_v13 = vpop.eup %3805 }
 0x714   :  { %v2369_v24 = vmul.f32 %v3806_v13, %v2364_v40  ;;  %v3808_v7 = vpop.eup %3807  ;;  %v5998_v40 = vld [vmem:[%s6547_s1 + $0x188] ss:$16 sps:$4 sm:$0xff]  }
 0x715   :  { %7148 = vst [vmem:[#allocation37_spill] sm:$0xff] %v5998_v40  ;;  %v2465_v13 = vmul.f32 0.5, %v3808_v7  ;;  %v7183_v7 = vld [vmem:[#allocation82_spill] sm:$0xff] }
 0x716   :  { %v2370_v21 = vpack.c.bf16 %v2369_v24, %v2369_v24  ;;  %v3810_v24 = vpop.eup %3809 }
 0x718   :  { %2404 = vmatmul.mubr.bf16.vlgmr.msra.gmra.mrb[56].mxu0 %v2370_v21  ;;  %2445 = vmatmul.mubr.bf16.vlgmr.msra.gmra.mrb[56].mxu1 %v2370_v21  ;;  %v2466_v21 = vadd.f32 0.5, %v2465_v13  ;;  %v7185_v13 = vld [vmem:[#allocation84_spill] sm:$0xff] }
 0x719   :  { %2474 = vmatpush1.bf16.msra.mxu0 %v5892_v17  ;;  %2515 = vmatpush1.bf16.msra.mxu1 %v5898_v48 }
 0x71a   :  { %2475 = vmatprep.subr.bf16.mxu0 %v5904_v52  ;;  %2516 = vmatprep.subr.bf16.mxu1 %v5910_v61 }
 0x71b   :  { %2505 = vmatprep.mubr.bf16.mxu0 %v6835_v11  ;;  %2546 = vmatprep.mubr.bf16.mxu1 %v6835_v11 }
 0x71d   :  { %2476 = vmatpush1.bf16.msra.mxu0 %v5918_v43  ;;  %2517 = vmatpush1.bf16.msra.mxu1 %v5924_v60 }
 0x71e   :  { %2477 = vmatprep.subr.bf16.mxu0 %v5930_v0  ;;  %2518 = vmatprep.subr.bf16.mxu1 %v5936_v28 }
 0x721   :  { %2478 = vmatpush1.bf16.msra.mxu0 %v5943_v45  ;;  %2519 = vmatpush1.bf16.msra.mxu1 %v5949_v49 }
 0x722   :  { %2479 = vmatprep.subr.bf16.mxu0 %v5955_v41  ;;  %2520 = vmatprep.subr.bf16.mxu1 %v5961_v20 }
 0x725   :  { %2480 = vmatpush1.bf16.msra.mxu0 %v5968_v57  ;;  %2521 = vmatpush1.bf16.msra.mxu1 %v5974_v2 }
 0x726   :  { %2481 = vmatprep.subr.bf16.mxu0 %v5980_v58  ;;  %2522 = vmatprep.subr.bf16.mxu1 %v5986_v51 }
 0x729   :  { %2482 = vmatpush1.bf16.msra.mxu0 %v5992_v15  ;;  %2523 = vmatpush1.bf16.msra.mxu1 %v5998_v40  ;;  %v2471_v40 = vmul.f32 %v3810_v24, %v2466_v21  ;;  %v7186_v24 = vld [vmem:[#allocation85_spill] sm:$0xff]  ;;  %v7187_v21 = vld [vmem:[#allocation86_spill] sm:$0xff] }
 0x72a   :  { %2483 = vmatprep.subr.bf16.mxu0 %v5281_v54  ;;  %2524 = vmatprep.subr.bf16.mxu1 %v5287_v55  ;;  %v7149_v55 = vld [vmem:[#allocation24_spill] sm:$0xff] }
 0x72b   :  { %v2472_v54 = vpack.c.bf16 %v2471_v40, %v2471_v40  ;;  %v7184_v40 = vld [vmem:[#allocation83_spill] sm:$0xff] }
 0x72d   :  { %2484 = vmatpush1.bf16.msra.mxu0 %v5293_v34  ;;  %2525 = vmatpush1.bf16.msra.mxu1 %v5299_v36  ;;  %v7150_v34 = vld [vmem:[#allocation25_spill] sm:$0xff]  ;;  %v7151_v36 = vld [vmem:[#allocation26_spill] sm:$0xff] }
 0x72e   :  { %2485 = vmatprep.subr.bf16.mxu0 %v5305_v35  ;;  %2526 = vmatprep.subr.bf16.mxu1 %v5311_v37  ;;  %v7152_v35 = vld [vmem:[#allocation27_spill] sm:$0xff]  ;;  %v7153_v37 = vld [vmem:[#allocation28_spill] sm:$0xff] }
 0x731   :  { %2486 = vmatpush1.bf16.msra.mxu0 %v5317_v62  ;;  %2527 = vmatpush1.bf16.msra.mxu1 %v5323_v63  ;;  %v7154_v62 = vld [vmem:[#allocation29_spill] sm:$0xff]  ;;  %v7155_v63 = vld [vmem:[#allocation30_spill] sm:$0xff] }
 0x732   :  { %2487 = vmatprep.subr.bf16.mxu0 %v5329_v3  ;;  %2528 = vmatprep.subr.bf16.mxu1 %v5335_v5  ;;  %v7156_v3 = vld [vmem:[#allocation55_spill] sm:$0xff]  ;;  %v7157_v5 = vld [vmem:[#allocation56_spill] sm:$0xff] }
 0x735   :  { %2488 = vmatpush1.bf16.msra.mxu0 %v5341_v6  ;;  %2529 = vmatpush1.bf16.msra.mxu1 %v5347_v26  ;;  %v7158_v6 = vld [vmem:[#allocation57_spill] sm:$0xff]  ;;  %v7159_v26 = vld [vmem:[#allocation58_spill] sm:$0xff] }
 0x736   :  { %2555 = vmatprep.subr.bf16.mxu0 %v5355_v30  ;;  %2596 = vmatprep.subr.bf16.mxu1 %v5361_v32  ;;  %v7160_v30 = vld [vmem:[#allocation59_spill] sm:$0xff]  ;;  %v7161_v32 = vld [vmem:[#allocation60_spill] sm:$0xff] }
 0x738   :  { %2506 = vmatmul.mubr.bf16.vlgmr.msra.gmra.mrb[60].mxu0 %v2472_v54  ;;  %2547 = vmatmul.mubr.bf16.vlgmr.msra.gmra.mrb[60].mxu1 %v2472_v54 }
 0x739   :  { %2556 = vmatpush1.bf16.msra.mxu0 %v5369_v33  ;;  %2597 = vmatpush1.bf16.msra.mxu1 %v5375_v25  ;;  %v7162_v33 = vld [vmem:[#allocation61_spill] sm:$0xff]  ;;  %v7163_v25 = vld [vmem:[#allocation62_spill] sm:$0xff] }
 0x73a   :  { %2557 = vmatprep.subr.bf16.mxu0 %v7078_v23  ;;  %2598 = vmatprep.subr.bf16.mxu1 %v7079_v38  ;;  %v7164_v23 = vld [vmem:[#allocation63_spill] sm:$0xff]  ;;  %v7165_v38 = vld [vmem:[#allocation64_spill] sm:$0xff] }
 0x73b   :  { %2587 = vmatprep.mubr.bf16.mxu0 %v6835_v11  ;;  %2628 = vmatprep.mubr.bf16.mxu1 %v6835_v11 }
 0x73d   :  { %2558 = vmatpush1.bf16.msra.mxu0 %v7080_v27  ;;  %2599 = vmatpush1.bf16.msra.mxu1 %v7081_v19  ;;  %v7166_v27 = vld [vmem:[#allocation65_spill] sm:$0xff]  ;;  %v7167_v19 = vld [vmem:[#allocation66_spill] sm:$0xff] }
 0x73e   :  { %2559 = vmatprep.subr.bf16.mxu0 %v7082_v9  ;;  %2600 = vmatprep.subr.bf16.mxu1 %v7083_v39  ;;  %v7168_v9 = vld [vmem:[#allocation67_spill] sm:$0xff]  ;;  %v7169_v39 = vld [vmem:[#allocation68_spill] sm:$0xff] }
 0x741   :  { %2560 = vmatpush1.bf16.msra.mxu0 %v7084_v31  ;;  %2601 = vmatpush1.bf16.msra.mxu1 %v7085_v8  ;;  %v7170_v31 = vld [vmem:[#allocation69_spill] sm:$0xff]  ;;  %v7171_v8 = vld [vmem:[#allocation70_spill] sm:$0xff] }
 0x742   :  { %2561 = vmatprep.subr.bf16.mxu0 %v7086_v22  ;;  %2602 = vmatprep.subr.bf16.mxu1 %v7087_v1  ;;  %v7172_v22 = vld [vmem:[#allocation71_spill] sm:$0xff]  ;;  %v7173_v1 = vld [vmem:[#allocation72_spill] sm:$0xff] }
 0x745   :  { %2562 = vmatpush1.bf16.msra.mxu0 %v7088_v29  ;;  %2603 = vmatpush1.bf16.msra.mxu1 %v7089_v59  ;;  %v7174_v29 = vld [vmem:[#allocation73_spill] sm:$0xff]  ;;  %v7175_v59 = vld [vmem:[#allocation74_spill] sm:$0xff] }
 0x746   :  { %2563 = vmatprep.subr.bf16.mxu0 %v7090_v46  ;;  %2604 = vmatprep.subr.bf16.mxu1 %v7091_v44  ;;  %v7176_v46 = vld [vmem:[#allocation75_spill] sm:$0xff]  ;;  %v7177_v44 = vld [vmem:[#allocation76_spill] sm:$0xff] }
 0x749   :  { %2564 = vmatpush1.bf16.msra.mxu0 %v7092_v47  ;;  %2605 = vmatpush1.bf16.msra.mxu1 %v7093_v50  ;;  %v7178_v47 = vld [vmem:[#allocation77_spill] sm:$0xff]  ;;  %v7179_v50 = vld [vmem:[#allocation78_spill] sm:$0xff] }
 0x74a   :  { %2565 = vmatprep.subr.bf16.mxu0 %v7094_v4  ;;  %2606 = vmatprep.subr.bf16.mxu1 %v7095_v18  ;;  %v7180_v4 = vld [vmem:[#allocation79_spill] sm:$0xff]  ;;  %v7181_v18 = vld [vmem:[#allocation80_spill] sm:$0xff] }
 0x74d   :  { %2566 = vmatpush1.bf16.msra.mxu0 %v7096_v56  ;;  %2607 = vmatpush1.bf16.msra.mxu1 %v7149_v55  ;;  %v7182_v56 = vld [vmem:[#allocation81_spill] sm:$0xff]  ;;  %v7189_v55 = vld [vmem:[#allocation36_spill] sm:$0xff] }
 0x74e   :  { %2567 = vmatprep.subr.bf16.mxu0 %v7150_v34  ;;  %2608 = vmatprep.subr.bf16.mxu1 %v7151_v36  ;;  %v3975_v34 = vld [vmem:[%s6547_s1 + $0x104] ss:$16 sps:$4 sm:$0xff]   ;;  %v3976_v36 = vld [vmem:[%s6547_s1 + $0x10c] ss:$16 sps:$4 sm:$0xff]  }
 0x751   :  { %2568 = vmatpush1.bf16.msra.mxu0 %v7152_v35  ;;  %2609 = vmatpush1.bf16.msra.mxu1 %v7153_v37  ;;  %v7190_v35 = vld [vmem:[#allocation4_spill] sm:$0xff]  ;;  %v7191_v37 = vld [vmem:[#allocation47_spill] sm:$0xff] }
 0x752   :  { %2569 = vmatprep.subr.bf16.mxu0 %v7154_v62  ;;  %2610 = vmatprep.subr.bf16.mxu1 %v7155_v63  ;;  %v462_v62 = vadd.f32 %v7191_v37, %v7190_v35  ;;  %v7192_v63 = vld [vmem:[#allocation6_spill] sm:$0xff] }
 0x755   :  { %2570 = vmatpush1.bf16.msra.mxu0 %v7156_v3  ;;  %2611 = vmatpush1.bf16.msra.mxu1 %v7157_v5  ;;  %v7193_v3 = vld [vmem:[#allocation48_spill] sm:$0xff] }
 0x756   :  { %2657 = vmatprep.subr.bf16.mxu0 %v7158_v6  ;;  %2698 = vmatprep.subr.bf16.mxu1 %v7159_v26  ;;  %v535_v5 = vadd.f32 %v7193_v3, %v7192_v63  ;;  %v7194_v6 = vld [vmem:[#allocation5_spill] sm:$0xff] }
 0x757   :  { %v7195_v26 = vld [vmem:[#allocation49_spill] sm:$0xff] }
 0x758   :  { %2588 = vmatmul.mubr.bf16.vlgmr.msra.gmra.mrb[56].mxu0 %v2472_v54  ;;  %2629 = vmatmul.mubr.bf16.vlgmr.msra.gmra.mrb[56].mxu1 %v2472_v54  ;;  %v7188_v54 = vld [vmem:[#allocation35_spill] sm:$0xff] }
 0x759   :  { %2658 = vmatpush1.bf16.msra.mxu0 %v7160_v30  ;;  %2699 = vmatpush1.bf16.msra.mxu1 %v7161_v32  ;;  %v464_v30 = vadd.f32 %v7195_v26, %v7194_v6  ;;  %v7196_v32 = vld [vmem:[#allocation7_spill] sm:$0xff] }
 0x75a   :  { %2659 = vmatprep.subr.bf16.mxu0 %v7162_v33  ;;  %2700 = vmatprep.subr.bf16.mxu1 %v7163_v25  ;;  %v7197_v33 = vld [vmem:[#allocation50_spill] sm:$0xff] }
 0x75b   :  { %2689 = vmatprep.mubr.bf16.mxu0 %v6835_v11  ;;  %2730 = vmatprep.mubr.bf16.mxu1 %v6835_v11  ;;  %v537_v25 = vadd.f32 %v7197_v33, %v7196_v32 }
 0x75d   :  { %2660 = vmatpush1.bf16.msra.mxu0 %v7164_v23  ;;  %2701 = vmatpush1.bf16.msra.mxu1 %v7165_v38 }
 0x75e   :  { %2661 = vmatprep.subr.bf16.mxu0 %v7166_v27  ;;  %2702 = vmatprep.subr.bf16.mxu1 %v7167_v19 }
 0x761   :  { %2662 = vmatpush1.bf16.msra.mxu0 %v7168_v9  ;;  %2703 = vmatpush1.bf16.msra.mxu1 %v7169_v39 }
 0x762   :  { %2663 = vmatprep.subr.bf16.mxu0 %v7170_v31  ;;  %2704 = vmatprep.subr.bf16.mxu1 %v7171_v8 }
 0x765   :  { %2664 = vmatpush1.bf16.msra.mxu0 %v7172_v22  ;;  %2705 = vmatpush1.bf16.msra.mxu1 %v7173_v1 }
 0x766   :  { %2665 = vmatprep.subr.bf16.mxu0 %v7174_v29  ;;  %2706 = vmatprep.subr.bf16.mxu1 %v7175_v59 }
 0x769   :  { %2666 = vmatpush1.bf16.msra.mxu0 %v7176_v46  ;;  %2707 = vmatpush1.bf16.msra.mxu1 %v7177_v44 }
 0x76a   :  { %2667 = vmatprep.subr.bf16.mxu0 %v7178_v47  ;;  %2708 = vmatprep.subr.bf16.mxu1 %v7179_v50 }
 0x76d   :  { %2668 = vmatpush1.bf16.msra.mxu0 %v7180_v4  ;;  %2709 = vmatpush1.bf16.msra.mxu1 %v7181_v18 }
 0x76e   :  { %2669 = vmatprep.subr.bf16.mxu0 %v7182_v56  ;;  %2710 = vmatprep.subr.bf16.mxu1 %v7183_v7 }
 0x771   :  { %2670 = vmatpush1.bf16.msra.mxu0 %v7184_v40  ;;  %2711 = vmatpush1.bf16.msra.mxu1 %v7185_v13 }
 0x772   :  { %2671 = vmatprep.subr.bf16.mxu0 %v7186_v24  ;;  %2712 = vmatprep.subr.bf16.mxu1 %v7187_v21 }
 0x775   :  { %2672 = vmatpush1.bf16.msra.mxu0 %v7188_v54  ;;  %2713 = vmatpush1.bf16.msra.mxu1 %v7189_v55 }
 0x776   :  { %2759 = vmatprep.subr.bf16.mxu0 %v3975_v34  ;;  %2800 = vmatprep.subr.bf16.mxu1 %v3976_v36 }
 0x80b   :  { %v2507_v23 = vpop.f32.mrb[60].mxu0  ;;  %v2548_v38 = vpop.f32.mrb[60].mxu1 }
 0x80c   :  { %v2739_v27 = vadd.f32 %v2507_v23, %v462_v62  ;;  %v2741_v19 = vadd.f32 %v2548_v38, %v535_v5  ;;  %v2509_v9 = vpop.f32.mrb[61].mxu0  ;;  %v2550_v39 = vpop.f32.mrb[61].mxu1 }
 0x80d   :  { %v2740_v31 = vadd.f32 %v2509_v9, %v464_v30  ;;  %v2742_v8 = vadd.f32 %v2550_v39, %v537_v25  ;;  %v2511_v22 = vpop.f32.mrb[62].mxu0  ;;  %v2552_v1 = vpop.f32.mrb[62].mxu1 }
 0x80e   :  { %3811 = vtanh.f32 %v2739_v27  ;;  %v2512_v29 = vpop.f32.mrb[63].mxu0  ;;  %v2553_v59 = vpop.f32.mrb[63].mxu1 }
 0x80f   :  { %3813 = vtanh.f32 %v2740_v31 }
 0x810   :  { %3815 = vtanh.f32 %v2741_v19 }
 0x818   :  { %v3812_v46 = vpop.eup %3811 }
 0x819   :  { %v2747_v44 = vmul.f32 0.5, %v3812_v46  ;;  %v3814_v47 = vpop.eup %3813 }
 0x81a   :  { %v2749_v4 = vmul.f32 0.5, %v3814_v47  ;;  %v3816_v18 = vpop.eup %3815  ;;  %v6168_v47 = vld [vmem:[%s6547_s1 + $0x204] ss:$16 sps:$4 sm:$0xff]  }
 0x81b   :  { %v2748_v50 = vadd.f32 0.5, %v2747_v44 }
 0x81c   :  { %v2750_v56 = vadd.f32 0.5, %v2749_v4  ;;  %v6182_v4 = vld [vmem:[%s6547_s1 + $0x200] ss:$16 sps:$4 sm:$0xff]  }
 0x81d   :  { %v2754_v7 = vmul.f32 %v3816_v18, %v2748_v50  ;;  %v6174_v50 = vld [vmem:[%s6547_s1 + $0x20c] ss:$16 sps:$4 sm:$0xff]   ;;  %v6188_v18 = vld [vmem:[%s6547_s1 + $0x208] ss:$16 sps:$4 sm:$0xff]  }
 0x81e   :  { %v2753_v40 = vmul.f32 %v2750_v56, %v5879_v42  ;;  %v6194_v56 = vld [vmem:[%s6547_s1 + $0x224] ss:$16 sps:$4 sm:$0xff]  }
 0x820   :  { %v6096_v13 = vadd.f32 %v2754_v7, %v2753_v40  ;;  %v6200_v7 = vld [vmem:[%s6547_s1 + $0x22c] ss:$16 sps:$4 sm:$0xff]   ;;  %v6208_v40 = vld [vmem:[%s6547_s1 + $0x220] ss:$16 sps:$4 sm:$0xff]  }
 0x82b   :  { %v2589_v24 = vpop.f32.mrb[56].mxu0  ;;  %v2630_v21 = vpop.f32.mrb[56].mxu1 }
 0x82c   :  { %v2590_v54 = vadd.f32 %v2589_v24, %v4888_v10  ;;  %v2591_v55 = vpop.f32.mrb[57].mxu0  ;;  %v2632_v34 = vpop.f32.mrb[57].mxu1  ;;  %v2631_v3 = vadd.f32 %v2630_v21, %v4896_v16  ;;  %v6214_v24 = vld [vmem:[%s6547_s1 + $0x228] ss:$16 sps:$4 sm:$0xff]   ;;  %v6220_v21 = vld [vmem:[%s6547_s1 + $0x244] ss:$16 sps:$4 sm:$0xff]  }
 0x82d   :  { %v2592_v36 = vadd.f32 %v2591_v55, %v4892_v14  ;;  %v2593_v37 = vpop.f32.mrb[58].mxu0  ;;  %v2634_v62 = vpop.f32.mrb[58].mxu1  ;;  %v2633_v42 = vadd.f32 %v2632_v34, %v4903_v12  ;;  %v6232_v55 = vld [vmem:[%s6547_s1 + $0x240] ss:$16 sps:$4 sm:$0xff]   ;;  %v6238_v34 = vld [vmem:[%s6547_s1 + $0x248] ss:$16 sps:$4 sm:$0xff]  }
 0x82e   :  { %3817 = vtanh.f32 %v2590_v54  ;;  %v2594_v5 = vpop.f32.mrb[59].mxu0  ;;  %v2635_v26 = vpop.f32.mrb[59].mxu1  ;;  %v6226_v54 = vld [vmem:[%s6547_s1 + $0x24c] ss:$16 sps:$4 sm:$0xff]   ;;  %v6256_v62 = vld [vmem:[%s6547_s1 + $0x260] ss:$16 sps:$4 sm:$0xff]  }
 0x82f   :  { %3819 = vtanh.f32 %v2592_v36  ;;  %v6244_v36 = vld [vmem:[%s6547_s1 + $0x264] ss:$16 sps:$4 sm:$0xff]   ;;  %v6250_v37 = vld [vmem:[%s6547_s1 + $0x26c] ss:$16 sps:$4 sm:$0xff]  }
 0x830   :  { %3821 = vtanh.f32 %v2631_v3  ;;  %v6262_v3 = vld [vmem:[%s6547_s1 + $0x268] ss:$16 sps:$4 sm:$0xff]   ;;  %v6268_v5 = vld [vmem:[%s6547_s1 + $0x284] ss:$16 sps:$4 sm:$0xff]   ;;  %v6274_v26 = vld [vmem:[%s6547_s1 + $0x28c] ss:$16 sps:$4 sm:$0xff]  }
 0x831   :  { %3823 = vtanh.f32 %v2633_v42  ;;  %v6280_v42 = vld [vmem:[%s6547_s1 + $0x280] ss:$16 sps:$4 sm:$0xff]  }
 0x838   :  { %v3818_v30 = vpop.eup %3817 }
 0x839   :  { %v2645_v33 = vmul.f32 0.5, %v3818_v30  ;;  %v3820_v25 = vpop.eup %3819  ;;  %v6286_v30 = vld [vmem:[%s6547_s1 + $0x288] ss:$16 sps:$4 sm:$0xff]  }
 0x83a   :  { %v2647_v38 = vmul.f32 0.5, %v3820_v25  ;;  %v3822_v27 = vpop.eup %3821  ;;  %v6298_v25 = vld [vmem:[%s6547_s1 + $0x2ac] ss:$16 sps:$4 sm:$0xff]  }
 0x83b   :  { %v2646_v23 = vadd.f32 0.5, %v2645_v33  ;;  %v3824_v22 = vpop.eup %3823  ;;  %v6292_v33 = vld [vmem:[%s6547_s1 + $0x2a4] ss:$16 sps:$4 sm:$0xff]  }
 0x83c   :  { %v2648_v19 = vadd.f32 0.5, %v2647_v38  ;;  %v2649_v1 = vmul.f32 0.5, %v3824_v22  ;;  %v6310_v38 = vld [vmem:[%s6547_s1 + $0x2a8] ss:$16 sps:$4 sm:$0xff]   ;;  %v6340_v22 = vld [vmem:[%s6547_s1 + $0x2e4] ss:$16 sps:$4 sm:$0xff]  }
 0x83d   :  { %v2652_v9 = vmul.f32 %v3822_v27, %v2646_v23  ;;  %v6304_v23 = vld [vmem:[%s6547_s1 + $0x2a0] ss:$16 sps:$4 sm:$0xff]   ;;  %v6316_v27 = vld [vmem:[%s6547_s1 + $0x2c4] ss:$16 sps:$4 sm:$0xff]  }
 0x83e   :  { %v2651_v39 = vmul.f32 %v2648_v19, %v5886_v53  ;;  %v2650_v29 = vadd.f32 0.5, %v2649_v1  ;;  %v6322_v19 = vld [vmem:[%s6547_s1 + $0x2cc] ss:$16 sps:$4 sm:$0xff]  }
 0x83f   :  { %v6346_v1 = vld [vmem:[%s6547_s1 + $0x2ec] ss:$16 sps:$4 sm:$0xff]  }
 0x840   :  { %v6103_v31 = vadd.f32 %v2652_v9, %v2651_v39  ;;  %v6328_v9 = vld [vmem:[%s6547_s1 + $0x2c0] ss:$16 sps:$4 sm:$0xff]   ;;  %v6334_v39 = vld [vmem:[%s6547_s1 + $0x2c8] ss:$16 sps:$4 sm:$0xff]  }
 0x842   :  { %3825 = vtanh.f32 %v6103_v31 }
 0x843   :  { %3827 = vtanh.f32 %v2742_v8 }
 0x844   :  { %3829 = vtanh.f32 %v6096_v13 }
 0x84c   :  { %v3826_v59 = vpop.eup %3825 }
 0x84d   :  { %v2655_v46 = vmul.f32 %v3826_v59, %v2650_v29  ;;  %v3828_v53 = vpop.eup %3827  ;;  %v6352_v29 = vld [vmem:[%s6547_s1 + $0x2e0] ss:$16 sps:$4 sm:$0xff]   ;;  %v6358_v59 = vld [vmem:[%s6547_s1 + $0x2e8] ss:$16 sps:$4 sm:$0xff]  }
 0x84f   :  { %v2656_v44 = vpack.c.bf16 %v2655_v46, %v2655_v46  ;;  %v4021_v46 = vld [vmem:[%s6547_s1 + $0x304] ss:$16 sps:$4 sm:$0xff]  }
 0x851   :  { %2690 = vmatmul.mubr.bf16.vlgmr.msra.gmra.mrb[64].mxu0 %v2656_v44  ;;  %2731 = vmatmul.mubr.bf16.vlgmr.msra.gmra.mrb[64].mxu1 %v2656_v44  ;;  %v4022_v44 = vld [vmem:[%s6547_s1 + $0x30c] ss:$16 sps:$4 sm:$0xff]  }
 0x852   :  { %2760 = vmatpush1.bf16.msra.mxu0 %v5892_v17  ;;  %2801 = vmatpush1.bf16.msra.mxu1 %v5898_v48  ;;  %v7198_v17 = vld [vmem:[#allocation37_spill] sm:$0xff]  ;;  %v3977_v48 = vld [vmem:[%s6547_s1 + $0x1a4] ss:$16 sps:$4 sm:$0xff]  }
 0x853   :  { %2761 = vmatprep.subr.bf16.mxu0 %v5904_v52  ;;  %2802 = vmatprep.subr.bf16.mxu1 %v5910_v61  ;;  %v3978_v52 = vld [vmem:[%s6547_s1 + $0x1ac] ss:$16 sps:$4 sm:$0xff]   ;;  %v2751_v61 = vmul.f32 0.5, %v3828_v53  ;;  %v4023_v53 = vld [vmem:[%s6547_s1 + $0x300] ss:$16 sps:$4 sm:$0xff]  }
 0x854   :  { %2791 = vmatprep.mubr.bf16.mxu0 %v6835_v11  ;;  %2832 = vmatprep.mubr.bf16.mxu1 %v6835_v11 }
 0x856   :  { %2762 = vmatpush1.bf16.msra.mxu0 %v5918_v43  ;;  %2803 = vmatpush1.bf16.msra.mxu1 %v5924_v60  ;;  %v3979_v43 = vld [vmem:[%s6547_s1 + $0x1a0] ss:$16 sps:$4 sm:$0xff]   ;;  %v3980_v60 = vld [vmem:[%s6547_s1 + $0x1a8] ss:$16 sps:$4 sm:$0xff]  }
 0x857   :  { %2763 = vmatprep.subr.bf16.mxu0 %v5930_v0  ;;  %2804 = vmatprep.subr.bf16.mxu1 %v5936_v28  ;;  %v3981_v0 = vld [vmem:[%s6547_s1 + $0x1c4] ss:$16 sps:$4 sm:$0xff]   ;;  %v3982_v28 = vld [vmem:[%s6547_s1 + $0x1cc] ss:$16 sps:$4 sm:$0xff]  }
 0x85a   :  { %2764 = vmatpush1.bf16.msra.mxu0 %v5943_v45  ;;  %2805 = vmatpush1.bf16.msra.mxu1 %v5949_v49  ;;  %v3830_v45 = vpop.eup %3829  ;;  %v2752_v49 = vadd.f32 0.5, %v2751_v61  ;;  %v4027_v61 = vld [vmem:[%s6547_s1 + $0x320] ss:$16 sps:$4 sm:$0xff]  }
 0x85b   :  { %2765 = vmatprep.subr.bf16.mxu0 %v5955_v41  ;;  %2806 = vmatprep.subr.bf16.mxu1 %v5961_v20  ;;  %v3983_v41 = vld [vmem:[%s6547_s1 + $0x1c0] ss:$16 sps:$4 sm:$0xff]   ;;  %v3984_v20 = vld [vmem:[%s6547_s1 + $0x1c8] ss:$16 sps:$4 sm:$0xff]  }
 0x85e   :  { %2766 = vmatpush1.bf16.msra.mxu0 %v5968_v57  ;;  %2807 = vmatpush1.bf16.msra.mxu1 %v5974_v2  ;;  %v2757_v57 = vmul.f32 %v3830_v45, %v2752_v49  ;;  %v3985_v2 = vld [vmem:[%s6547_s1 + $0x1e4] ss:$16 sps:$4 sm:$0xff]   ;;  %v4032_v45 = vld [vmem:[%s6547_s1 + $0x348] ss:$16 sps:$4 sm:$0xff]  }
 0x85f   :  { %2767 = vmatprep.subr.bf16.mxu0 %v5980_v58  ;;  %2808 = vmatprep.subr.bf16.mxu1 %v5986_v51  ;;  %v3986_v58 = vld [vmem:[%s6547_s1 + $0x1ec] ss:$16 sps:$4 sm:$0xff]   ;;  %v3987_v51 = vld [vmem:[%s6547_s1 + $0x1e0] ss:$16 sps:$4 sm:$0xff]   ;;  %v4033_v49 = vld [vmem:[%s6547_s1 + $0x364] ss:$16 sps:$4 sm:$0xff]  }
 0x860   :  { %v6163_v8 = vpack.c.bf16 %v2757_v57, %v2757_v57  ;;  %v4036_v57 = vld [vmem:[%s6547_s1 + $0x368] ss:$16 sps:$4 sm:$0xff]  }
 0x862   :  { %2768 = vmatpush1.bf16.msra.mxu0 %v5992_v15  ;;  %2809 = vmatpush1.bf16.msra.mxu1 %v7198_v17  ;;  %v3988_v15 = vld [vmem:[%s6547_s1 + $0x1e8] ss:$16 sps:$4 sm:$0xff]  }
 0x863   :  { %2769 = vmatprep.subr.bf16.mxu0 %v3977_v48  ;;  %2810 = vmatprep.subr.bf16.mxu1 %v3978_v52  ;;  %v4024_v17 = vld [vmem:[%s6547_s1 + $0x308] ss:$16 sps:$4 sm:$0xff]   ;;  %v4025_v48 = vld [vmem:[%s6547_s1 + $0x324] ss:$16 sps:$4 sm:$0xff]   ;;  %v4026_v52 = vld [vmem:[%s6547_s1 + $0x32c] ss:$16 sps:$4 sm:$0xff]  }
 0x866   :  { %2770 = vmatpush1.bf16.msra.mxu0 %v3979_v43  ;;  %2811 = vmatpush1.bf16.msra.mxu1 %v3980_v60  ;;  %v4028_v43 = vld [vmem:[%s6547_s1 + $0x328] ss:$16 sps:$4 sm:$0xff]   ;;  %v4029_v60 = vld [vmem:[%s6547_s1 + $0x344] ss:$16 sps:$4 sm:$0xff]  }
 0x867   :  { %2771 = vmatprep.subr.bf16.mxu0 %v3981_v0  ;;  %2812 = vmatprep.subr.bf16.mxu1 %v3982_v28  ;;  %v4030_v0 = vld [vmem:[%s6547_s1 + $0x34c] ss:$16 sps:$4 sm:$0xff]   ;;  %v4031_v28 = vld [vmem:[%s6547_s1 + $0x340] ss:$16 sps:$4 sm:$0xff]  }
 0x86a   :  { %2772 = vmatpush1.bf16.msra.mxu0 %v3983_v41  ;;  %2813 = vmatpush1.bf16.msra.mxu1 %v3984_v20  ;;  %v4034_v41 = vld [vmem:[%s6547_s1 + $0x36c] ss:$16 sps:$4 sm:$0xff]   ;;  %v4035_v20 = vld [vmem:[%s6547_s1 + $0x360] ss:$16 sps:$4 sm:$0xff]  }
 0x86b   :  { %2773 = vmatprep.subr.bf16.mxu0 %v3985_v2  ;;  %2814 = vmatprep.subr.bf16.mxu1 %v3986_v58  ;;  %v4037_v2 = vld [vmem:[%s6547_s1 + $0x384] ss:$16 sps:$4 sm:$0xff]   ;;  %v4038_v58 = vld [vmem:[%s6547_s1 + $0x38c] ss:$16 sps:$4 sm:$0xff]  }
 0x86e   :  { %2774 = vmatpush1.bf16.msra.mxu0 %v3987_v51  ;;  %2815 = vmatpush1.bf16.msra.mxu1 %v3988_v15  ;;  %v4039_v51 = vld [vmem:[%s6547_s1 + $0x380] ss:$16 sps:$4 sm:$0xff]   ;;  %v4040_v15 = vld [vmem:[%s6547_s1 + $0x388] ss:$16 sps:$4 sm:$0xff]  }
 0x86f   :  { %2841 = vmatprep.subr.bf16.mxu0 %v6168_v47  ;;  %2882 = vmatprep.subr.bf16.mxu1 %v6174_v50 }
 0x871   :  { %2792 = vmatmul.mubr.bf16.vlgmr.msra.gmra.mrb[68].mxu0 %v6163_v8  ;;  %2833 = vmatmul.mubr.bf16.vlgmr.msra.gmra.mrb[68].mxu1 %v6163_v8 }
 0x872   :  { %2842 = vmatpush1.bf16.msra.mxu0 %v6182_v4  ;;  %2883 = vmatpush1.bf16.msra.mxu1 %v6188_v18 }
 0x873   :  { %2843 = vmatprep.subr.bf16.mxu0 %v6194_v56  ;;  %2884 = vmatprep.subr.bf16.mxu1 %v6200_v7 }
 0x874   :  { %2873 = vmatprep.mubr.bf16.mxu0 %v6835_v11  ;;  %2914 = vmatprep.mubr.bf16.mxu1 %v6835_v11 }
 0x876   :  { %2844 = vmatpush1.bf16.msra.mxu0 %v6208_v40  ;;  %2885 = vmatpush1.bf16.msra.mxu1 %v6214_v24 }
 0x877   :  { %2845 = vmatprep.subr.bf16.mxu0 %v6220_v21  ;;  %2886 = vmatprep.subr.bf16.mxu1 %v6226_v54 }
 0x87a   :  { %2846 = vmatpush1.bf16.msra.mxu0 %v6232_v55  ;;  %2887 = vmatpush1.bf16.msra.mxu1 %v6238_v34 }
 0x87b   :  { %2847 = vmatprep.subr.bf16.mxu0 %v6244_v36  ;;  %2888 = vmatprep.subr.bf16.mxu1 %v6250_v37 }
 0x87e   :  { %2848 = vmatpush1.bf16.msra.mxu0 %v6256_v62  ;;  %2889 = vmatpush1.bf16.msra.mxu1 %v6262_v3 }
 0x87f   :  { %2849 = vmatprep.subr.bf16.mxu0 %v6268_v5  ;;  %2890 = vmatprep.subr.bf16.mxu1 %v6274_v26 }
 0x882   :  { %2850 = vmatpush1.bf16.msra.mxu0 %v6280_v42  ;;  %2891 = vmatpush1.bf16.msra.mxu1 %v6286_v30 }
 0x883   :  { %2851 = vmatprep.subr.bf16.mxu0 %v6292_v33  ;;  %2892 = vmatprep.subr.bf16.mxu1 %v6298_v25 }
 0x886   :  { %2852 = vmatpush1.bf16.msra.mxu0 %v6304_v23  ;;  %2893 = vmatpush1.bf16.msra.mxu1 %v6310_v38 }
 0x887   :  { %2853 = vmatprep.subr.bf16.mxu0 %v6316_v27  ;;  %2894 = vmatprep.subr.bf16.mxu1 %v6322_v19 }
 0x88a   :  { %2854 = vmatpush1.bf16.msra.mxu0 %v6328_v9  ;;  %2895 = vmatpush1.bf16.msra.mxu1 %v6334_v39 }
 0x88b   :  { %2855 = vmatprep.subr.bf16.mxu0 %v6340_v22  ;;  %2896 = vmatprep.subr.bf16.mxu1 %v6346_v1 }
 0x88e   :  { %2856 = vmatpush1.bf16.msra.mxu0 %v6352_v29  ;;  %2897 = vmatpush1.bf16.msra.mxu1 %v6358_v59 }
 0x88f   :  { %2943 = vmatprep.subr.bf16.mxu0 %v4021_v46  ;;  %2984 = vmatprep.subr.bf16.mxu1 %v4022_v44  ;;  %v4042_v46 = vld [vmem:[%s6547_s1 + $0x3ac] ss:$16 sps:$4 sm:$0xff]   ;;  %v4043_v44 = vld [vmem:[%s6547_s1 + $0x3a0] ss:$16 sps:$4 sm:$0xff]  }
 0x891   :  { %2874 = vmatmul.mubr.bf16.vlgmr.msra.gmra.mrb[64].mxu0 %v6163_v8  ;;  %2915 = vmatmul.mubr.bf16.vlgmr.msra.gmra.mrb[64].mxu1 %v6163_v8  ;;  %v4041_v8 = vld [vmem:[%s6547_s1 + $0x3a4] ss:$16 sps:$4 sm:$0xff]  }
 0x892   :  { %2944 = vmatpush1.bf16.msra.mxu0 %v4023_v53  ;;  %2985 = vmatpush1.bf16.msra.mxu1 %v4024_v17  ;;  %v4044_v53 = vld [vmem:[%s6547_s1 + $0x3a8] ss:$16 sps:$4 sm:$0xff]   ;;  %v4045_v17 = vld [vmem:[%s6547_s1 + $0x3c4] ss:$16 sps:$4 sm:$0xff]  }
 0x893   :  { %2945 = vmatprep.subr.bf16.mxu0 %v4025_v48  ;;  %2986 = vmatprep.subr.bf16.mxu1 %v4026_v52  ;;  %v4046_v48 = vld [vmem:[%s6547_s1 + $0x3cc] ss:$16 sps:$4 sm:$0xff]   ;;  %v4047_v52 = vld [vmem:[%s6547_s1 + $0x3c0] ss:$16 sps:$4 sm:$0xff]  }
 0x894   :  { %2975 = vmatprep.mubr.bf16.mxu0 %v6835_v11  ;;  %3016 = vmatprep.mubr.bf16.mxu1 %v6835_v11 }
 0x896   :  { %2946 = vmatpush1.bf16.msra.mxu0 %v4027_v61  ;;  %2987 = vmatpush1.bf16.msra.mxu1 %v4028_v43  ;;  %v4048_v61 = vld [vmem:[%s6547_s1 + $0x3c8] ss:$16 sps:$4 sm:$0xff]   ;;  %v4049_v43 = vld [vmem:[%s6547_s1 + $0x3e4] ss:$16 sps:$4 sm:$0xff]  }
 0x897   :  { %2947 = vmatprep.subr.bf16.mxu0 %v4029_v60  ;;  %2988 = vmatprep.subr.bf16.mxu1 %v4030_v0  ;;  %v4050_v60 = vld [vmem:[%s6547_s1 + $0x3ec] ss:$16 sps:$4 sm:$0xff]   ;;  %v4051_v0 = vld [vmem:[%s6547_s1 + $0x3e0] ss:$16 sps:$4 sm:$0xff]  }
 0x89a   :  { %2948 = vmatpush1.bf16.msra.mxu0 %v4031_v28  ;;  %2989 = vmatpush1.bf16.msra.mxu1 %v4032_v45  ;;  %v4052_v28 = vld [vmem:[%s6547_s1 + $0x3e8] ss:$16 sps:$4 sm:$0xff]  }
 0x89b   :  { %2949 = vmatprep.subr.bf16.mxu0 %v4033_v49  ;;  %2990 = vmatprep.subr.bf16.mxu1 %v4034_v41  ;;  %v7199_v45 = vld [vmem:[#allocation51_spill] sm:$0xff]  ;;  %v7200_v41 = vld [vmem:[#allocation52_spill] sm:$0xff] }
 0x89c   :  { %v466_v49 = vadd.f32 %v7199_v45, %v7190_v35 }
 0x89e   :  { %2950 = vmatpush1.bf16.msra.mxu0 %v4035_v20  ;;  %2991 = vmatpush1.bf16.msra.mxu1 %v4036_v57  ;;  %v539_v20 = vadd.f32 %v7200_v41, %v7192_v63  ;;  %v7201_v57 = vld [vmem:[#allocation53_spill] sm:$0xff] }
 0x89f   :  { %2951 = vmatprep.subr.bf16.mxu0 %v4037_v2  ;;  %2992 = vmatprep.subr.bf16.mxu1 %v4038_v58  ;;  %v468_v2 = vadd.f32 %v7201_v57, %v7194_v6  ;;  %v7202_v58 = vld [vmem:[#allocation54_spill] sm:$0xff] }
 0x8a2   :  { %2952 = vmatpush1.bf16.msra.mxu0 %v4039_v51  ;;  %2993 = vmatpush1.bf16.msra.mxu1 %v4040_v15  ;;  %v541_v51 = vadd.f32 %v7202_v58, %v7196_v32 }
 0x8a3   :  { %2953 = vmatprep.subr.bf16.mxu0 %v4041_v8  ;;  %2994 = vmatprep.subr.bf16.mxu1 %v4042_v46 }
 0x8a6   :  { %2954 = vmatpush1.bf16.msra.mxu0 %v4043_v44  ;;  %2995 = vmatpush1.bf16.msra.mxu1 %v4044_v53 }
 0x8a7   :  { %2955 = vmatprep.subr.bf16.mxu0 %v4045_v17  ;;  %2996 = vmatprep.subr.bf16.mxu1 %v4046_v48 }
 0x8aa   :  { %2956 = vmatpush1.bf16.msra.mxu0 %v4047_v52  ;;  %2997 = vmatpush1.bf16.msra.mxu1 %v4048_v61 }
 0x8ab   :  { %2957 = vmatprep.subr.bf16.mxu0 %v4049_v43  ;;  %2998 = vmatprep.subr.bf16.mxu1 %v4050_v60 }
 0x8ae   :  { %2958 = vmatpush1.bf16.msra.mxu0 %v4051_v0  ;;  %2999 = vmatpush1.bf16.msra.mxu1 %v4052_v28 }
 0x8af   :  { %3045 = vmatprep.subr.bf16.mxu0 %v6168_v47  ;;  %3086 = vmatprep.subr.bf16.mxu1 %v6174_v50 }
 0x944   :  { %v2793_v15 = vpop.f32.mrb[68].mxu0  ;;  %v2834_v8 = vpop.f32.mrb[68].mxu1 }
 0x945   :  { %v3025_v46 = vadd.f32 %v2793_v15, %v466_v49  ;;  %v3027_v44 = vadd.f32 %v2834_v8, %v539_v20  ;;  %v2795_v53 = vpop.f32.mrb[69].mxu0  ;;  %v2836_v47 = vpop.f32.mrb[69].mxu1 }
 0x946   :  { %v3026_v17 = vadd.f32 %v2795_v53, %v468_v2  ;;  %v3028_v50 = vadd.f32 %v2836_v47, %v541_v51  ;;  %v2797_v48 = vpop.f32.mrb[70].mxu0  ;;  %v2838_v52 = vpop.f32.mrb[70].mxu1 }
 0x947   :  { %3831 = vtanh.f32 %v3025_v46  ;;  %v2798_v35 = vpop.f32.mrb[71].mxu0  ;;  %v2839_v61 = vpop.f32.mrb[71].mxu1 }
 0x948   :  { %3833 = vtanh.f32 %v3026_v17 }
 0x949   :  { %3835 = vtanh.f32 %v3027_v44 }
 0x94a   :  { %3837 = vtanh.f32 %v3028_v50 }
 0x951   :  { %v3832_v63 = vpop.eup %3831 }
 0x952   :  { %v3033_v6 = vmul.f32 0.5, %v3832_v63  ;;  %v3834_v43 = vpop.eup %3833 }
 0x953   :  { %v3035_v32 = vmul.f32 0.5, %v3834_v43  ;;  %v3836_v0 = vpop.eup %3835 }
 0x954   :  { %v3034_v60 = vadd.f32 0.5, %v3033_v6  ;;  %v3838_v20 = vpop.eup %3837 }
 0x955   :  { %v3036_v28 = vadd.f32 0.5, %v3035_v32  ;;  %v3037_v57 = vmul.f32 0.5, %v3838_v20 }
 0x956   :  { %v3040_v45 = vmul.f32 %v3836_v0, %v3034_v60 }
 0x957   :  { %v3039_v49 = vmul.f32 %v3036_v28, %v6096_v13  ;;  %v3038_v51 = vadd.f32 0.5, %v3037_v57 }
 0x959   :  { %v3041_v41 = vadd.f32 %v3040_v45, %v3039_v49 }
 0x95b   :  { %3839 = vtanh.f32 %v3041_v41 }
 0x964   :  { %v2875_v2 = vpop.f32.mrb[64].mxu0  ;;  %v2916_v58 = vpop.f32.mrb[64].mxu1 }
 0x965   :  { %v2876_v15 = vadd.f32 %v2875_v2, %v4888_v10  ;;  %v2877_v8 = vpop.f32.mrb[65].mxu0  ;;  %v2918_v46 = vpop.f32.mrb[65].mxu1  ;;  %v2917_v13 = vadd.f32 %v2916_v58, %v4896_v16 }
 0x966   :  { %v3840_v44 = vpop.eup %3839  ;;  %v2878_v53 = vadd.f32 %v2877_v8, %v4892_v14  ;;  %v2879_v47 = vpop.f32.mrb[66].mxu0  ;;  %v2919_v35 = vadd.f32 %v2918_v46, %v4903_v12 }
 0x967   :  { %v2920_v17 = vpop.f32.mrb[66].mxu1  ;;  %v3043_v50 = vmul.f32 %v3840_v44, %v3038_v51  ;;  %3841 = vtanh.f32 %v2876_v15  ;;  %v2880_v48 = vpop.f32.mrb[67].mxu0 }
 0x968   :  { %v2921_v52 = vpop.f32.mrb[67].mxu1  ;;  %3843 = vtanh.f32 %v2878_v53 }
 0x969   :  { %3845 = vtanh.f32 %v2917_v13 }
 0x96a   :  { %3847 = vtanh.f32 %v2919_v35 }
 0x971   :  { %v3842_v61 = vpop.eup %3841 }
 0x972   :  { %v2931_v63 = vmul.f32 0.5, %v3842_v61  ;;  %v3844_v6 = vpop.eup %3843 }
 0x973   :  { %v2933_v60 = vmul.f32 0.5, %v3844_v6  ;;  %v3846_v32 = vpop.eup %3845 }
 0x974   :  { %v2932_v43 = vadd.f32 0.5, %v2931_v63  ;;  %v3848_v41 = vpop.eup %3847 }
 0x975   :  { %v2934_v0 = vadd.f32 0.5, %v2933_v60  ;;  %v2935_v20 = vmul.f32 0.5, %v3848_v41 }
 0x976   :  { %v2938_v28 = vmul.f32 %v3846_v32, %v2932_v43 }
 0x977   :  { %v2937_v45 = vmul.f32 %v2934_v0, %v6103_v31  ;;  %v2936_v57 = vadd.f32 0.5, %v2935_v20  ;;  %v3693_v31 = vld [vmem:[%s6547_s1 + $0x400] ss:$16 sps:$4 sm:$0xff]  }
 0x979   :  { %v6477_v49 = vadd.f32 %v2938_v28, %v2937_v45 }
 0x97b   :  { %3849 = vtanh.f32 %v6477_v49 }
 0x985   :  { %v3850_v2 = vpop.eup %3849 }
 0x986   :  { %v2941_v58 = vmul.f32 %v3850_v2, %v2936_v57 }
 0x988   :  { %v2942_v51 = vpack.c.bf16 %v2941_v58, %v2941_v58 }
 0x98a   :  { %2976 = vmatmul.mubr.bf16.vlgmr.msra.gmra.mrb[72].mxu0 %v2942_v51  ;;  %3017 = vmatmul.mubr.bf16.vlgmr.msra.gmra.mrb[72].mxu1 %v2942_v51 }
 0x98b   :  { %3046 = vmatpush1.bf16.msra.mxu0 %v6182_v4  ;;  %3087 = vmatpush1.bf16.msra.mxu1 %v6188_v18  ;;  %v4054_v4 = vmov 0.0   ;;  %v3694_v18 = vld [vmem:[%s6547_s1 + $0x420] ss:$16 sps:$4 sm:$0xff]  }
 0x98c   :  { %3047 = vmatprep.subr.bf16.mxu0 %v6194_v56  ;;  %3088 = vmatprep.subr.bf16.mxu1 %v6200_v7  ;;  %v3695_v56 = vld [vmem:[%s6547_s1 + $0x440] ss:$16 sps:$4 sm:$0xff]  }
 0x98d   :  { %3077 = vmatprep.mubr.bf16.mxu0 %v6835_v11  ;;  %3118 = vmatprep.mubr.bf16.mxu1 %v6835_v11  ;;  %v3044_v11 = vpack.c.bf16 %v3043_v50, %v3043_v50  ;;  %v3696_v7 = vld [vmem:[%s6547_s1 + $0x460] ss:$16 sps:$4 sm:$0xff]  }
 0x98f   :  { %3048 = vmatpush1.bf16.msra.mxu0 %v6208_v40  ;;  %3089 = vmatpush1.bf16.msra.mxu1 %v6214_v24  ;;  %v3697_v40 = vld [vmem:[%s6547_s1 + $0x480] ss:$16 sps:$4 sm:$0xff]  }
 0x990   :  { %3049 = vmatprep.subr.bf16.mxu0 %v6220_v21  ;;  %3090 = vmatprep.subr.bf16.mxu1 %v6226_v54  ;;  %v3698_v24 = vld [vmem:[%s6547_s1 + $0x4a0] ss:$16 sps:$4 sm:$0xff]  }
 0x991   :  { %v3699_v21 = vld [vmem:[%s6547_s1 + $0x4c0] ss:$16 sps:$4 sm:$0xff]  }
 0x992   :  { %v3700_v54 = vld [vmem:[%s6547_s1 + $0x4e0] ss:$16 sps:$4 sm:$0xff]  }
 0x993   :  { %3050 = vmatpush1.bf16.msra.mxu0 %v6232_v55  ;;  %3091 = vmatpush1.bf16.msra.mxu1 %v6238_v34 }
 0x994   :  { %3051 = vmatprep.subr.bf16.mxu0 %v6244_v36  ;;  %3092 = vmatprep.subr.bf16.mxu1 %v6250_v37 }
 0x997   :  { %3052 = vmatpush1.bf16.msra.mxu0 %v6256_v62  ;;  %3093 = vmatpush1.bf16.msra.mxu1 %v6262_v3 }
 0x998   :  { %3053 = vmatprep.subr.bf16.mxu0 %v6268_v5  ;;  %3094 = vmatprep.subr.bf16.mxu1 %v6274_v26 }
 0x99b   :  { %3054 = vmatpush1.bf16.msra.mxu0 %v6280_v42  ;;  %3095 = vmatpush1.bf16.msra.mxu1 %v6286_v30 }
 0x99c   :  { %3055 = vmatprep.subr.bf16.mxu0 %v6292_v33  ;;  %3096 = vmatprep.subr.bf16.mxu1 %v6298_v25 }
 0x99f   :  { %3056 = vmatpush1.bf16.msra.mxu0 %v6304_v23  ;;  %3097 = vmatpush1.bf16.msra.mxu1 %v6310_v38 }
 0x9a0   :  { %3057 = vmatprep.subr.bf16.mxu0 %v6316_v27  ;;  %3098 = vmatprep.subr.bf16.mxu1 %v6322_v19 }
 0x9a3   :  { %3058 = vmatpush1.bf16.msra.mxu0 %v6328_v9  ;;  %3099 = vmatpush1.bf16.msra.mxu1 %v6334_v39 }
 0x9a4   :  { %3059 = vmatprep.subr.bf16.mxu0 %v6340_v22  ;;  %3100 = vmatprep.subr.bf16.mxu1 %v6346_v1 }
 0x9a7   :  { %3060 = vmatpush1.bf16.msra.mxu0 %v6352_v29  ;;  %3101 = vmatpush1.bf16.msra.mxu1 %v6358_v59 }
 0x9a8   :  { %3390 = vmatprep.subr.bf16.mxu0 %v4054_v4 }
 0x9aa   :  { %3078 = vmatmul.mubr.bf16.vlgmr.msra.gmra.mrb[72].mxu0 %v3044_v11  ;;  %3119 = vmatmul.mubr.bf16.vlgmr.msra.gmra.mrb[72].mxu1 %v3044_v11 }
 0x9ab   :  { %3391 = vmatpush3.bf16.msra.mxu0 %v3693_v31  ;;  %3406 = vmatprep.mubr.msk.bf16.mxu0 %vm4055_vm0, %v4054_v4 }
 0x9ac   :  { %3392 = vmatprep.subr.bf16.mxu0 %v4054_v4 }
 0x9af   :  { %3393 = vmatpush3.bf16.msra.mxu0 %v3694_v18 }
 0x9b0   :  { %3394 = vmatprep.subr.bf16.mxu0 %v4054_v4 }
 0x9b3   :  { %3395 = vmatpush3.bf16.msra.mxu0 %v3695_v56 }
 0x9b4   :  { %3396 = vmatprep.subr.bf16.mxu0 %v4054_v4 }
 0x9b7   :  { %3397 = vmatpush3.bf16.msra.mxu0 %v3696_v7 }
 0x9b8   :  { %3398 = vmatprep.subr.bf16.mxu0 %v4054_v4 }
 0x9bb   :  { %3399 = vmatpush3.bf16.msra.mxu0 %v3697_v40 }
 0x9bc   :  { %3400 = vmatprep.subr.bf16.mxu0 %v4054_v4 }
 0x9bf   :  { %3401 = vmatpush3.bf16.msra.mxu0 %v3698_v24 }
 0x9c0   :  { %3402 = vmatprep.subr.bf16.mxu0 %v4054_v4 }
 0x9c3   :  { %3403 = vmatpush3.bf16.msra.mxu0 %v3699_v21 }
 0x9c4   :  { %3404 = vmatprep.subr.bf16.mxu0 %v4054_v4 }
 0x9c7   :  { %3405 = vmatpush3.bf16.msra.mxu0 %v3700_v54 }
 0xa7d   :  { %v3079_v55 = vpop.f32.mrb[72].mxu0  ;;  %v3120_v34 = vpop.f32.mrb[72].mxu1 }
 0xa7e   :  { %v3080_v36 = vadd.f32 %v3079_v55, %v4888_v10  ;;  %v3081_v37 = vpop.f32.mrb[73].mxu0  ;;  %v3122_v62 = vpop.f32.mrb[73].mxu1  ;;  %v3121_v42 = vadd.f32 %v3120_v34, %v4896_v16 }
 0xa7f   :  { %v3082_v3 = vadd.f32 %v3081_v37, %v4892_v14  ;;  %v3083_v5 = vpop.f32.mrb[74].mxu0  ;;  %v3124_v26 = vpop.f32.mrb[74].mxu1  ;;  %v3123_v25 = vadd.f32 %v3122_v62, %v4903_v12  ;;  %v183_v12 = vld [vmem:[%s6549_s2 + $0x2] ss:$0 sm:$0xff] }
 0xa80   :  { %3851 = vtanh.f32 %v3080_v36  ;;  %v3084_v30 = vpop.f32.mrb[75].mxu0  ;;  %v3125_v33 = vpop.f32.mrb[75].mxu1 }
 0xa81   :  { %3853 = vtanh.f32 %v3082_v3 }
 0xa82   :  { %3855 = vtanh.f32 %v3121_v42 }
 0xa83   :  { %3857 = vtanh.f32 %v3123_v25 }
 0xa8a   :  { %v3852_v23 = vpop.eup %3851 }
 0xa8b   :  { %v3135_v38 = vmul.f32 0.5, %v3852_v23  ;;  %v3854_v27 = vpop.eup %3853 }
 0xa8c   :  { %v3137_v10 = vmul.f32 0.5, %v3854_v27  ;;  %v3856_v9 = vpop.eup %3855 }
 0xa8d   :  { %v3136_v19 = vadd.f32 0.5, %v3135_v38  ;;  %v3858_v16 = vpop.eup %3857 }
 0xa8e   :  { %v3138_v39 = vadd.f32 0.5, %v3137_v10  ;;  %v3139_v29 = vmul.f32 0.5, %v3858_v16 }
 0xa8f   :  { %v3142_v14 = vmul.f32 %v3856_v9, %v3136_v19 }
 0xa90   :  { %v3141_v22 = vmul.f32 %v3138_v39, %v6477_v49  ;;  %v3140_v59 = vadd.f32 0.5, %v3139_v29 }
 0xa92   :  { %v3143_v1 = vadd.f32 %v3142_v14, %v3141_v22 }
 0xa94   :  { %3859 = vtanh.f32 %v3143_v1 }
 0xa9e   :  { %v3860_v15 = vpop.eup %3859 }
 0xa9f   :  { %v3145_v8 = vmul.f32 %v3860_v15, %v3140_v59 }
 0xaa1   :  { %v3146_v46 = vpack.c.bf16 %v3145_v8, %v3145_v8 }
 0xaa3   :  { %3407 = vmatmul.mubr.bf16.vlgmr.msra.gmra.mrb[76].mxu0 %v3146_v46 }
 0xb76   :  { %v3229_v44 = vpop.f32.mrb[76].mxu0 }
 0xb77   :  { %v3230_v53 = vadd.f32 %v3229_v44, %v183_v12  ;;  %v3408_v47 = vpop.f32.mrb[77].mxu0 }
 0xb78   :  { %v3232_v17 = vpop.f32.mrb[78].mxu0 }
 0xb79   :  { %3235 = vst [vmem:[%s6550_s3] sm:$0xff] %v3230_v53  ;;  %v3409_v50 = vpop.f32.mrb[79].mxu0 }

</bundles_post_ra>
